<compile_context>
chip_gen: v7x
topology: tpu7x:2x2x1
jax: 0.10.0
libtpu: 0.0.40
codegen_flags: <defaults>
</compile_context>

<pallas_src>
import functools

import jax
import jax.numpy as jnp
from jax.experimental import pallas as pl
from jax.experimental.pallas import tpu as pltpu

C_IN, C1, C2, C_OUT = 128, 64, 16, 5  # module hardcodes self.C = 128


def _detection_kernel(x_ref, mask_ref, w1_ref, b1_ref, w2_ref, b2_ref,
                      w3_ref, b3_ref, out_ref, *, H, W):
    HW = H * W
    x2d = x_ref[0]                                   # (C_IN, HW)

    def conv3x3_relu(src, wp_ref, b_ref, cout):
        # src: (cin, HW); wp_ref: (9*cout, cin) tap-packed weights.
        # One wide MXU matmul covers all 9 taps (full 128+ lane columns), then
        # each tap's partial slab is lane-rolled to its destination pixel,
        # border-masked (SAME padding) and accumulated on the VPU.
        part = jnp.dot(wp_ref[...], src, preferred_element_type=jnp.float32)  # (9*cout, HW)
        acc = jnp.zeros((cout, HW), jnp.float32)
        for dy in range(3):
            for dx in range(3):
                t = dy * 3 + dx
                s = (dy - 1) * W + (dx - 1)          # flattened source offset
                ptap = part[t * cout:(t + 1) * cout, :]
                if s != 0:
                    ptap = pltpu.roll(ptap, (-s) % HW, 1)   # dst[p] = part[p + s]
                acc = acc + ptap * mask_ref[t]       # (1, HW) destination validity
        return jnp.maximum(acc + b_ref[...], 0.0)    # bias + ReLU

    h1 = conv3x3_relu(x2d, w1_ref, b1_ref, C1)       # (64, HW)
    h2 = conv3x3_relu(h1, w2_ref, b2_ref, C2)        # (16, HW)
    h3 = jnp.dot(w3_ref[...], h2, preferred_element_type=jnp.float32) + b3_ref[...]
    out_ref[0] = jnp.maximum(h3, 0.0)                # (5, HW): lane-dense NCHW store


def detection_branch_forward(x_nchw, params):
    """x_nchw: (N, 128, H, W) float32 -> (N, 5, H, W) float32."""
    w1, b1, w2, b2, w3, b3 = params
    N, C, H, W = x_nchw.shape
    assert C == C_IN
    HW = H * W

    # NCHW kept as-is; flattening HxW is a free reshape (no HBM pad/transpose).
    x_flat = x_nchw.reshape(N, C_IN, HW)

    # Pack the 9 taps into the matmul M dimension: rows [t*Cout:(t+1)*Cout] of
    # wp hold w[dy,dx]^T for tap t = dy*3+dx.  (tiny; pre-pack once in practice)
    w1p = w1.reshape(9, C_IN, C1).transpose(0, 2, 1).reshape(9 * C1, C_IN)
    w2p = w2.reshape(9, C1, C2).transpose(0, 2, 1).reshape(9 * C2, C1)
    w3t = w3.T                                        # (C_OUT, C2)
    b1c = b1.reshape(C1, 1)
    b2c = b2.reshape(C2, 1)
    b3c = b3.reshape(C_OUT, 1)

    # Destination-pixel validity masks for the 9 taps (replaces SAME padding).
    yy = jnp.arange(H).reshape(H, 1)
    xx = jnp.arange(W).reshape(1, W)
    masks = []
    for dy in (-1, 0, 1):
        for dx in (-1, 0, 1):
            valid = ((yy + dy >= 0) & (yy + dy < H) &
                     (xx + dx >= 0) & (xx + dx < W))
            masks.append(valid.reshape(1, HW))
    tap_mask = jnp.stack(masks).astype(jnp.float32)   # (9, 1, HW)

    kern = functools.partial(_detection_kernel, H=H, W=W)
    # TODO(synk): for large feature maps add a row-strip grid axis with a 1-row
    # halo so the (C_IN, HW) working set stays inside v7x's 64 MiB VMEM; also
    # consider bf16 x/w1/w2 (f32 accumulate) on v5e/v6e for 2x MXU / half HBM.
    out = pl.pallas_call(
        kern,
        out_shape=jax.ShapeDtypeStruct((N, C_OUT, HW), jnp.float32),
        grid_spec=pltpu.PrefetchScalarGridSpec(
            num_scalar_prefetch=0,
            grid=(N,),
            in_specs=[
                pl.BlockSpec((1, C_IN, HW), lambda n: (n, 0, 0)),
                pl.BlockSpec((9, 1, HW), lambda n: (0, 0, 0)),
                pl.BlockSpec((9 * C1, C_IN), lambda n: (0, 0)),
                pl.BlockSpec((C1, 1), lambda n: (0, 0)),
                pl.BlockSpec((9 * C2, C1), lambda n: (0, 0)),
                pl.BlockSpec((C2, 1), lambda n: (0, 0)),
                pl.BlockSpec((C_OUT, C2), lambda n: (0, 0)),
                pl.BlockSpec((C_OUT, 1), lambda n: (0, 0)),
            ],
            out_specs=pl.BlockSpec((1, C_OUT, HW), lambda n: (n, 0, 0)),
        ),
        compiler_params=pltpu.CompilerParams(
            dimension_semantics=("parallel",)),      # independent batch elems
    )(x_flat, tap_mask, w1p, b1c, w2p, b2c, w3t, b3c)

    # Output is already NCHW -- only a free reshape back to (N, 5, H, W).
    return out.reshape(N, C_OUT, H, W)


def init_params(key):
    """Deterministic synthetic weights (PyTorch-style kaiming-uniform bounds)."""
    ks = jax.random.split(key, 6)

    def u(k, shape, fan_in):
        bound = 1.0 / jnp.sqrt(fan_in)
        return jax.random.uniform(k, shape, jnp.float32, -bound, bound)

    w1 = u(ks[0], (3, 3, C_IN, C1), C_IN * 9)   # HWIO layout
    b1 = u(ks[1], (C1,), C_IN * 9)
    w2 = u(ks[2], (3, 3, C1, C2), C1 * 9)
    b2 = u(ks[3], (C2,), C1 * 9)
    w3 = u(ks[4], (C2, C_OUT), C2)              # 1x1 conv as matmul weight
    b3 = u(ks[5], (C_OUT,), C2)
    return (w1, b1, w2, b2, w3, b3)


def reference_forward(x_nchw, params):
    """Pure-JAX reference (lax convs) for correctness checking."""
    w1, b1, w2, b2, w3, b3 = params
    dn = ("NHWC", "HWIO", "NHWC")
    y = jnp.transpose(x_nchw, (0, 2, 3, 1))
    y = jax.lax.conv_general_dilated(y, w1, (1, 1), "SAME",
                                     dimension_numbers=dn) + b1
    y = jnp.maximum(y, 0.0)
    y = jax.lax.conv_general_dilated(y, w2, (1, 1), "SAME",
                                     dimension_numbers=dn) + b2
    y = jnp.maximum(y, 0.0)
    y = jax.lax.conv_general_dilated(y, w3.reshape(1, 1, C2, C_OUT), (1, 1),
                                     "SAME", dimension_numbers=dn) + b3
    y = jnp.maximum(y, 0.0)
    return jnp.transpose(y, (0, 3, 1, 2))


if __name__ == "__main__":
    key = jax.random.PRNGKey(0)
    kx, kp = jax.random.split(key)

    N, H, W = 2, 16, 16
    x = jax.random.normal(kx, (N, C_IN, H, W), jnp.float32)     # NCHW like PyTorch
    params = init_params(kp)

    out = detection_branch_forward(x, params)
    out = jax.block_until_ready(out)

    ref = jax.block_until_ready(reference_forward(x, params))
    assert out.shape == (N, C_OUT, H, W)
    assert jnp.allclose(out, ref, atol=1e-4, rtol=1e-4)

    print("KERNEL_OK")
</pallas_src>

<mosaic_0001>
module attributes {stable_mosaic.version = 11 : i64} {
  func.func @_detection_kernel(%arg0: i32, %arg1: memref<1x128x256xf32, #tpu.memory_space<vmem>>, %arg2: memref<9x1x256xf32, #tpu.memory_space<vmem>>, %arg3: memref<576x128xf32, #tpu.memory_space<vmem>>, %arg4: memref<64x1xf32, #tpu.memory_space<vmem>>, %arg5: memref<144x64xf32, #tpu.memory_space<vmem>>, %arg6: memref<16x1xf32, #tpu.memory_space<vmem>>, %arg7: memref<5x16xf32, #tpu.memory_space<vmem>>, %arg8: memref<5x1xf32, #tpu.memory_space<vmem>>, %arg9: memref<1x5x256xf32, #tpu.memory_space<vmem>>) attributes {dimension_semantics = [#tpu.dimension_semantics<parallel>], iteration_bounds = array<i64: 2>, scalar_prefetch = 0 : i64, scratch_operands = 0 : i64, tpu.core_type = #tpu.core_type<tc>, window_params = [{transform_indices = @transform_0, window_bounds = array<i64: 1, 128, 256>}, {pipeline_mode = #tpu.pipeline_mode<synchronous>, transform_indices = @transform_1, window_bounds = array<i64: 9, 1, 256>}, {pipeline_mode = #tpu.pipeline_mode<synchronous>, transform_indices = @transform_2, window_bounds = array<i64: 576, 128>}, {pipeline_mode = #tpu.pipeline_mode<synchronous>, transform_indices = @transform_3, window_bounds = array<i64: 64, 1>}, {pipeline_mode = #tpu.pipeline_mode<synchronous>, transform_indices = @transform_4, window_bounds = array<i64: 144, 64>}, {pipeline_mode = #tpu.pipeline_mode<synchronous>, transform_indices = @transform_5, window_bounds = array<i64: 16, 1>}, {pipeline_mode = #tpu.pipeline_mode<synchronous>, transform_indices = @transform_6, window_bounds = array<i64: 5, 16>}, {pipeline_mode = #tpu.pipeline_mode<synchronous>, transform_indices = @transform_7, window_bounds = array<i64: 5, 1>}, {transform_indices = @transform_8, window_bounds = array<i64: 1, 5, 256>}]} {
    %c0 = arith.constant 0 : index
    %c0_0 = arith.constant 0 : index
    %c0_1 = arith.constant 0 : index
    %0 = vector.load %arg1[%c0, %c0_0, %c0_1] : memref<1x128x256xf32, #tpu.memory_space<vmem>>, vector<1x128x256xf32>
    %1 = vector.shape_cast %0 : vector<1x128x256xf32> to vector<128x256xf32>
    %c0_2 = arith.constant 0 : index
    %c0_3 = arith.constant 0 : index
    %2 = vector.load %arg3[%c0_2, %c0_3] : memref<576x128xf32, #tpu.memory_space<vmem>>, vector<576x128xf32>
    %cst = arith.constant dense<0.000000e+00> : vector<576x256xf32>
    %3 = tpu.matmul %2, %1, %cst {dimension_numbers = #tpu.dot_dimension_numbers<[1], [0], [0], [1], [0, 0, 1, 1], [], []>} : vector<576x128xf32>, vector<128x256xf32>, vector<576x256xf32> -> vector<576x256xf32>
    %cst_4 = arith.constant 0.000000e+00 : f32
    %4 = vector.broadcast %cst_4 : f32 to vector<64x256xf32>
    %5 = vector.extract_strided_slice %3 {offsets = [0, 0], sizes = [64, 256], strides = [1, 1]} : vector<576x256xf32> to vector<64x256xf32>
    %c17_i32 = arith.constant 17 : i32
    %6 = tpu.dynamic_rotate %5 by %c17_i32 dim 1 : vector<64x256xf32>, i32 -> vector<64x256xf32>
    %c0_5 = arith.constant 0 : index
    %c0_6 = arith.constant 0 : index
    %c0_7 = arith.constant 0 : index
    %7 = vector.load %arg2[%c0_5, %c0_6, %c0_7] : memref<9x1x256xf32, #tpu.memory_space<vmem>>, vector<1x1x256xf32>
    %8 = vector.shape_cast %7 : vector<1x1x256xf32> to vector<1x256xf32>
    %9 = vector.broadcast %8 : vector<1x256xf32> to vector<64x256xf32>
    %10 = arith.mulf %6, %9 : vector<64x256xf32>
    %11 = arith.addf %4, %10 : vector<64x256xf32>
    %12 = vector.extract_strided_slice %3 {offsets = [64, 0], sizes = [64, 256], strides = [1, 1]} : vector<576x256xf32> to vector<64x256xf32>
    %c16_i32 = arith.constant 16 : i32
    %13 = tpu.dynamic_rotate %12 by %c16_i32 dim 1 : vector<64x256xf32>, i32 -> vector<64x256xf32>
    %c1 = arith.constant 1 : index
    %c0_8 = arith.constant 0 : index
    %c0_9 = arith.constant 0 : index
    %14 = vector.load %arg2[%c1, %c0_8, %c0_9] : memref<9x1x256xf32, #tpu.memory_space<vmem>>, vector<1x1x256xf32>
    %15 = vector.shape_cast %14 : vector<1x1x256xf32> to vector<1x256xf32>
    %16 = vector.broadcast %15 : vector<1x256xf32> to vector<64x256xf32>
    %17 = arith.mulf %13, %16 : vector<64x256xf32>
    %18 = arith.addf %11, %17 : vector<64x256xf32>
    %19 = vector.extract_strided_slice %3 {offsets = [128, 0], sizes = [64, 256], strides = [1, 1]} : vector<576x256xf32> to vector<64x256xf32>
    %c15_i32 = arith.constant 15 : i32
    %20 = tpu.dynamic_rotate %19 by %c15_i32 dim 1 : vector<64x256xf32>, i32 -> vector<64x256xf32>
    %c2 = arith.constant 2 : index
    %c0_10 = arith.constant 0 : index
    %c0_11 = arith.constant 0 : index
    %21 = vector.load %arg2[%c2, %c0_10, %c0_11] : memref<9x1x256xf32, #tpu.memory_space<vmem>>, vector<1x1x256xf32>
    %22 = vector.shape_cast %21 : vector<1x1x256xf32> to vector<1x256xf32>
    %23 = vector.broadcast %22 : vector<1x256xf32> to vector<64x256xf32>
    %24 = arith.mulf %20, %23 : vector<64x256xf32>
    %25 = arith.addf %18, %24 : vector<64x256xf32>
    %26 = vector.extract_strided_slice %3 {offsets = [192, 0], sizes = [64, 256], strides = [1, 1]} : vector<576x256xf32> to vector<64x256xf32>
    %c1_i32 = arith.constant 1 : i32
    %27 = tpu.dynamic_rotate %26 by %c1_i32 dim 1 : vector<64x256xf32>, i32 -> vector<64x256xf32>
    %c3 = arith.constant 3 : index
    %c0_12 = arith.constant 0 : index
    %c0_13 = arith.constant 0 : index
    %28 = vector.load %arg2[%c3, %c0_12, %c0_13] : memref<9x1x256xf32, #tpu.memory_space<vmem>>, vector<1x1x256xf32>
    %29 = vector.shape_cast %28 : vector<1x1x256xf32> to vector<1x256xf32>
    %30 = vector.broadcast %29 : vector<1x256xf32> to vector<64x256xf32>
    %31 = arith.mulf %27, %30 : vector<64x256xf32>
    %32 = arith.addf %25, %31 : vector<64x256xf32>
    %33 = vector.extract_strided_slice %3 {offsets = [256, 0], sizes = [64, 256], strides = [1, 1]} : vector<576x256xf32> to vector<64x256xf32>
    %c4 = arith.constant 4 : index
    %c0_14 = arith.constant 0 : index
    %c0_15 = arith.constant 0 : index
    %34 = vector.load %arg2[%c4, %c0_14, %c0_15] : memref<9x1x256xf32, #tpu.memory_space<vmem>>, vector<1x1x256xf32>
    %35 = vector.shape_cast %34 : vector<1x1x256xf32> to vector<1x256xf32>
    %36 = vector.broadcast %35 : vector<1x256xf32> to vector<64x256xf32>
    %37 = arith.mulf %33, %36 : vector<64x256xf32>
    %38 = arith.addf %32, %37 : vector<64x256xf32>
    %39 = vector.extract_strided_slice %3 {offsets = [320, 0], sizes = [64, 256], strides = [1, 1]} : vector<576x256xf32> to vector<64x256xf32>
    %c255_i32 = arith.constant 255 : i32
    %40 = tpu.dynamic_rotate %39 by %c255_i32 dim 1 : vector<64x256xf32>, i32 -> vector<64x256xf32>
    %c5 = arith.constant 5 : index
    %c0_16 = arith.constant 0 : index
    %c0_17 = arith.constant 0 : index
    %41 = vector.load %arg2[%c5, %c0_16, %c0_17] : memref<9x1x256xf32, #tpu.memory_space<vmem>>, vector<1x1x256xf32>
    %42 = vector.shape_cast %41 : vector<1x1x256xf32> to vector<1x256xf32>
    %43 = vector.broadcast %42 : vector<1x256xf32> to vector<64x256xf32>
    %44 = arith.mulf %40, %43 : vector<64x256xf32>
    %45 = arith.addf %38, %44 : vector<64x256xf32>
    %46 = vector.extract_strided_slice %3 {offsets = [384, 0], sizes = [64, 256], strides = [1, 1]} : vector<576x256xf32> to vector<64x256xf32>
    %c241_i32 = arith.constant 241 : i32
    %47 = tpu.dynamic_rotate %46 by %c241_i32 dim 1 : vector<64x256xf32>, i32 -> vector<64x256xf32>
    %c6 = arith.constant 6 : index
    %c0_18 = arith.constant 0 : index
    %c0_19 = arith.constant 0 : index
    %48 = vector.load %arg2[%c6, %c0_18, %c0_19] : memref<9x1x256xf32, #tpu.memory_space<vmem>>, vector<1x1x256xf32>
    %49 = vector.shape_cast %48 : vector<1x1x256xf32> to vector<1x256xf32>
    %50 = vector.broadcast %49 : vector<1x256xf32> to vector<64x256xf32>
    %51 = arith.mulf %47, %50 : vector<64x256xf32>
    %52 = arith.addf %45, %51 : vector<64x256xf32>
    %53 = vector.extract_strided_slice %3 {offsets = [448, 0], sizes = [64, 256], strides = [1, 1]} : vector<576x256xf32> to vector<64x256xf32>
    %c240_i32 = arith.constant 240 : i32
    %54 = tpu.dynamic_rotate %53 by %c240_i32 dim 1 : vector<64x256xf32>, i32 -> vector<64x256xf32>
    %c7 = arith.constant 7 : index
    %c0_20 = arith.constant 0 : index
    %c0_21 = arith.constant 0 : index
    %55 = vector.load %arg2[%c7, %c0_20, %c0_21] : memref<9x1x256xf32, #tpu.memory_space<vmem>>, vector<1x1x256xf32>
    %56 = vector.shape_cast %55 : vector<1x1x256xf32> to vector<1x256xf32>
    %57 = vector.broadcast %56 : vector<1x256xf32> to vector<64x256xf32>
    %58 = arith.mulf %54, %57 : vector<64x256xf32>
    %59 = arith.addf %52, %58 : vector<64x256xf32>
    %60 = vector.extract_strided_slice %3 {offsets = [512, 0], sizes = [64, 256], strides = [1, 1]} : vector<576x256xf32> to vector<64x256xf32>
    %c239_i32 = arith.constant 239 : i32
    %61 = tpu.dynamic_rotate %60 by %c239_i32 dim 1 : vector<64x256xf32>, i32 -> vector<64x256xf32>
    %c8 = arith.constant 8 : index
    %c0_22 = arith.constant 0 : index
    %c0_23 = arith.constant 0 : index
    %62 = vector.load %arg2[%c8, %c0_22, %c0_23] : memref<9x1x256xf32, #tpu.memory_space<vmem>>, vector<1x1x256xf32>
    %63 = vector.shape_cast %62 : vector<1x1x256xf32> to vector<1x256xf32>
    %64 = vector.broadcast %63 : vector<1x256xf32> to vector<64x256xf32>
    %65 = arith.mulf %61, %64 : vector<64x256xf32>
    %66 = arith.addf %59, %65 : vector<64x256xf32>
    %c0_24 = arith.constant 0 : index
    %c0_25 = arith.constant 0 : index
    %67 = vector.load %arg4[%c0_24, %c0_25] : memref<64x1xf32, #tpu.memory_space<vmem>>, vector<64x1xf32>
    %68 = vector.broadcast %67 : vector<64x1xf32> to vector<64x256xf32>
    %69 = arith.addf %66, %68 : vector<64x256xf32>
    %cst_26 = arith.constant 0.000000e+00 : f32
    %70 = vector.broadcast %cst_26 : f32 to vector<64x256xf32>
    %71 = arith.maximumf %69, %70 : vector<64x256xf32>
    %c0_27 = arith.constant 0 : index
    %c0_28 = arith.constant 0 : index
    %72 = vector.load %arg5[%c0_27, %c0_28] : memref<144x64xf32, #tpu.memory_space<vmem>>, vector<144x64xf32>
    %cst_29 = arith.constant dense<0.000000e+00> : vector<144x256xf32>
    %73 = tpu.matmul %72, %71, %cst_29 {dimension_numbers = #tpu.dot_dimension_numbers<[1], [0], [0], [1], [0, 0, 1, 1], [], []>} : vector<144x64xf32>, vector<64x256xf32>, vector<144x256xf32> -> vector<144x256xf32>
    %cst_30 = arith.constant 0.000000e+00 : f32
    %74 = vector.broadcast %cst_30 : f32 to vector<16x256xf32>
    %75 = vector.extract_strided_slice %73 {offsets = [0, 0], sizes = [16, 256], strides = [1, 1]} : vector<144x256xf32> to vector<16x256xf32>
    %c17_i32_31 = arith.constant 17 : i32
    %76 = tpu.dynamic_rotate %75 by %c17_i32_31 dim 1 : vector<16x256xf32>, i32 -> vector<16x256xf32>
    %c0_32 = arith.constant 0 : index
    %c0_33 = arith.constant 0 : index
    %c0_34 = arith.constant 0 : index
    %77 = vector.load %arg2[%c0_32, %c0_33, %c0_34] : memref<9x1x256xf32, #tpu.memory_space<vmem>>, vector<1x1x256xf32>
    %78 = vector.shape_cast %77 : vector<1x1x256xf32> to vector<1x256xf32>
    %79 = vector.broadcast %78 : vector<1x256xf32> to vector<16x256xf32>
    %80 = arith.mulf %76, %79 : vector<16x256xf32>
    %81 = arith.addf %74, %80 : vector<16x256xf32>
    %82 = vector.extract_strided_slice %73 {offsets = [16, 0], sizes = [16, 256], strides = [1, 1]} : vector<144x256xf32> to vector<16x256xf32>
    %c16_i32_35 = arith.constant 16 : i32
    %83 = tpu.dynamic_rotate %82 by %c16_i32_35 dim 1 : vector<16x256xf32>, i32 -> vector<16x256xf32>
    %c1_36 = arith.constant 1 : index
    %c0_37 = arith.constant 0 : index
    %c0_38 = arith.constant 0 : index
    %84 = vector.load %arg2[%c1_36, %c0_37, %c0_38] : memref<9x1x256xf32, #tpu.memory_space<vmem>>, vector<1x1x256xf32>
    %85 = vector.shape_cast %84 : vector<1x1x256xf32> to vector<1x256xf32>
    %86 = vector.broadcast %85 : vector<1x256xf32> to vector<16x256xf32>
    %87 = arith.mulf %83, %86 : vector<16x256xf32>
    %88 = arith.addf %81, %87 : vector<16x256xf32>
    %89 = vector.extract_strided_slice %73 {offsets = [32, 0], sizes = [16, 256], strides = [1, 1]} : vector<144x256xf32> to vector<16x256xf32>
    %c15_i32_39 = arith.constant 15 : i32
    %90 = tpu.dynamic_rotate %89 by %c15_i32_39 dim 1 : vector<16x256xf32>, i32 -> vector<16x256xf32>
    %c2_40 = arith.constant 2 : index
    %c0_41 = arith.constant 0 : index
    %c0_42 = arith.constant 0 : index
    %91 = vector.load %arg2[%c2_40, %c0_41, %c0_42] : memref<9x1x256xf32, #tpu.memory_space<vmem>>, vector<1x1x256xf32>
    %92 = vector.shape_cast %91 : vector<1x1x256xf32> to vector<1x256xf32>
    %93 = vector.broadcast %92 : vector<1x256xf32> to vector<16x256xf32>
    %94 = arith.mulf %90, %93 : vector<16x256xf32>
    %95 = arith.addf %88, %94 : vector<16x256xf32>
    %96 = vector.extract_strided_slice %73 {offsets = [48, 0], sizes = [16, 256], strides = [1, 1]} : vector<144x256xf32> to vector<16x256xf32>
    %c1_i32_43 = arith.constant 1 : i32
    %97 = tpu.dynamic_rotate %96 by %c1_i32_43 dim 1 : vector<16x256xf32>, i32 -> vector<16x256xf32>
    %c3_44 = arith.constant 3 : index
    %c0_45 = arith.constant 0 : index
    %c0_46 = arith.constant 0 : index
    %98 = vector.load %arg2[%c3_44, %c0_45, %c0_46] : memref<9x1x256xf32, #tpu.memory_space<vmem>>, vector<1x1x256xf32>
    %99 = vector.shape_cast %98 : vector<1x1x256xf32> to vector<1x256xf32>
    %100 = vector.broadcast %99 : vector<1x256xf32> to vector<16x256xf32>
    %101 = arith.mulf %97, %100 : vector<16x256xf32>
    %102 = arith.addf %95, %101 : vector<16x256xf32>
    %103 = vector.extract_strided_slice %73 {offsets = [64, 0], sizes = [16, 256], strides = [1, 1]} : vector<144x256xf32> to vector<16x256xf32>
    %c4_47 = arith.constant 4 : index
    %c0_48 = arith.constant 0 : index
    %c0_49 = arith.constant 0 : index
    %104 = vector.load %arg2[%c4_47, %c0_48, %c0_49] : memref<9x1x256xf32, #tpu.memory_space<vmem>>, vector<1x1x256xf32>
    %105 = vector.shape_cast %104 : vector<1x1x256xf32> to vector<1x256xf32>
    %106 = vector.broadcast %105 : vector<1x256xf32> to vector<16x256xf32>
    %107 = arith.mulf %103, %106 : vector<16x256xf32>
    %108 = arith.addf %102, %107 : vector<16x256xf32>
    %109 = vector.extract_strided_slice %73 {offsets = [80, 0], sizes = [16, 256], strides = [1, 1]} : vector<144x256xf32> to vector<16x256xf32>
    %c255_i32_50 = arith.constant 255 : i32
    %110 = tpu.dynamic_rotate %109 by %c255_i32_50 dim 1 : vector<16x256xf32>, i32 -> vector<16x256xf32>
    %c5_51 = arith.constant 5 : index
    %c0_52 = arith.constant 0 : index
    %c0_53 = arith.constant 0 : index
    %111 = vector.load %arg2[%c5_51, %c0_52, %c0_53] : memref<9x1x256xf32, #tpu.memory_space<vmem>>, vector<1x1x256xf32>
    %112 = vector.shape_cast %111 : vector<1x1x256xf32> to vector<1x256xf32>
    %113 = vector.broadcast %112 : vector<1x256xf32> to vector<16x256xf32>
    %114 = arith.mulf %110, %113 : vector<16x256xf32>
    %115 = arith.addf %108, %114 : vector<16x256xf32>
    %116 = vector.extract_strided_slice %73 {offsets = [96, 0], sizes = [16, 256], strides = [1, 1]} : vector<144x256xf32> to vector<16x256xf32>
    %c241_i32_54 = arith.constant 241 : i32
    %117 = tpu.dynamic_rotate %116 by %c241_i32_54 dim 1 : vector<16x256xf32>, i32 -> vector<16x256xf32>
    %c6_55 = arith.constant 6 : index
    %c0_56 = arith.constant 0 : index
    %c0_57 = arith.constant 0 : index
    %118 = vector.load %arg2[%c6_55, %c0_56, %c0_57] : memref<9x1x256xf32, #tpu.memory_space<vmem>>, vector<1x1x256xf32>
    %119 = vector.shape_cast %118 : vector<1x1x256xf32> to vector<1x256xf32>
    %120 = vector.broadcast %119 : vector<1x256xf32> to vector<16x256xf32>
    %121 = arith.mulf %117, %120 : vector<16x256xf32>
    %122 = arith.addf %115, %121 : vector<16x256xf32>
    %123 = vector.extract_strided_slice %73 {offsets = [112, 0], sizes = [16, 256], strides = [1, 1]} : vector<144x256xf32> to vector<16x256xf32>
    %c240_i32_58 = arith.constant 240 : i32
    %124 = tpu.dynamic_rotate %123 by %c240_i32_58 dim 1 : vector<16x256xf32>, i32 -> vector<16x256xf32>
    %c7_59 = arith.constant 7 : index
    %c0_60 = arith.constant 0 : index
    %c0_61 = arith.constant 0 : index
    %125 = vector.load %arg2[%c7_59, %c0_60, %c0_61] : memref<9x1x256xf32, #tpu.memory_space<vmem>>, vector<1x1x256xf32>
    %126 = vector.shape_cast %125 : vector<1x1x256xf32> to vector<1x256xf32>
    %127 = vector.broadcast %126 : vector<1x256xf32> to vector<16x256xf32>
    %128 = arith.mulf %124, %127 : vector<16x256xf32>
    %129 = arith.addf %122, %128 : vector<16x256xf32>
    %130 = vector.extract_strided_slice %73 {offsets = [128, 0], sizes = [16, 256], strides = [1, 1]} : vector<144x256xf32> to vector<16x256xf32>
    %c239_i32_62 = arith.constant 239 : i32
    %131 = tpu.dynamic_rotate %130 by %c239_i32_62 dim 1 : vector<16x256xf32>, i32 -> vector<16x256xf32>
    %c8_63 = arith.constant 8 : index
    %c0_64 = arith.constant 0 : index
    %c0_65 = arith.constant 0 : index
    %132 = vector.load %arg2[%c8_63, %c0_64, %c0_65] : memref<9x1x256xf32, #tpu.memory_space<vmem>>, vector<1x1x256xf32>
    %133 = vector.shape_cast %132 : vector<1x1x256xf32> to vector<1x256xf32>
    %134 = vector.broadcast %133 : vector<1x256xf32> to vector<16x256xf32>
    %135 = arith.mulf %131, %134 : vector<16x256xf32>
    %136 = arith.addf %129, %135 : vector<16x256xf32>
    %c0_66 = arith.constant 0 : index
    %c0_67 = arith.constant 0 : index
    %137 = vector.load %arg6[%c0_66, %c0_67] : memref<16x1xf32, #tpu.memory_space<vmem>>, vector<16x1xf32>
    %138 = vector.broadcast %137 : vector<16x1xf32> to vector<16x256xf32>
    %139 = arith.addf %136, %138 : vector<16x256xf32>
    %cst_68 = arith.constant 0.000000e+00 : f32
    %140 = vector.broadcast %cst_68 : f32 to vector<16x256xf32>
    %141 = arith.maximumf %139, %140 : vector<16x256xf32>
    %c0_69 = arith.constant 0 : index
    %c0_70 = arith.constant 0 : index
    %142 = vector.load %arg7[%c0_69, %c0_70] : memref<5x16xf32, #tpu.memory_space<vmem>>, vector<5x16xf32>
    %cst_71 = arith.constant dense<0.000000e+00> : vector<5x256xf32>
    %143 = tpu.matmul %142, %141, %cst_71 {dimension_numbers = #tpu.dot_dimension_numbers<[1], [0], [0], [1], [0, 0, 1, 1], [], []>} : vector<5x16xf32>, vector<16x256xf32>, vector<5x256xf32> -> vector<5x256xf32>
    %c0_72 = arith.constant 0 : index
    %c0_73 = arith.constant 0 : index
    %144 = vector.load %arg8[%c0_72, %c0_73] : memref<5x1xf32, #tpu.memory_space<vmem>>, vector<5x1xf32>
    %145 = vector.broadcast %144 : vector<5x1xf32> to vector<5x256xf32>
    %146 = arith.addf %143, %145 : vector<5x256xf32>
    %cst_74 = arith.constant 0.000000e+00 : f32
    %147 = vector.broadcast %cst_74 : f32 to vector<5x256xf32>
    %148 = arith.maximumf %146, %147 : vector<5x256xf32>
    %c0_75 = arith.constant 0 : index
    %c0_76 = arith.constant 0 : index
    %c0_77 = arith.constant 0 : index
    %149 = vector.load %arg9[%c0_75, %c0_76, %c0_77] : memref<1x5x256xf32, #tpu.memory_space<vmem>>, vector<1x5x256xf32>
    %150 = vector.shape_cast %149 : vector<1x5x256xf32> to vector<5x256xf32>
    %151 = vector.shape_cast %148 : vector<5x256xf32> to vector<1x5x256xf32>
    tpu.vector_store %arg9[%c0_75, %c0_76, %c0_77], %151 {strides = array<i32>} : memref<1x5x256xf32, #tpu.memory_space<vmem>>, vector<1x5x256xf32>,
    return
  }
  func.func @transform_0(%arg0: i32) -> (i32, i32, i32) {
    %c0_i32 = arith.constant 0 : i32
    %c0_i32_0 = arith.constant 0 : i32
    %c0_i32_1 = arith.constant 0 : i32
    return %arg0, %c0_i32, %c0_i32_0 : i32, i32, i32
  }
  func.func @transform_1(%arg0: i32) -> (i32, i32, i32) {
    %c0_i32 = arith.constant 0 : i32
    %c0_i32_0 = arith.constant 0 : i32
    %c0_i32_1 = arith.constant 0 : i32
    %c0_i32_2 = arith.constant 0 : i32
    return %c0_i32, %c0_i32_0, %c0_i32_1 : i32, i32, i32
  }
  func.func @transform_2(%arg0: i32) -> (i32, i32) {
    %c0_i32 = arith.constant 0 : i32
    %c0_i32_0 = arith.constant 0 : i32
    %c0_i32_1 = arith.constant 0 : i32
    return %c0_i32, %c0_i32_0 : i32, i32
  }
  func.func @transform_3(%arg0: i32) -> (i32, i32) {
    %c0_i32 = arith.constant 0 : i32
    %c0_i32_0 = arith.constant 0 : i32
    %c0_i32_1 = arith.constant 0 : i32
    return %c0_i32, %c0_i32_0 : i32, i32
  }
  func.func @transform_4(%arg0: i32) -> (i32, i32) {
    %c0_i32 = arith.constant 0 : i32
    %c0_i32_0 = arith.constant 0 : i32
    %c0_i32_1 = arith.constant 0 : i32
    return %c0_i32, %c0_i32_0 : i32, i32
  }
  func.func @transform_5(%arg0: i32) -> (i32, i32) {
    %c0_i32 = arith.constant 0 : i32
    %c0_i32_0 = arith.constant 0 : i32
    %c0_i32_1 = arith.constant 0 : i32
    return %c0_i32, %c0_i32_0 : i32, i32
  }
  func.func @transform_6(%arg0: i32) -> (i32, i32) {
    %c0_i32 = arith.constant 0 : i32
    %c0_i32_0 = arith.constant 0 : i32
    %c0_i32_1 = arith.constant 0 : i32
    return %c0_i32, %c0_i32_0 : i32, i32
  }
  func.func @transform_7(%arg0: i32) -> (i32, i32) {
    %c0_i32 = arith.constant 0 : i32
    %c0_i32_0 = arith.constant 0 : i32
    %c0_i32_1 = arith.constant 0 : i32
    return %c0_i32, %c0_i32_0 : i32, i32
  }
  func.func @transform_8(%arg0: i32) -> (i32, i32, i32) {
    %c0_i32 = arith.constant 0 : i32
    %c0_i32_0 = arith.constant 0 : i32
    %c0_i32_1 = arith.constant 0 : i32
    return %arg0, %c0_i32, %c0_i32_0 : i32, i32, i32
  }
}

</mosaic_0001>

<bundles_post_ra>
// kernel: tpu_custom_call.1
= control target key start
LH: loop header
LB: loop body
LE: loop exit
PB: predicated region body
PF: predicated region fallthrough
CT: control target
= control target key end

     0   :  { %13 = vsyncpa [#allocation3], 0  ;;  %s4851_s0 = inlined_call_operand.hbm [shape: f32[2,128,256], index: 0, kind: input, shape index: {}]   ;;  %s4852_s1 = inlined_call_operand.vmem [shape: f32[9,1,256], index: 1, kind: input, shape index: {}]   ;;  %s4853_s2 = inlined_call_operand.hbm [shape: f32[576,128], index: 2, kind: input, shape index: {}]   ;;  %s4854_s3 = inlined_call_operand.vmem [shape: f32[64,1], index: 3, kind: input, shape index: {}]   ;;  %s4855_s4 = inlined_call_operand.vmem [shape: f32[144,64], index: 4, kind: input, shape index: {}]   ;;  %s4856_s5 = inlined_call_operand.vmem [shape: f32[16,1], index: 5, kind: input, shape index: {}]   ;;  %s4857_s6 = inlined_call_operand.vmem [shape: f32[5,16], index: 6, kind: input, shape index: {}]   ;;  %s4858_s7 = inlined_call_operand.vmem [shape: f32[5,1], index: 7, kind: input, shape index: {}]   ;;  %s4859_s8 = inlined_call_operand.vmem [shape: f32[2,5,256], index: 8, kind: output, shape index: {}]  }
   0x1   :  { %15 = vsyncpa [#allocation3 + $0x1], 0 }
   0x2   :  { %16 = vsyncpa [#allocation5], 0  ;;  %s2753_s27 = smov 0   ;;  %s2755_s28 = smov 0  }
   0x3   :  { %s2757_s29 = smov 0   ;;  %s2759_s30 = smov 0  }
   0x4 LB: > { %s2772_s9 = sadd.s32 4294967295, %s2690_s30   ;;  %p42_p0 = scmp.ne.s32.totalorder %s2682_s28, %s2678_s27  ;;  %s2690_s30 = sphi %s2759_s30, %s5175_s30   ;;  %s2686_s29 = sphi %s2757_s29, %s5174_s29   ;;  %s2682_s28 = sphi %s2755_s28, %s5173_s28   ;;  %s2678_s27 = sphi %s2753_s27, %s5172_s27  }
   0x5   : > { %p4860_p1 = scmp.eq.s32.totalorder %s2772_s9, 0  ;;  %p2418_p2 = scmp.ge.s32.totalorder %s2690_s30, 1 }
   0x6   : > { %p226_p3 = scmp.lt.s32.totalorder %s2690_s30, 3  ;;  %s2692_s12 = smov [#allocation4]  }
   0x7   : > { %p2780_p4 = por %p4860_p1, %p42_p0  ;;  %s241_s13 = sshll.u32 %s2692_s12, 4  ;;  %s242_s13 = int_to_ptr.vmem [resolvable:$true] %s241_s13 }
   0x8   : > { %p2784_p5 = pnand %p2418_p2, %p226_p3  ;;  %s2797_s15 = sadd.s32 1, %s2690_s30  }
   0x9   : > { %s4927_s10 = scalar_select %p2780_p4, 1, 0 }
   0xa   : > { %s4928_s11 = scalar_select %p2784_p5, 1, 0 }
   0xb   : > { %p2534_p6 = pneg %p2784_p5  ;;  %s29_s16 = sadd.s32 1, %s2686_s29 }
   0xc   : > { %s26_s17 = ssub.s32 %s2690_s30, %s2797_s15  ;;  %s2594_s20 = scalar_lea.hbm %s4853_s2, 9216 }
   0xd   : > { %p2792_p7 = pnand %p2534_p6, %p4860_p1  ;;  %p2595_p8 = scmp.ne.s32.totalorder %s4853_s2, %s2594_s20 }
   0xe   : > { %p2601_p12 = scmp.lt.u32.totalorder %s2594_s20, %s4853_s2 }
   0xf   : > { %p2596_p9 = pneg %p2792_p7 }
  0x11   : > { %p2597_p10 = pnand %p2596_p9, %p2595_p8 }
  0x13   : > { %p2598_p11 = pneg %p2597_p10 }
  0x15   : > { %p2603_p13 = pnand %p2601_p12, %p2598_p11 }
  0x17   : > { %2606 = shalt.err (!%p2603_p13)
}
  0x18   : > { %s2607_s25 = scalar_lea.vmem %s242_s13, 9216  ;;  %p2615_p6 = scmp.lt.s32.totalorder %s242_s13, %s242_s13 }
  0x19   : > { %p2608_p0 = scmp.ne.s32.totalorder %s242_s13, %s2607_s25  ;;  %p2616_p1 = scmp.lt.s32.totalorder %s2607_s25, %s2607_s25 }
  0x1b   : > { %p2610_p2 = pnand %p2608_p0, %p2596_p9  ;;  %p2617_p4 = por %p2616_p1, %p2615_p6 }
  0x1d   : > { %p2611_p3 = pneg %p2610_p2 }
  0x1f   : > { %p2618_p5 = pnand %p2617_p4, %p2611_p3 }
  0x21   : > { %2621 = shalt.err (!%p2618_p5)
}
  0x22   : > { %s2693_s26 = smov 128   ;;  %s2694_s27 = smov 8  }
  0x23   : > { %2537 = dma.hbm_to_vmem [thread:$0]  (!%p2792_p7), %s4853_s2, 9216, %s242_s13, [#allocation5], %s2693_s26, %s2693_s26, %s2694_s27  }
  0x24   : > { %p27_p8 = scmp.eq.s32.totalorder %s26_s17, 0  ;;  %p36_p9 = scmp.ne.s32.totalorder %s2686_s29, %s2682_s28 }
  0x25   : > { %p37_p1 = scmp.eq.s32.totalorder %s2690_s30, 0  ;;  %p2543_p4 = scmp.lt.s32.totalorder %s2690_s30, 2 }
  0x26   : > { %s2823_s19 = scalar_select %p27_p8, %s2686_s29, %s29_s16  }
  0x27   : > { %p38_p5 = por %p37_p1, %p36_p9  ;;  %s270_s20 = sand.u32 1, %s2686_s29  }
  0x28   : > { %s2421_s21 = sshll.u32 %s270_s20, 8  ;;  %s2458_s22 = sshll.u32 %s2690_s30, 12 }
  0x29   : > { %s2830_s25 = scalar_lea.hbm %s4851_s0, %s2458_s22  ;;  %s274_s13 = scalar_lea.vmem [#allocation2], %s2421_s21 }
  0x2a   : > { %s281_s14 = sshll.u32 %s274_s13, 4  ;;  %p2834_p7 = pnand %p2543_p4, %p38_p5  ;;  %s2832_s14 = int_to_ptr.vmem [resolvable:$true] %s281_s14 }
  0x2b   : > { %s2838_s30 = scalar_lea.sflag [#allocation3], %s270_s20  ;;  %s2622_s17 = scalar_lea.hbm %s2830_s25, 4096 }
  0x2c   : > { %p2623_p10 = scmp.ne.s32.totalorder %s2830_s25, %s2622_s17  ;;  %p2624_p11 = pneg %p2834_p7 }
  0x2d   : > { %s2627_s12 = scalar_lea.hbm %s4851_s0, 8192  ;;  %p2628_p0 = scmp.lt.u32.totalorder %s2830_s25, %s4851_s0 }
  0x2e   : > { %p2625_p12 = pnand %p2624_p11, %p2623_p10  ;;  %p2629_p2 = scmp.lt.u32.totalorder %s2627_s12, %s2622_s17 }
  0x2f   : > { %p2631_p6 = scmp.lt.u32.totalorder %s2622_s17, %s2830_s25 }
  0x30   : > { %p2626_p13 = pneg %p2625_p12  ;;  %p2630_p3 = por %p2629_p2, %p2628_p0 }
  0x32   : > { %p2632_p8 = por %p2631_p6, %p2630_p3 }
  0x34   : > { %p2633_p9 = pnand %p2632_p8, %p2626_p13 }
  0x36   : > { %2636 = shalt.err (!%p2633_p9)
}
  0x37   : > { %s2637_s20 = scalar_lea.vmem %s2832_s14, 4096  ;;  %s2695_s22 = smov [#allocation2]  }
  0x38   : > { %p2638_p1 = scmp.ne.s32.totalorder %s2832_s14, %s2637_s20  ;;  %s2642_s23 = sshll.u32 %s2695_s22, 4  ;;  %s2643_s23 = int_to_ptr.vmem [resolvable:$false] %s2642_s23 }
  0x39   : > { %s2644_s24 = scalar_lea.vmem %s2643_s23, 8192  ;;  %p2645_p10 = scmp.lt.s32.totalorder %s2832_s14, %s2643_s23 }
  0x3a   : > { %p2640_p4 = pnand %p2638_p1, %p2624_p11  ;;  %p2646_p12 = scmp.lt.s32.totalorder %s2644_s24, %s2637_s20 }
  0x3c   : > { %p2641_p5 = pneg %p2640_p4  ;;  %p2647_p0 = por %p2646_p12, %p2645_p10 }
  0x3e   : > { %p2648_p2 = pnand %p2647_p0, %p2641_p5 }
  0x40   : > { %2651 = shalt.err (!%p2648_p2)
}
  0x41   : > { %s2696_s13 = smov 256   ;;  %s2697_s17 = smov 16  }
  0x42   : > { %2541 = dma.hbm_to_vmem [thread:$0]  (!%p2834_p7), %s2830_s25, 4096, %s2832_s14, %s2838_s30, %s2696_s13, %s2696_s13, %s2697_s17  }
  0x43   : > { %p4931_p11 = scmp.ne.s32.totalorder %s4928_s11, 0 }
  0x45   : > { %293 = sbr.rel (%p4931_p11) target bundleno = 1361 (0x551), region = 52 }
  0x4c   : > { %s295_s26 = sand.u32 1, %s2682_s28   ;;  %p4932_p13 = scmp.ne.s32.totalorder %s4927_s10, 0 }
  0x4d   : > { %s2425_s27 = sshll.u32 %s295_s26, 8  ;;  %s296_s12 = scalar_lea.sflag [#allocation3], %s295_s26 }
  0x4e   : > { %s2869_s18 = scalar_lea.vmem [#allocation2], %s2425_s27 }
  0x4f   : > { %2669 = dma.done.wait (%p4932_p13), %s296_s12, 4096  }
  0x50   : > { %2671 = vsyncadd (%p4932_p13), %s296_s12, 4294963200  ;;  %p4933_p3 = scmp.eq.s32.totalorder %s2772_s9, 0 }
  0x52   : > { %2673 = dma.done.wait (%p4933_p3), [#allocation5], 9216   ;;  %p4934_p7 = pmov %p4933_p3 }
  0x53   : > { %v4863_v0 = vmov 0.0   ;;  %v342_v1 = vld [vmem:[%s2869_s18 + $0x8] sm:$0xff]  ;;  %v344_v2 = vld [vmem:[%s2869_s18 + $0x18] sm:$0xff]  ;;  %v341_v3 = vld [vmem:[%s2869_s18] sm:$0xff]  ;;  %v2699_v51 = vmov 0   ;;  %s2700_s17 = smov 127  }
  0x54   : > { %2675 = vsyncadd (%p4934_p7), [#allocation5], 4294958080  ;;  %509 = vmatprep.mubr.f32.mxu0 %v4863_v0  ;;  %785 = vmatprep.mubr.f32.mxu1 %v4863_v0  ;;  %v2460_v4 = vpack.c.bf16 %v344_v2, %v342_v1  ;;  %v343_v5 = vld [vmem:[%s2869_s18 + $0x10] sm:$0xff]  ;;  %v346_v6 = vld [vmem:[%s2869_s18 + $0x28] sm:$0xff]  ;;  %s2701_s26 = smov 17   ;;  %s2702_s27 = smov 113  }
  0x55   : > { %v348_v7 = vld [vmem:[%s2869_s18 + $0x38] sm:$0xff]  ;;  %v2462_v8 = vpack.c.bf16 %v343_v5, %v341_v3  ;;  %v345_v10 = vld [vmem:[%s2869_s18 + $0x20] sm:$0xff]  ;;  %v347_v11 = vld [vmem:[%s2869_s18 + $0x30] sm:$0xff]  ;;  %2593 = vset.pattern.permute.xlu1 %v2699_v51  ;;  %2592 = vset.pattern.permute.xlu0 %v2699_v51  ;;  %s2703_s12 = smov 16   ;;  %s2705_s10 = smov 15   ;;  %vm1838_vm8 = vcmask 523264  }
  0x56   : > { %v2464_v9 = vpack.c.bf16 %v348_v7, %v346_v6  ;;  %v350_v12 = vld [vmem:[%s2869_s18 + $0x48] sm:$0xff]  ;;  %2461 = vmatprep.subr.bf16.mxu0 %v2460_v4  ;;  %2512 = vmatprep.subr.bf16.mxu1 %v2460_v4  ;;  %v352_v13 = vld [vmem:[%s2869_s18 + $0x58] sm:$0xff]  ;;  %v2466_v14 = vpack.c.bf16 %v347_v11, %v345_v10  ;;  %v349_v16 = vld [vmem:[%s2869_s18 + $0x40] sm:$0xff]  ;;  %s2706_s11 = smov 111   ;;  %s2707_s25 = smov 1   ;;  %vm2261_vm9 = vcmask 130048  }
  0x57   : > { %2463 = vmatpush1.bf16.msra.mxu0 %v2462_v8  ;;  %2520 = vmatpush1.bf16.msra.mxu1 %v2462_v8  ;;  %v2468_v15 = vpack.c.bf16 %v352_v13, %v350_v12  ;;  %v351_v17 = vld [vmem:[%s2869_s18 + $0x50] sm:$0xff]  ;;  %v354_v18 = vld [vmem:[%s2869_s18 + $0x68] sm:$0xff]  ;;  %v356_v19 = vld [vmem:[%s2869_s18 + $0x78] sm:$0xff]  ;;  %p336_p6 = scmp.lt.s32.totalorder %s2772_s9, 1 }
  0x58   : > { %2465 = vmatprep.subr.bf16.mxu0 %v2464_v9  ;;  %2513 = vmatprep.subr.bf16.mxu1 %v2464_v9  ;;  %v2470_v20 = vpack.c.bf16 %v351_v17, %v349_v16  ;;  %v2472_v21 = vpack.c.bf16 %v356_v19, %v354_v18  ;;  %v353_v22 = vld [vmem:[%s2869_s18 + $0x60] sm:$0xff]  ;;  %v355_v23 = vld [vmem:[%s2869_s18 + $0x70] sm:$0xff]  ;;  %v358_v24 = vld [vmem:[%s2869_s18 + $0x88] sm:$0xff] }
  0x59   : > { %v360_v25 = vld [vmem:[%s2869_s18 + $0x98] sm:$0xff]  ;;  %v2474_v26 = vpack.c.bf16 %v355_v23, %v353_v22  ;;  %v357_v28 = vld [vmem:[%s2869_s18 + $0x80] sm:$0xff]  ;;  %v359_v29 = vld [vmem:[%s2869_s18 + $0x90] sm:$0xff]  ;;  %s5177_s9 = smov (!%p336_p6, %s2772_s9), 1 }
  0x5a   : > { %v2476_v27 = vpack.c.bf16 %v360_v25, %v358_v24  ;;  %v362_v30 = vld [vmem:[%s2869_s18 + $0xa8] sm:$0xff]  ;;  %v364_v31 = vld [vmem:[%s2869_s18 + $0xb8] sm:$0xff]  ;;  %v2478_v32 = vpack.c.bf16 %v359_v29, %v357_v28  ;;  %v361_v34 = vld [vmem:[%s2869_s18 + $0xa0] sm:$0xff] }
  0x5b   : > { %2467 = vmatpush1.bf16.msra.mxu0 %v2466_v14  ;;  %2521 = vmatpush1.bf16.msra.mxu1 %v2466_v14  ;;  %v2480_v33 = vpack.c.bf16 %v364_v31, %v362_v30  ;;  %v363_v35 = vld [vmem:[%s2869_s18 + $0xb0] sm:$0xff]  ;;  %v366_v36 = vld [vmem:[%s2869_s18 + $0xc8] sm:$0xff]  ;;  %v368_v37 = vld [vmem:[%s2869_s18 + $0xd8] sm:$0xff] }
  0x5c   : > { %2469 = vmatprep.subr.bf16.mxu0 %v2468_v15  ;;  %2514 = vmatprep.subr.bf16.mxu1 %v2468_v15  ;;  %v2482_v38 = vpack.c.bf16 %v363_v35, %v361_v34  ;;  %v2484_v39 = vpack.c.bf16 %v368_v37, %v366_v36  ;;  %v365_v40 = vld [vmem:[%s2869_s18 + $0xc0] sm:$0xff]  ;;  %v367_v41 = vld [vmem:[%s2869_s18 + $0xd0] sm:$0xff]  ;;  %v370_v42 = vld [vmem:[%s2869_s18 + $0xe8] sm:$0xff] }
  0x5d   : > { %v372_v43 = vld [vmem:[%s2869_s18 + $0xf8] sm:$0xff]  ;;  %v2486_v44 = vpack.c.bf16 %v367_v41, %v365_v40  ;;  %v369_v46 = vld [vmem:[%s2869_s18 + $0xe0] sm:$0xff]  ;;  %v371_v47 = vld [vmem:[%s2869_s18 + $0xf0] sm:$0xff]  ;;  %s2704_s18 = smov 112  }
  0x5e   : > { %v2488_v45 = vpack.c.bf16 %v372_v43, %v370_v42  ;;  %v2490_v48 = vpack.c.bf16 %v371_v47, %v369_v46  ;;  %v1741_v49 = vld [vmem:[%s4854_s3 + $0x8] sm:$0xff]  ;;  %v1740_v50 = vld [vmem:[%s4854_s3] sm:$0xff]  ;;  %v419_v53 = vld [vmem:[#allocation4 + $0x170] sm:$0xff] }
  0x5f   : > { %2471 = vmatpush1.bf16.msra.mxu0 %v2470_v20  ;;  %2522 = vmatpush1.bf16.msra.mxu1 %v2470_v20  ;;  %v373_v52 = vld [vmem:[#allocation4] sm:$0xff]  ;;  %v1742_v54 = vld [vmem:[%s4854_s3 + $0x10] sm:$0xff]  ;;  %v1743_v55 = vld [vmem:[%s4854_s3 + $0x18] sm:$0xff] }
  0x60   : > { %2473 = vmatprep.subr.bf16.mxu0 %v2472_v21  ;;  %2515 = vmatprep.subr.bf16.mxu1 %v2472_v21  ;;  %v374_v56 = vld [vmem:[#allocation4 + $0x8] sm:$0xff]  ;;  %v420_v57 = vld [vmem:[#allocation4 + $0x178] sm:$0xff]  ;;  %v1744_v58 = vld [vmem:[%s4854_s3 + $0x20] sm:$0xff] }
  0x61   : > { %1755 = vperm.xlu1 %2593, %v1741_v49   ;;  %1750 = vperm.xlu0 %2592, %v1740_v50   ;;  %v1745_v59 = vld [vmem:[%s4854_s3 + $0x28] sm:$0xff]  ;;  %v375_v60 = vld [vmem:[#allocation4 + $0x10] sm:$0xff]  ;;  %v421_v61 = vld [vmem:[#allocation4 + $0x180] sm:$0xff] }
  0x62   : > { %v376_v62 = vld [vmem:[#allocation4 + $0x18] sm:$0xff]  ;;  %v422_v63 = vld [vmem:[#allocation4 + $0x188] sm:$0xff]  ;;  %v377_v1 = vld [vmem:[#allocation4 + $0x20] sm:$0xff] }
  0x63   : > { %2475 = vmatpush1.bf16.msra.mxu0 %v2474_v26  ;;  %2523 = vmatpush1.bf16.msra.mxu1 %v2474_v26  ;;  %v423_v2 = vld [vmem:[#allocation4 + $0x190] sm:$0xff]  ;;  %v378_v3 = vld [vmem:[#allocation4 + $0x28] sm:$0xff]  ;;  %v424_v4 = vld [vmem:[#allocation4 + $0x198] sm:$0xff] }
  0x64   : > { %2477 = vmatprep.subr.bf16.mxu0 %v2476_v27  ;;  %2516 = vmatprep.subr.bf16.mxu1 %v2476_v27  ;;  %v379_v5 = vld [vmem:[#allocation4 + $0x30] sm:$0xff]  ;;  %v425_v6 = vld [vmem:[#allocation4 + $0x1a0] sm:$0xff]  ;;  %v380_v7 = vld [vmem:[#allocation4 + $0x38] sm:$0xff] }
  0x65   : > { %1760 = vperm.xlu1 %2593, %v1742_v54   ;;  %1765 = vperm.xlu0 %2592, %v1743_v55   ;;  %v426_v8 = vld [vmem:[#allocation4 + $0x1a8] sm:$0xff]  ;;  %v381_v9 = vld [vmem:[#allocation4 + $0x40] sm:$0xff]  ;;  %v427_v10 = vld [vmem:[#allocation4 + $0x1b0] sm:$0xff] }
  0x66   : > { %v382_v11 = vld [vmem:[#allocation4 + $0x48] sm:$0xff]  ;;  %v428_v12 = vld [vmem:[#allocation4 + $0x1b8] sm:$0xff]  ;;  %v383_v13 = vld [vmem:[#allocation4 + $0x50] sm:$0xff] }
  0x67   : > { %2479 = vmatpush1.bf16.msra.mxu0 %v2478_v32  ;;  %2524 = vmatpush1.bf16.msra.mxu1 %v2478_v32  ;;  %v429_v14 = vld [vmem:[#allocation4 + $0x1c0] sm:$0xff]  ;;  %v384_v15 = vld [vmem:[#allocation4 + $0x58] sm:$0xff]  ;;  %v430_v16 = vld [vmem:[#allocation4 + $0x1c8] sm:$0xff] }
  0x68   : > { %2481 = vmatprep.subr.bf16.mxu0 %v2480_v33  ;;  %2517 = vmatprep.subr.bf16.mxu1 %v2480_v33  ;;  %v385_v17 = vld [vmem:[#allocation4 + $0x60] sm:$0xff]  ;;  %v431_v18 = vld [vmem:[#allocation4 + $0x1d0] sm:$0xff]  ;;  %v386_v19 = vld [vmem:[#allocation4 + $0x68] sm:$0xff] }
  0x69   : > { %1770 = vperm.xlu1 %2593, %v1744_v58   ;;  %1775 = vperm.xlu0 %2592, %v1745_v59   ;;  %v432_v20 = vld [vmem:[#allocation4 + $0x1d8] sm:$0xff]  ;;  %v387_v21 = vld [vmem:[#allocation4 + $0x70] sm:$0xff]  ;;  %v433_v22 = vld [vmem:[#allocation4 + $0x1e0] sm:$0xff] }
  0x6a   : > { %v388_v23 = vld [vmem:[#allocation4 + $0x78] sm:$0xff]  ;;  %v434_v24 = vld [vmem:[#allocation4 + $0x1e8] sm:$0xff]  ;;  %v389_v25 = vld [vmem:[#allocation4 + $0x80] sm:$0xff] }
  0x6b   : > { %2483 = vmatpush1.bf16.msra.mxu0 %v2482_v38  ;;  %2525 = vmatpush1.bf16.msra.mxu1 %v2482_v38  ;;  %v435_v26 = vld [vmem:[#allocation4 + $0x1f0] sm:$0xff]  ;;  %v390_v27 = vld [vmem:[#allocation4 + $0x88] sm:$0xff]  ;;  %v436_v28 = vld [vmem:[#allocation4 + $0x1f8] sm:$0xff] }
  0x6c   : > { %2485 = vmatprep.subr.bf16.mxu0 %v2484_v39  ;;  %2518 = vmatprep.subr.bf16.mxu1 %v2484_v39  ;;  %v391_v29 = vld [vmem:[#allocation4 + $0x90] sm:$0xff]  ;;  %v437_v30 = vld [vmem:[#allocation4 + $0x200] sm:$0xff]  ;;  %v392_v31 = vld [vmem:[#allocation4 + $0x98] sm:$0xff] }
  0x6d   : > { %v438_v32 = vld [vmem:[#allocation4 + $0x208] sm:$0xff]  ;;  %v393_v33 = vld [vmem:[#allocation4 + $0xa0] sm:$0xff]  ;;  %v439_v34 = vld [vmem:[#allocation4 + $0x210] sm:$0xff] }
  0x6e   : > { %v394_v35 = vld [vmem:[#allocation4 + $0xa8] sm:$0xff]  ;;  %v440_v36 = vld [vmem:[#allocation4 + $0x218] sm:$0xff]  ;;  %v395_v37 = vld [vmem:[#allocation4 + $0xb0] sm:$0xff] }
  0x6f   : > { %2487 = vmatpush1.bf16.msra.mxu0 %v2486_v44  ;;  %2526 = vmatpush1.bf16.msra.mxu1 %v2486_v44  ;;  %v441_v38 = vld [vmem:[#allocation4 + $0x220] sm:$0xff]  ;;  %v396_v39 = vld [vmem:[#allocation4 + $0xb8] sm:$0xff]  ;;  %v442_v40 = vld [vmem:[#allocation4 + $0x228] sm:$0xff] }
  0x70   : > { %2489 = vmatprep.subr.bf16.mxu0 %v2488_v45  ;;  %2519 = vmatprep.subr.bf16.mxu1 %v2488_v45  ;;  %v397_v41 = vld [vmem:[#allocation4 + $0xc0] sm:$0xff]  ;;  %v398_v42 = vld [vmem:[#allocation4 + $0xc8] sm:$0xff]  ;;  %v399_v43 = vld [vmem:[#allocation4 + $0xd0] sm:$0xff] }
  0x71   : > { %v400_v44 = vld [vmem:[#allocation4 + $0xd8] sm:$0xff]  ;;  %v401_v45 = vld [vmem:[#allocation4 + $0xe0] sm:$0xff]  ;;  %v402_v46 = vld [vmem:[#allocation4 + $0xe8] sm:$0xff] }
  0x72   : > { %v443_v47 = vld [vmem:[#allocation4 + $0x230] sm:$0xff]  ;;  %v444_v49 = vld [vmem:[#allocation4 + $0x238] sm:$0xff]  ;;  %v405_v51 = vld [vmem:[#allocation4 + $0x100] sm:$0xff] }
  0x73   : > { %2491 = vmatpush1.bf16.msra.mxu0 %v2490_v48  ;;  %2527 = vmatpush1.bf16.msra.mxu1 %v2490_v48  ;;  %v403_v48 = vld [vmem:[#allocation4 + $0xf0] sm:$0xff]  ;;  %v404_v50 = vld [vmem:[#allocation4 + $0xf8] sm:$0xff]  ;;  %v409_v55 = vld [vmem:[#allocation4 + $0x120] sm:$0xff] }
  0x74   : > { %v408_v54 = vld [vmem:[#allocation4 + $0x118] sm:$0xff]  ;;  %v413_v59 = vld [vmem:[#allocation4 + $0x140] sm:$0xff] }
  0x75   : > { %v412_v58 = vld [vmem:[#allocation4 + $0x138] sm:$0xff] }
  0x76   : > { %510 = vmatmul.mubr.f32.vlgmr.msra.gmra.mrb[0].mxu0 %v373_v52  ;;  %786 = vmatmul.mubr.f32.vlgmr.msra.gmra.mrb[0].mxu1 %v419_v53  ;;  %v406_v52 = vld [vmem:[#allocation4 + $0x108] sm:$0xff]  ;;  %v407_v53 = vld [vmem:[#allocation4 + $0x110] sm:$0xff] }
  0x77   : > { %515 = vmatprep.mubr.f32.mxu0 %v4863_v0  ;;  %791 = vmatprep.mubr.f32.mxu1 %v4863_v0 }
  0x7a   : > { %516 = vmatmul.mubr.f32.gmra.mrb[2].mxu0 %v374_v56  ;;  %792 = vmatmul.mubr.f32.gmra.mrb[2].mxu1 %v420_v57  ;;  %v410_v56 = vld [vmem:[#allocation4 + $0x128] sm:$0xff]  ;;  %v411_v57 = vld [vmem:[#allocation4 + $0x130] sm:$0xff] }
  0x7b   : > { %521 = vmatprep.mubr.f32.mxu0 %v4863_v0  ;;  %797 = vmatprep.mubr.f32.mxu1 %v4863_v0 }
  0x7e   : > { %522 = vmatmul.mubr.f32.gmra.mrb[4].mxu0 %v375_v60  ;;  %798 = vmatmul.mubr.f32.gmra.mrb[4].mxu1 %v421_v61  ;;  %v414_v60 = vld [vmem:[#allocation4 + $0x148] sm:$0xff]  ;;  %v415_v61 = vld [vmem:[#allocation4 + $0x150] sm:$0xff] }
  0x7f   : > { %527 = vmatprep.mubr.f32.mxu0 %v4863_v0  ;;  %803 = vmatprep.mubr.f32.mxu1 %v4863_v0 }
  0x82   : > { %528 = vmatmul.mubr.f32.gmra.mrb[6].mxu0 %v376_v62  ;;  %804 = vmatmul.mubr.f32.gmra.mrb[6].mxu1 %v422_v63  ;;  %v416_v62 = vld [vmem:[#allocation4 + $0x158] sm:$0xff]  ;;  %v417_v63 = vld [vmem:[#allocation4 + $0x160] sm:$0xff] }
  0x83   : > { %533 = vmatprep.mubr.f32.mxu0 %v4863_v0  ;;  %809 = vmatprep.mubr.f32.mxu1 %v4863_v0 }
  0x86   : > { %534 = vmatmul.mubr.f32.gmra.mrb[8].mxu0 %v377_v1  ;;  %810 = vmatmul.mubr.f32.gmra.mrb[8].mxu1 %v423_v2  ;;  %v418_v1 = vld [vmem:[#allocation4 + $0x168] sm:$0xff] }
  0x87   : > { %539 = vmatprep.mubr.f32.mxu0 %v4863_v0  ;;  %815 = vmatprep.mubr.f32.mxu1 %v4863_v0 }
  0x8a   : > { %540 = vmatmul.mubr.f32.gmra.mrb[10].mxu0 %v378_v3  ;;  %816 = vmatmul.mubr.f32.gmra.mrb[10].mxu1 %v424_v4 }
  0x8b   : > { %545 = vmatprep.mubr.f32.mxu0 %v4863_v0  ;;  %821 = vmatprep.mubr.f32.mxu1 %v4863_v0 }
  0x8e   : > { %546 = vmatmul.mubr.f32.gmra.mrb[12].mxu0 %v379_v5  ;;  %822 = vmatmul.mubr.f32.gmra.mrb[12].mxu1 %v425_v6 }
  0x8f   : > { %551 = vmatprep.mubr.f32.mxu0 %v4863_v0  ;;  %827 = vmatprep.mubr.f32.mxu1 %v4863_v0 }
  0x92   : > { %552 = vmatmul.mubr.f32.gmra.mrb[14].mxu0 %v380_v7  ;;  %828 = vmatmul.mubr.f32.gmra.mrb[14].mxu1 %v426_v8 }
  0x93   : > { %557 = vmatprep.mubr.f32.mxu0 %v4863_v0  ;;  %833 = vmatprep.mubr.f32.mxu1 %v4863_v0 }
  0x96   : > { %558 = vmatmul.mubr.f32.gmra.mrb[16].mxu0 %v381_v9  ;;  %834 = vmatmul.mubr.f32.gmra.mrb[16].mxu1 %v427_v10 }
  0x97   : > { %563 = vmatprep.mubr.f32.mxu0 %v4863_v0  ;;  %839 = vmatprep.mubr.f32.mxu1 %v4863_v0 }
  0x9a   : > { %564 = vmatmul.mubr.f32.gmra.mrb[18].mxu0 %v382_v11  ;;  %840 = vmatmul.mubr.f32.gmra.mrb[18].mxu1 %v428_v12 }
  0x9b   : > { %569 = vmatprep.mubr.f32.mxu0 %v4863_v0  ;;  %845 = vmatprep.mubr.f32.mxu1 %v4863_v0 }
  0x9e   : > { %570 = vmatmul.mubr.f32.gmra.mrb[20].mxu0 %v383_v13  ;;  %846 = vmatmul.mubr.f32.gmra.mrb[20].mxu1 %v429_v14 }
  0x9f   : > { %575 = vmatprep.mubr.f32.mxu0 %v4863_v0  ;;  %851 = vmatprep.mubr.f32.mxu1 %v4863_v0 }
  0xa2   : > { %576 = vmatmul.mubr.f32.gmra.mrb[22].mxu0 %v384_v15  ;;  %852 = vmatmul.mubr.f32.gmra.mrb[22].mxu1 %v430_v16 }
  0xa3   : > { %581 = vmatprep.mubr.f32.mxu0 %v4863_v0  ;;  %857 = vmatprep.mubr.f32.mxu1 %v4863_v0 }
  0xa6   : > { %582 = vmatmul.mubr.f32.gmra.mrb[24].mxu0 %v385_v17  ;;  %858 = vmatmul.mubr.f32.gmra.mrb[24].mxu1 %v431_v18 }
  0xa7   : > { %587 = vmatprep.mubr.f32.mxu0 %v4863_v0  ;;  %863 = vmatprep.mubr.f32.mxu1 %v4863_v0 }
  0xaa   : > { %588 = vmatmul.mubr.f32.gmra.mrb[26].mxu0 %v386_v19  ;;  %864 = vmatmul.mubr.f32.gmra.mrb[26].mxu1 %v432_v20 }
  0xab   : > { %593 = vmatprep.mubr.f32.mxu0 %v4863_v0  ;;  %869 = vmatprep.mubr.f32.mxu1 %v4863_v0 }
  0xae   : > { %594 = vmatmul.mubr.f32.gmra.mrb[28].mxu0 %v387_v21  ;;  %870 = vmatmul.mubr.f32.gmra.mrb[28].mxu1 %v433_v22 }
  0xaf   : > { %599 = vmatprep.mubr.f32.mxu0 %v4863_v0  ;;  %875 = vmatprep.mubr.f32.mxu1 %v4863_v0 }
  0xb2   : > { %600 = vmatmul.mubr.f32.gmra.mrb[30].mxu0 %v388_v23  ;;  %876 = vmatmul.mubr.f32.gmra.mrb[30].mxu1 %v434_v24 }
  0xb3   : > { %605 = vmatprep.mubr.f32.mxu0 %v4863_v0  ;;  %881 = vmatprep.mubr.f32.mxu1 %v4863_v0 }
  0xb6   : > { %606 = vmatmul.mubr.f32.gmra.mrb[32].mxu0 %v389_v25  ;;  %882 = vmatmul.mubr.f32.gmra.mrb[32].mxu1 %v435_v26 }
  0xb7   : > { %611 = vmatprep.mubr.f32.mxu0 %v4863_v0  ;;  %887 = vmatprep.mubr.f32.mxu1 %v4863_v0 }
  0xba   : > { %612 = vmatmul.mubr.f32.gmra.mrb[34].mxu0 %v390_v27  ;;  %888 = vmatmul.mubr.f32.gmra.mrb[34].mxu1 %v436_v28 }
  0xbb   : > { %617 = vmatprep.mubr.f32.mxu0 %v4863_v0  ;;  %893 = vmatprep.mubr.f32.mxu1 %v4863_v0 }
  0xbe   : > { %618 = vmatmul.mubr.f32.gmra.mrb[36].mxu0 %v391_v29  ;;  %894 = vmatmul.mubr.f32.gmra.mrb[36].mxu1 %v437_v30 }
  0xbf   : > { %623 = vmatprep.mubr.f32.mxu0 %v4863_v0  ;;  %899 = vmatprep.mubr.f32.mxu1 %v4863_v0 }
  0xc2   : > { %624 = vmatmul.mubr.f32.gmra.mrb[38].mxu0 %v392_v31  ;;  %900 = vmatmul.mubr.f32.gmra.mrb[38].mxu1 %v438_v32 }
  0xc3   : > { %629 = vmatprep.mubr.f32.mxu0 %v4863_v0  ;;  %905 = vmatprep.mubr.f32.mxu1 %v4863_v0 }
  0xc6   : > { %630 = vmatmul.mubr.f32.gmra.mrb[40].mxu0 %v393_v33  ;;  %906 = vmatmul.mubr.f32.gmra.mrb[40].mxu1 %v439_v34 }
  0xc7   : > { %635 = vmatprep.mubr.f32.mxu0 %v4863_v0  ;;  %911 = vmatprep.mubr.f32.mxu1 %v4863_v0 }
  0xca   : > { %636 = vmatmul.mubr.f32.gmra.mrb[42].mxu0 %v394_v35  ;;  %912 = vmatmul.mubr.f32.gmra.mrb[42].mxu1 %v440_v36 }
  0xcb   : > { %641 = vmatprep.mubr.f32.mxu0 %v4863_v0  ;;  %917 = vmatprep.mubr.f32.mxu1 %v4863_v0 }
  0xce   : > { %642 = vmatmul.mubr.f32.gmra.mrb[44].mxu0 %v395_v37  ;;  %918 = vmatmul.mubr.f32.gmra.mrb[44].mxu1 %v441_v38 }
  0xcf   : > { %647 = vmatprep.mubr.f32.mxu0 %v4863_v0  ;;  %923 = vmatprep.mubr.f32.mxu1 %v4863_v0 }
  0xd2   : > { %648 = vmatmul.mubr.f32.gmra.mrb[46].mxu0 %v396_v39  ;;  %924 = vmatmul.mubr.f32.gmra.mrb[46].mxu1 %v442_v40 }
  0xd3   : > { %653 = vmatprep.mubr.f32.mxu0 %v4863_v0  ;;  %929 = vmatprep.mubr.f32.mxu1 %v4863_v0 }
  0xd6   : > { %654 = vmatmul.mubr.f32.gmra.mrb[48].mxu0 %v397_v41  ;;  %930 = vmatmul.mubr.f32.gmra.mrb[48].mxu1 %v443_v47 }
  0xd7   : > { %659 = vmatprep.mubr.f32.mxu0 %v4863_v0  ;;  %935 = vmatprep.mubr.f32.mxu1 %v4863_v0 }
  0xda   : > { %660 = vmatmul.mubr.f32.gmra.mrb[50].mxu0 %v398_v42  ;;  %936 = vmatmul.mubr.f32.gmra.mrb[50].mxu1 %v444_v49 }
  0xdb   : > { %665 = vmatprep.mubr.f32.mxu0 %v4863_v0  ;;  %1957 = vmatprep.mubr.f32.mxu1 %v4863_v0 }
  0xde   : > { %666 = vmatmul.mubr.f32.gmra.mrb[52].mxu0 %v399_v43 }
  0xdf   : > { %671 = vmatprep.mubr.f32.mxu0 %v4863_v0 }
  0xe2   : > { %672 = vmatmul.mubr.f32.gmra.mrb[54].mxu0 %v400_v44 }
  0xe3   : > { %677 = vmatprep.mubr.f32.mxu0 %v4863_v0 }
  0xe6   : > { %678 = vmatmul.mubr.f32.gmra.mrb[56].mxu0 %v401_v45 }
  0xe7   : > { %683 = vmatprep.mubr.f32.mxu0 %v4863_v0 }
  0xea   : > { %684 = vmatmul.mubr.f32.gmra.mrb[58].mxu0 %v402_v46 }
  0xeb   : > { %689 = vmatprep.mubr.f32.mxu0 %v4863_v0 }
  0xee   : > { %690 = vmatmul.mubr.f32.gmra.mrb[60].mxu0 %v403_v48 }
  0xef   : > { %695 = vmatprep.mubr.f32.mxu0 %v4863_v0 }
  0xf2   : > { %696 = vmatmul.mubr.f32.gmra.mrb[62].mxu0 %v404_v50 }
  0xf3   : > { %701 = vmatprep.mubr.f32.mxu0 %v4863_v0 }
  0xf6   : > { %702 = vmatmul.mubr.f32.gmra.mrb[64].mxu0 %v405_v51 }
  0xf7   : > { %707 = vmatprep.mubr.f32.mxu0 %v4863_v0 }
  0xfa   : > { %708 = vmatmul.mubr.f32.gmra.mrb[66].mxu0 %v406_v52 }
  0xfb   : > { %713 = vmatprep.mubr.f32.mxu0 %v4863_v0 }
  0xfe   : > { %714 = vmatmul.mubr.f32.gmra.mrb[68].mxu0 %v407_v53 }
  0xff   : > { %719 = vmatprep.mubr.f32.mxu0 %v4863_v0 }
 0x102   : > { %720 = vmatmul.mubr.f32.gmra.mrb[70].mxu0 %v408_v54 }
 0x103   : > { %725 = vmatprep.mubr.f32.mxu0 %v4863_v0 }
 0x106   : > { %726 = vmatmul.mubr.f32.gmra.mrb[72].mxu0 %v409_v55 }
 0x107   : > { %731 = vmatprep.mubr.f32.mxu0 %v4863_v0 }
 0x10a   : > { %732 = vmatmul.mubr.f32.gmra.mrb[74].mxu0 %v410_v56 }
 0x10b   : > { %737 = vmatprep.mubr.f32.mxu0 %v4863_v0 }
 0x10e   : > { %738 = vmatmul.mubr.f32.gmra.mrb[76].mxu0 %v411_v57 }
 0x10f   : > { %743 = vmatprep.mubr.f32.mxu0 %v4863_v0 }
 0x112   : > { %744 = vmatmul.mubr.f32.gmra.mrb[78].mxu0 %v412_v58 }
 0x113   : > { %749 = vmatprep.mubr.f32.mxu0 %v4863_v0 }
 0x116   : > { %750 = vmatmul.mubr.f32.gmra.mrb[80].mxu0 %v413_v59 }
 0x117   : > { %755 = vmatprep.mubr.f32.mxu0 %v4863_v0 }
 0x11a   : > { %756 = vmatmul.mubr.f32.gmra.mrb[82].mxu0 %v414_v60 }
 0x11b   : > { %761 = vmatprep.mubr.f32.mxu0 %v4863_v0 }
 0x11e   : > { %762 = vmatmul.mubr.f32.gmra.mrb[84].mxu0 %v415_v61 }
 0x11f   : > { %767 = vmatprep.mubr.f32.mxu0 %v4863_v0 }
 0x122   : > { %768 = vmatmul.mubr.f32.gmra.mrb[86].mxu0 %v416_v62 }
 0x123   : > { %773 = vmatprep.mubr.f32.mxu0 %v4863_v0 }
 0x126   : > { %774 = vmatmul.mubr.f32.gmra.mrb[88].mxu0 %v417_v63 }
 0x127   : > { %779 = vmatprep.mubr.f32.mxu0 %v4863_v0 }
 0x12a   : > { %780 = vmatmul.mubr.f32.gmra.mrb[90].mxu0 %v418_v1 }
 0x149   : > { %v511_v2 = vpop.f32.mrb[0].mxu0  ;;  %v787_v3 = vpop.f32.mrb[0].mxu1 }
 0x14a   : > { %1376 = vrot.lane.b32.xlu1 %v787_v3, %s2700_s17  ;;  %v789_v4 = vpop.f32.mrb[1].mxu1  ;;  %942 = vrot.lane.b32.xlu0 %v511_v2, %s2701_s26  ;;  %v513_v5 = vpop.f32.mrb[1].mxu0 }
 0x14d   : > { %v517_v6 = vpop.f32.mrb[2].mxu0  ;;  %v793_v7 = vpop.f32.mrb[2].mxu1 }
 0x14e   : > { %958 = vrot.lane.b32.xlu1 %v513_v5, %s2701_s26  ;;  %944 = vrot.lane.b32.xlu0 %v517_v6, %s2701_s26  ;;  %v519_v8 = vpop.f32.mrb[3].mxu0  ;;  %v795_v9 = vpop.f32.mrb[3].mxu1 }
 0x151   : > { %v523_v10 = vpop.f32.mrb[4].mxu0  ;;  %v799_v11 = vpop.f32.mrb[4].mxu1 }
 0x152   : > { %1392 = vrot.lane.b32.xlu1 %v789_v4, %s2700_s17  ;;  %1378 = vrot.lane.b32.xlu0 %v793_v7, %s2700_s17  ;;  %v525_v12 = vpop.f32.mrb[5].mxu0  ;;  %v801_v13 = vpop.f32.mrb[5].mxu1 }
 0x155   : > { %v529_v14 = vpop.f32.mrb[6].mxu0  ;;  %v805_v15 = vpop.f32.mrb[6].mxu1 }
 0x156   : > { %1394 = vrot.lane.b32.xlu0 %v795_v9, %s2700_s17  ;;  %960 = vrot.lane.b32.xlu1 %v519_v8, %s2701_s26  ;;  %v531_v16 = vpop.f32.mrb[7].mxu0  ;;  %v807_v17 = vpop.f32.mrb[7].mxu1 }
 0x159   : > { %v535_v18 = vpop.f32.mrb[8].mxu0  ;;  %v811_v19 = vpop.f32.mrb[8].mxu1 }
 0x15a   : > { %946 = vrot.lane.b32.xlu0 %v523_v10, %s2701_s26  ;;  %948 = vrot.lane.b32.xlu1 %v529_v14, %s2701_s26  ;;  %v537_v20 = vpop.f32.mrb[9].mxu0  ;;  %v813_v21 = vpop.f32.mrb[9].mxu1 }
 0x15d   : > { %v541_v22 = vpop.f32.mrb[10].mxu0  ;;  %v817_v23 = vpop.f32.mrb[10].mxu1 }
 0x15e   : > { %1458 = vrot.lane.b32.xlu0 %v799_v11, %s2702_s27  ;;  %1460 = vrot.lane.b32.xlu1 %v805_v15, %s2702_s27  ;;  %v543_v24 = vpop.f32.mrb[11].mxu0  ;;  %v819_v25 = vpop.f32.mrb[11].mxu1 }
 0x161   : > { %v547_v26 = vpop.f32.mrb[12].mxu0  ;;  %v823_v27 = vpop.f32.mrb[12].mxu1 }
 0x162   : > { %962 = vrot.lane.b32.xlu0 %v525_v12, %s2701_s26  ;;  %964 = vrot.lane.b32.xlu1 %v531_v16, %s2701_s26  ;;  %v549_v28 = vpop.f32.mrb[13].mxu0  ;;  %v825_v29 = vpop.f32.mrb[13].mxu1 }
 0x165   : > { %v553_v30 = vpop.f32.mrb[14].mxu0  ;;  %v829_v31 = vpop.f32.mrb[14].mxu1 }
 0x166   : > { %1474 = vrot.lane.b32.xlu0 %v801_v13, %s2702_s27  ;;  %1476 = vrot.lane.b32.xlu1 %v807_v17, %s2702_s27  ;;  %v555_v32 = vpop.f32.mrb[15].mxu0  ;;  %v831_v33 = vpop.f32.mrb[15].mxu1 }
 0x169   : > { %v559_v34 = vpop.f32.mrb[16].mxu0  ;;  %v835_v35 = vpop.f32.mrb[16].mxu1 }
 0x16a   : > { %1462 = vrot.lane.b32.xlu1 %v811_v19, %s2702_s27  ;;  %950 = vrot.lane.b32.xlu0 %v535_v18, %s2701_s26  ;;  %v561_v36 = vpop.f32.mrb[17].mxu0  ;;  %v837_v37 = vpop.f32.mrb[17].mxu1 }
 0x16d   : > { %v565_v38 = vpop.f32.mrb[18].mxu0  ;;  %v841_v39 = vpop.f32.mrb[18].mxu1 }
 0x16e   : > { %1478 = vrot.lane.b32.xlu1 %v813_v21, %s2702_s27  ;;  %966 = vrot.lane.b32.xlu0 %v537_v20, %s2701_s26  ;;  %v567_v40 = vpop.f32.mrb[19].mxu0  ;;  %v843_v41 = vpop.f32.mrb[19].mxu1 }
 0x171   : > { %v571_v42 = vpop.f32.mrb[20].mxu0  ;;  %v3022_v43 = vpop.f32.mrb[20].mxu1 }
 0x172   : > { %1464 = vrot.lane.b32.xlu0 %v817_v23, %s2702_s27  ;;  %952 = vrot.lane.b32.xlu1 %v541_v22, %s2701_s26  ;;  %v3026_v44 = vpop.f32.mrb[21].mxu0  ;;  %v3028_v45 = vpop.f32.mrb[21].mxu1 }
 0x175   : > { %v577_v46 = vpop.f32.mrb[22].mxu0  ;;  %v3030_v47 = vpop.f32.mrb[22].mxu1 }
 0x176   : > { %1480 = vrot.lane.b32.xlu0 %v819_v25, %s2702_s27  ;;  %968 = vrot.lane.b32.xlu1 %v543_v24, %s2701_s26  ;;  %v3034_v48 = vpop.f32.mrb[23].mxu0  ;;  %v3036_v49 = vpop.f32.mrb[23].mxu1 }
 0x179   : > { %v3038_v50 = vpop.f32.mrb[24].mxu0  ;;  %v3040_v51 = vpop.f32.mrb[24].mxu1 }
 0x17a   : > { %1466 = vrot.lane.b32.xlu1 %v823_v27, %s2702_s27  ;;  %954 = vrot.lane.b32.xlu0 %v547_v26, %s2701_s26  ;;  %v3044_v52 = vpop.f32.mrb[25].mxu0  ;;  %v3046_v53 = vpop.f32.mrb[25].mxu1 }
 0x17d   : > { %v3048_v54 = vpop.f32.mrb[26].mxu0  ;;  %v3050_v55 = vpop.f32.mrb[26].mxu1 }
 0x17e   : > { %1482 = vrot.lane.b32.xlu1 %v825_v29, %s2702_s27  ;;  %970 = vrot.lane.b32.xlu0 %v549_v28, %s2701_s26  ;;  %v3054_v56 = vpop.f32.mrb[27].mxu0  ;;  %v3056_v57 = vpop.f32.mrb[27].mxu1 }
 0x181   : > { %v3058_v58 = vpop.f32.mrb[28].mxu0  ;;  %v3060_v59 = vpop.f32.mrb[28].mxu1 }
 0x182   : > { %1468 = vrot.lane.b32.xlu0 %v829_v31, %s2702_s27  ;;  %956 = vrot.lane.b32.xlu1 %v553_v30, %s2701_s26  ;;  %v3064_v60 = vpop.f32.mrb[29].mxu0  ;;  %v3066_v61 = vpop.f32.mrb[29].mxu1 }
 0x185   : > { %v3068_v62 = vpop.f32.mrb[30].mxu1  ;;  %v3070_v63 = vpop.f32.mrb[30].mxu0 }
 0x186   : > { %1484 = vrot.lane.b32.xlu0 %v831_v33, %s2702_s27  ;;  %972 = vrot.lane.b32.xlu1 %v555_v32, %s2701_s26  ;;  %v3074_v1 = vpop.f32.mrb[31].mxu0  ;;  %v3076_v2 = vpop.f32.mrb[31].mxu1 }
 0x189   : > { %v3078_v3 = vpop.f32.mrb[32].mxu0  ;;  %v3080_v4 = vpop.f32.mrb[32].mxu1 }
 0x18a   : > { %1470 = vrot.lane.b32.xlu1 %v835_v35, %s2702_s27  ;;  %1037 = vrot.lane.b32.xlu0 %v559_v34, %s2703_s12  ;;  %v3084_v5 = vpop.f32.mrb[33].mxu0  ;;  %v3086_v6 = vpop.f32.mrb[33].mxu1 }
 0x18b   : > { %v3164_v35 = vpop.permute.xlu1 %1755 }
 0x18c   : > { %4935 = vst [vmem:[#allocation8_spill] sm:$0xff] %v3164_v35 }
 0x18d   : > { %v3088_v7 = vpop.f32.mrb[34].mxu0  ;;  %v3090_v8 = vpop.f32.mrb[34].mxu1 }
 0x18e   : > { %1486 = vrot.lane.b32.xlu1 %v837_v37, %s2702_s27  ;;  %1053 = vrot.lane.b32.xlu0 %v561_v36, %s2703_s12  ;;  %v3094_v9 = vpop.f32.mrb[35].mxu0  ;;  %v3096_v10 = vpop.f32.mrb[35].mxu1 }
 0x18f   : > { %v3172_v37 = vpop.permute.xlu0 %1750 }
 0x190   : > { %4936 = vst [vmem:[#allocation9_spill] sm:$0xff] %v3172_v37 }
 0x191   : > { %v3098_v11 = vpop.f32.mrb[36].mxu0  ;;  %v3100_v12 = vpop.f32.mrb[36].mxu1 }
 0x192   : > { %1472 = vrot.lane.b32.xlu0 %v841_v39, %s2702_s27  ;;  %1039 = vrot.lane.b32.xlu1 %v565_v38, %s2703_s12  ;;  %v3104_v13 = vpop.f32.mrb[37].mxu0  ;;  %v3106_v14 = vpop.f32.mrb[37].mxu1 }
 0x195   : > { %v3108_v15 = vpop.f32.mrb[38].mxu0  ;;  %v3110_v16 = vpop.f32.mrb[38].mxu1 }
 0x196   : > { %1488 = vrot.lane.b32.xlu0 %v843_v41, %s2702_s27  ;;  %1055 = vrot.lane.b32.xlu1 %v567_v40, %s2703_s12  ;;  %v3114_v17 = vpop.f32.mrb[39].mxu0  ;;  %v3116_v18 = vpop.f32.mrb[39].mxu1 }
 0x197   : > { %v3184_v41 = vpop.permute.xlu1 %1760 }
 0x198   : > { %4937 = vst [vmem:[#allocation10_spill] sm:$0xff] %v3184_v41 }
 0x199   : > { %v3118_v19 = vpop.f32.mrb[40].mxu0  ;;  %v3120_v20 = vpop.f32.mrb[40].mxu1 }
 0x19a   : > { %1041 = vrot.lane.b32.xlu0 %v571_v42, %s2703_s12  ;;  %1043 = vrot.lane.b32.xlu1 %v577_v46, %s2703_s12  ;;  %v3124_v21 = vpop.f32.mrb[41].mxu0  ;;  %v3126_v22 = vpop.f32.mrb[41].mxu1 }
 0x19b   : > { %v3186_v42 = vpop.permute.xlu0 %1765 }
 0x19c   : > { %4938 = vst [vmem:[#allocation11_spill] sm:$0xff] %v3186_v42 }
 0x19d   : > { %v3128_v23 = vpop.f32.mrb[42].mxu0  ;;  %v3130_v24 = vpop.f32.mrb[42].mxu1 }
 0x19e   : > { %1552 = vrot.lane.b32.xlu0 %v3022_v43, %s2704_s18  ;;  %1554 = vrot.lane.b32.xlu1 %v3030_v47, %s2704_s18  ;;  %v3136_v25 = vpop.f32.mrb[43].mxu0  ;;  %v3138_v26 = vpop.f32.mrb[43].mxu1 }
 0x19f   : > { %v3200_v47 = vpop.permute.xlu0 %1775 }
 0x1a0   : > { %4940 = vst [vmem:[#allocation13_spill] sm:$0xff] %v3200_v47 }
 0x1a1   : > { %v3140_v27 = vpop.f32.mrb[44].mxu0  ;;  %v3142_v28 = vpop.f32.mrb[44].mxu1 }
 0x1a2   : > { %1057 = vrot.lane.b32.xlu0 %v3026_v44, %s2703_s12  ;;  %1059 = vrot.lane.b32.xlu1 %v3034_v48, %s2703_s12  ;;  %v3148_v29 = vpop.f32.mrb[45].mxu0  ;;  %v3150_v30 = vpop.f32.mrb[45].mxu1 }
 0x1a5   : > { %v3152_v31 = vpop.f32.mrb[46].mxu0  ;;  %v3154_v32 = vpop.f32.mrb[46].mxu1 }
 0x1a6   : > { %1568 = vrot.lane.b32.xlu0 %v3028_v45, %s2704_s18  ;;  %1570 = vrot.lane.b32.xlu1 %v3036_v49, %s2704_s18  ;;  %v3160_v33 = vpop.f32.mrb[47].mxu0  ;;  %v3162_v34 = vpop.f32.mrb[47].mxu1 }
 0x1a7   : > { %v3196_v45 = vpop.permute.xlu1 %1770 }
 0x1a8   : > { %4939 = vst [vmem:[#allocation12_spill] sm:$0xff] %v3196_v45 }
 0x1a9   : > { %v3166_v36 = vpop.f32.mrb[48].mxu0  ;;  %v3246_v0 = vpop.f32.mrb[48].mxu1 }
 0x1aa   : > { %1556 = vrot.lane.b32.xlu1 %v3040_v51, %s2704_s18  ;;  %1045 = vrot.lane.b32.xlu0 %v3038_v50, %s2703_s12  ;;  %v3174_v38 = vpop.f32.mrb[49].mxu0  ;;  %v3254_v47 = vpop.f32.mrb[49].mxu1 }
 0x1ad   : > { %v3176_v39 = vpop.f32.mrb[50].mxu0 }
 0x1ae   : > { %1572 = vrot.lane.b32.xlu1 %v3046_v53, %s2704_s18  ;;  %1061 = vrot.lane.b32.xlu0 %v3044_v52, %s2703_s12  ;;  %v3182_v40 = vpop.f32.mrb[51].mxu0 }
 0x1b1   : > { %v3188_v43 = vpop.f32.mrb[52].mxu0 }
 0x1b2   : > { %1558 = vrot.lane.b32.xlu0 %v3050_v55, %s2704_s18  ;;  %1047 = vrot.lane.b32.xlu1 %v3048_v54, %s2703_s12  ;;  %v3194_v44 = vpop.f32.mrb[53].mxu0 }
 0x1b5   : > { %v3198_v46 = vpop.f32.mrb[54].mxu0 }
 0x1b6   : > { %1574 = vrot.lane.b32.xlu0 %v3056_v57, %s2704_s18  ;;  %1063 = vrot.lane.b32.xlu1 %v3054_v56, %s2703_s12  ;;  %v3206_v48 = vpop.f32.mrb[55].mxu0 }
 0x1b9   : > { %v3208_v49 = vpop.f32.mrb[56].mxu0 }
 0x1ba   : > { %1560 = vrot.lane.b32.xlu1 %v3060_v59, %s2704_s18  ;;  %1049 = vrot.lane.b32.xlu0 %v3058_v58, %s2703_s12  ;;  %v3214_v50 = vpop.f32.mrb[57].mxu0 }
 0x1bc   : > { %v3216_v51 = vpop.permute.xlu1 %1376  ;;  %v3218_v52 = vpop.permute.xlu0 %942 }
 0x1bd   : > { %4941 = vst [vmem:[#allocation14_spill] sm:$0xff] %v3216_v51  ;;  %v3220_v53 = vpop.f32.mrb[58].mxu0 }
 0x1be   : > { %1576 = vrot.lane.b32.xlu1 %v3066_v61, %s2704_s18  ;;  %1065 = vrot.lane.b32.xlu0 %v3064_v60, %s2703_s12  ;;  %v3226_v54 = vpop.f32.mrb[59].mxu0 }
 0x1c0   : > { %v3228_v55 = vpop.permute.xlu1 %958  ;;  %v3230_v56 = vpop.permute.xlu0 %944 }
 0x1c1   : > { %v3232_v57 = vpop.f32.mrb[60].mxu0 }
 0x1c2   : > { %1562 = vrot.lane.b32.xlu0 %v3068_v62, %s2704_s18  ;;  %1051 = vrot.lane.b32.xlu1 %v3070_v63, %s2703_s12  ;;  %v3238_v58 = vpop.f32.mrb[61].mxu0  ;;  %v3256_v63 = vpop.f32.mrb[50].mxu1 }
 0x1c4   : > { %v3240_v59 = vpop.permute.xlu1 %1392  ;;  %v3242_v61 = vpop.permute.xlu0 %1378 }
 0x1c5   : > { %4942 = vst [vmem:[#allocation15_spill] sm:$0xff] %v3240_v59  ;;  %v3244_v60 = vpop.f32.mrb[62].mxu0 }
 0x1c6   : > { %1578 = vrot.lane.b32.xlu0 %v3076_v2, %s2704_s18  ;;  %1067 = vrot.lane.b32.xlu1 %v3074_v1, %s2703_s12  ;;  %v3252_v62 = vpop.f32.mrb[63].mxu0  ;;  %v3268_v2 = vpop.f32.mrb[51].mxu1 }
 0x1c8   : > { %v3258_v51 = vpop.permute.xlu0 %1394  ;;  %v3260_v59 = vpop.permute.xlu1 %960 }
 0x1c9   : > { %v3262_v45 = vpop.f32.mrb[64].mxu0 }
 0x1ca   : > { %4943 = vst [vmem:[#allocation16_spill] sm:$0xff] %v3262_v45  ;;  %1564 = vrot.lane.b32.xlu1 %v3080_v4, %s2704_s18  ;;  %v3266_v42 = vpop.f32.mrb[65].mxu0  ;;  %1131 = vrot.lane.b32.xlu0 %v3078_v3, %s2705_s10 }
 0x1cb   : > { %4944 = vst [vmem:[#allocation17_spill] sm:$0xff] %v3266_v42 }
 0x1cc   : > { %v3272_v1 = vpop.permute.xlu0 %946  ;;  %v3274_v41 = vpop.permute.xlu1 %948 }
 0x1cd   : > { %4945 = vst [vmem:[#allocation18_spill] sm:$0xff] %v3274_v41  ;;  %v3276_v37 = vpop.f32.mrb[66].mxu0 }
 0x1ce   : > { %1580 = vrot.lane.b32.xlu1 %v3086_v6, %s2704_s18  ;;  %v3280_v35 = vpop.f32.mrb[67].mxu0  ;;  %1147 = vrot.lane.b32.xlu0 %v3084_v5, %s2705_s10 }
 0x1cf   : > { %4946 = vst [vmem:[#allocation19_spill] sm:$0xff] %v3280_v35 }
 0x1d0   : > { %v3284_v4 = vpop.permute.xlu0 %1458  ;;  %v3286_v42 = vpop.permute.xlu1 %1460 }
 0x1d1   : > { %4947 = vst [vmem:[#allocation20_spill] sm:$0xff] %v3286_v42  ;;  %v3288_v45 = vpop.f32.mrb[68].mxu0 }
 0x1d2   : > { %1133 = vrot.lane.b32.xlu1 %v3088_v7, %s2705_s10  ;;  %v3292_v3 = vpop.f32.mrb[69].mxu0  ;;  %1566 = vrot.lane.b32.xlu0 %v3090_v8, %s2704_s18 }
 0x1d3   : > { %4948 = vst [vmem:[#allocation21_spill] sm:$0xff] %v3292_v3 }
 0x1d4   : > { %v3296_v6 = vpop.permute.xlu0 %962  ;;  %v3298_v41 = vpop.permute.xlu1 %964 }
 0x1d5   : > { %v3300_v35 = vpop.f32.mrb[70].mxu0 }
 0x1d6   : > { %4949 = vst [vmem:[#allocation22_spill] sm:$0xff] %v3300_v35  ;;  %1149 = vrot.lane.b32.xlu1 %v3094_v9, %s2705_s10  ;;  %v3304_v5 = vpop.f32.mrb[71].mxu0  ;;  %1582 = vrot.lane.b32.xlu0 %v3096_v10, %s2704_s18 }
 0x1d7   : > { %4950 = vst [vmem:[#allocation23_spill] sm:$0xff] %v3304_v5 }
 0x1d8   : > { %v3308_v7 = vpop.permute.xlu0 %1474  ;;  %v3310_v42 = vpop.permute.xlu1 %1476 }
 0x1d9   : > { %v3312_v3 = vpop.f32.mrb[72].mxu0 }
 0x1da   : > { %4951 = vst [vmem:[#allocation24_spill] sm:$0xff] %v3312_v3  ;;  %1646 = vrot.lane.b32.xlu1 %v3100_v12, %s2706_s11  ;;  %v3316_v8 = vpop.f32.mrb[73].mxu0  ;;  %1135 = vrot.lane.b32.xlu0 %v3098_v11, %s2705_s10 }
 0x1db   : > { %4952 = vst [vmem:[#allocation25_spill] sm:$0xff] %v3316_v8 }
 0x1dc   : > { %v3320_v9 = vpop.permute.xlu1 %1462  ;;  %v3322_v5 = vpop.permute.xlu0 %950 }
 0x1dd   : > { %v3324_v10 = vpop.f32.mrb[74].mxu0 }
 0x1de   : > { %4953 = vst [vmem:[#allocation26_spill] sm:$0xff] %v3324_v10  ;;  %1662 = vrot.lane.b32.xlu1 %v3106_v14, %s2706_s11  ;;  %v3328_v35 = vpop.f32.mrb[75].mxu0  ;;  %1151 = vrot.lane.b32.xlu0 %v3104_v13, %s2705_s10 }
 0x1df   : > { %4954 = vst [vmem:[#allocation27_spill] sm:$0xff] %v3328_v35 }
 0x1e0   : > { %v3332_v12 = vpop.permute.xlu1 %1478  ;;  %v3334_v8 = vpop.permute.xlu0 %966 }
 0x1e1   : > { %v3336_v3 = vpop.f32.mrb[76].mxu0 }
 0x1e2   : > { %4955 = vst [vmem:[#allocation28_spill] sm:$0xff] %v3336_v3  ;;  %1137 = vrot.lane.b32.xlu1 %v3108_v15, %s2705_s10  ;;  %v3340_v11 = vpop.f32.mrb[77].mxu0  ;;  %1648 = vrot.lane.b32.xlu0 %v3110_v16, %s2706_s11 }
 0x1e3   : > { %4956 = vst [vmem:[#allocation29_spill] sm:$0xff] %v3340_v11 }
 0x1e4   : > { %v3344_v14 = vpop.permute.xlu0 %1464  ;;  %v3346_v35 = vpop.permute.xlu1 %952 }
 0x1e5   : > { %4957 = vst [vmem:[#allocation30_spill] sm:$0xff] %v3346_v35  ;;  %v3348_v10 = vpop.f32.mrb[78].mxu0 }
 0x1e6   : > { %4958 = vst [vmem:[#allocation31_spill] sm:$0xff] %v3348_v10  ;;  %1153 = vrot.lane.b32.xlu1 %v3114_v17, %s2705_s10  ;;  %v3352_v13 = vpop.f32.mrb[79].mxu0  ;;  %1664 = vrot.lane.b32.xlu0 %v3116_v18, %s2706_s11 }
 0x1e7   : > { %4959 = vst [vmem:[#allocation32_spill] sm:$0xff] %v3352_v13 }
 0x1e8   : > { %v3356_v15 = vpop.permute.xlu0 %1480  ;;  %v3358_v11 = vpop.permute.xlu1 %968 }
 0x1e9   : > { %4960 = vst [vmem:[#allocation33_spill] sm:$0xff] %v3358_v11  ;;  %v3360_v3 = vpop.f32.mrb[80].mxu0 }
 0x1ea   : > { %1650 = vrot.lane.b32.xlu1 %v3120_v20, %s2706_s11  ;;  %v3364_v16 = vpop.f32.mrb[81].mxu0  ;;  %1139 = vrot.lane.b32.xlu0 %v3118_v19, %s2705_s10 }
 0x1ec   : > { %v3368_v17 = vpop.permute.xlu1 %1466  ;;  %v3370_v13 = vpop.permute.xlu0 %954 }
 0x1ed   : > { %4961 = vst [vmem:[#allocation34_spill] sm:$0xff] %v3368_v17  ;;  %4962 = vst [vmem:[#allocation35_spill] sm:$0xff] %v3370_v13  ;;  %v3372_v10 = vpop.f32.mrb[82].mxu0 }
 0x1ee   : > { %1666 = vrot.lane.b32.xlu1 %v3126_v22, %s2706_s11  ;;  %v3376_v18 = vpop.f32.mrb[83].mxu0  ;;  %1155 = vrot.lane.b32.xlu0 %v3124_v21, %s2705_s10 }
 0x1f0   : > { %v3380_v20 = vpop.permute.xlu1 %1482  ;;  %v3382_v35 = vpop.permute.xlu0 %970 }
 0x1f1   : > { %4963 = vst [vmem:[#allocation36_spill] sm:$0xff] %v3380_v20  ;;  %4964 = vst [vmem:[#allocation37_spill] sm:$0xff] %v3382_v35  ;;  %v3384_v11 = vpop.f32.mrb[84].mxu0 }
 0x1f2   : > { %1141 = vrot.lane.b32.xlu1 %v3128_v23, %s2705_s10  ;;  %v3388_v19 = vpop.f32.mrb[85].mxu0  ;;  %1652 = vrot.lane.b32.xlu0 %v3130_v24, %s2706_s11 }
 0x1f4   : > { %v3392_v22 = vpop.permute.xlu0 %1468  ;;  %v3394_v13 = vpop.permute.xlu1 %956 }
 0x1f5   : > { %4965 = vst [vmem:[#allocation38_spill] sm:$0xff] %v3392_v22  ;;  %4966 = vst [vmem:[#allocation39_spill] sm:$0xff] %v3394_v13  ;;  %v3396_v17 = vpop.f32.mrb[86].mxu0 }
 0x1f6   : > { %1157 = vrot.lane.b32.xlu1 %v3136_v25, %s2705_s10  ;;  %v3400_v21 = vpop.f32.mrb[87].mxu0  ;;  %1668 = vrot.lane.b32.xlu0 %v3138_v26, %s2706_s11 }
 0x1f8   : > { %v3404_v23 = vpop.permute.xlu0 %1484  ;;  %v3406_v35 = vpop.permute.xlu1 %972 }
 0x1f9   : > { %4967 = vst [vmem:[#allocation40_spill] sm:$0xff] %v3406_v35  ;;  %v3408_v20 = vpop.f32.mrb[88].mxu0 }
 0x1fa   : > { %1143 = vrot.lane.b32.xlu1 %v3140_v27, %s2705_s10  ;;  %v3412_v24 = vpop.f32.mrb[89].mxu0  ;;  %1145 = vrot.lane.b32.xlu0 %v3152_v31, %s2705_s10 }
 0x1fc   : > { %v3416_v25 = vpop.permute.xlu1 %1470  ;;  %v3418_v13 = vpop.permute.xlu0 %1037 }
 0x1fd   : > { %4968 = vst [vmem:[#allocation41_spill] sm:$0xff] %v3416_v25  ;;  %v3420_v22 = vpop.f32.mrb[90].mxu0 }
 0x1fe   : > { %1654 = vrot.lane.b32.xlu1 %v3142_v28, %s2706_s11  ;;  %v3424_v26 = vpop.f32.mrb[91].mxu0  ;;  %1656 = vrot.lane.b32.xlu0 %v3154_v32, %s2706_s11 }
 0x200   : > { %v3428_v27 = vpop.permute.xlu1 %1486  ;;  %v3430_v35 = vpop.permute.xlu0 %1053 }
 0x201   : > { %4969 = vst [vmem:[#allocation42_spill] sm:$0xff] %v3428_v27 }
 0x202   : > { %1159 = vrot.lane.b32.xlu1 %v3148_v29, %s2705_s10  ;;  %1161 = vrot.lane.b32.xlu0 %v3160_v33, %s2705_s10 }
 0x204   : > { %v3436_v31 = vpop.permute.xlu0 %1472  ;;  %v3438_v25 = vpop.permute.xlu1 %1039 }
 0x206   : > { %1670 = vrot.lane.b32.xlu1 %v3150_v30, %s2706_s11  ;;  %1672 = vrot.lane.b32.xlu0 %v3162_v34, %s2706_s11 }
 0x208   : > { %v3444_v28 = vpop.permute.xlu0 %1488  ;;  %v3446_v32 = vpop.permute.xlu1 %1055 }
 0x20a   : > { %1227 = vrot.lane.b32.xlu1 %v3176_v39, %s2707_s25  ;;  %1225 = vrot.lane.b32.xlu0 %v3166_v36, %s2707_s25 }
 0x20c   : > { %v3452_v29 = vpop.permute.xlu0 %1041  ;;  %v3454_v33 = vpop.permute.xlu1 %1043 }
 0x20e   : > { %1243 = vrot.lane.b32.xlu1 %v3182_v40, %s2707_s25  ;;  %1241 = vrot.lane.b32.xlu0 %v3174_v38, %s2707_s25 }
 0x210   : > { %v3460_v30 = vpop.permute.xlu0 %1552  ;;  %v3462_v34 = vpop.permute.xlu1 %1554 }
 0x212   : > { %1231 = vrot.lane.b32.xlu1 %v3198_v46, %s2707_s25  ;;  %1229 = vrot.lane.b32.xlu0 %v3188_v43, %s2707_s25 }
 0x214   : > { %v3468_v36 = vpop.permute.xlu0 %1057  ;;  %v3470_v39 = vpop.permute.xlu1 %1059 }
 0x216   : > { %1247 = vrot.lane.b32.xlu1 %v3206_v48, %s2707_s25  ;;  %1245 = vrot.lane.b32.xlu0 %v3194_v44, %s2707_s25 }
 0x218   : > { %v3476_v38 = vpop.permute.xlu0 %1568  ;;  %v3478_v40 = vpop.permute.xlu1 %1570 }
 0x21a   : > { %1235 = vrot.lane.b32.xlu1 %v3220_v53, %s2707_s25  ;;  %1233 = vrot.lane.b32.xlu0 %v3208_v49, %s2707_s25 }
 0x21c   : > { %v3484_v43 = vpop.permute.xlu1 %1556  ;;  %v3486_v46 = vpop.permute.xlu0 %1045 }
 0x21e   : > { %1251 = vrot.lane.b32.xlu1 %v3226_v54, %s2707_s25  ;;  %1249 = vrot.lane.b32.xlu0 %v3214_v50, %s2707_s25 }
 0x220   : > { %v3492_v44 = vpop.permute.xlu1 %1572  ;;  %v3494_v48 = vpop.permute.xlu0 %1061 }
 0x222   : > { %1237 = vrot.lane.b32.xlu1 %v3232_v57, %s2707_s25  ;;  %1239 = vrot.lane.b32.xlu0 %v3244_v60, %s2707_s25 }
 0x224   : > { %v3500_v49 = vpop.permute.xlu0 %1558  ;;  %v3502_v53 = vpop.permute.xlu1 %1047 }
 0x225   : > { %4970 = vst [vmem:[#allocation43_spill] sm:$0xff] %v3500_v49  ;;  %4971 = vst [vmem:[#allocation44_spill] sm:$0xff] %v3502_v53 }
 0x226   : > { %1253 = vrot.lane.b32.xlu1 %v3238_v58, %s2707_s25  ;;  %1255 = vrot.lane.b32.xlu0 %v3252_v62, %s2707_s25 }
 0x228   : > { %v3508_v50 = vpop.permute.xlu0 %1574  ;;  %v3510_v54 = vpop.permute.xlu1 %1063 }
 0x229   : > { %4972 = vst [vmem:[#allocation45_spill] sm:$0xff] %v3508_v50  ;;  %4973 = vst [vmem:[#allocation46_spill] sm:$0xff] %v3510_v54 }
 0x22a   : > { %1366 = vrot.lane.b32.xlu1 %v3372_v10, %s2700_s17  ;;  %1364 = vrot.lane.b32.xlu0 %v3360_v3, %s2700_s17 }
 0x22c   : > { %v3516_v57 = vpop.permute.xlu1 %1560  ;;  %v3518_v60 = vpop.permute.xlu0 %1049 }
 0x22d   : > { %4974 = vst [vmem:[#allocation47_spill] sm:$0xff] %v3516_v57  ;;  %4975 = vst [vmem:[#allocation48_spill] sm:$0xff] %v3518_v60 }
 0x22e   : > { %1382 = vrot.lane.b32.xlu1 %v3376_v18, %s2700_s17  ;;  %1380 = vrot.lane.b32.xlu0 %v3364_v16, %s2700_s17 }
 0x230   : > { %v3524_v58 = vpop.permute.xlu1 %1576  ;;  %v3526_v62 = vpop.permute.xlu0 %1065 }
 0x231   : > { %4976 = vst [vmem:[#allocation49_spill] sm:$0xff] %v3524_v58  ;;  %4977 = vst [vmem:[#allocation50_spill] sm:$0xff] %v3526_v62 }
 0x232   : > { %1370 = vrot.lane.b32.xlu1 %v3396_v17, %s2700_s17  ;;  %1368 = vrot.lane.b32.xlu0 %v3384_v11, %s2700_s17 }
 0x234   : > { %v3532_v3 = vpop.permute.xlu0 %1562  ;;  %v3534_v10 = vpop.permute.xlu1 %1051 }
 0x235   : > { %4978 = vst [vmem:[#allocation51_spill] sm:$0xff] %v3532_v3  ;;  %4979 = vst [vmem:[#allocation52_spill] sm:$0xff] %v3534_v10 }
 0x236   : > { %1386 = vrot.lane.b32.xlu1 %v3400_v21, %s2700_s17  ;;  %1384 = vrot.lane.b32.xlu0 %v3388_v19, %s2700_s17  ;;  %v1746_v19 = vld [vmem:[%s4854_s3 + $0x30] sm:$0xff] }
 0x238   : > { %v3540_v16 = vpop.permute.xlu0 %1578  ;;  %v3542_v18 = vpop.permute.xlu1 %1067 }
 0x239   : > { %4980 = vst [vmem:[#allocation53_spill] sm:$0xff] %v3540_v16  ;;  %4981 = vst [vmem:[#allocation54_spill] sm:$0xff] %v3542_v18  ;;  %v2234_v16 = vld [vmem:[%s4856_s5] sm:$0xff] }
 0x23a   : > { %1372 = vrot.lane.b32.xlu1 %v3408_v20, %s2700_s17  ;;  %1374 = vrot.lane.b32.xlu0 %v3420_v22, %s2700_s17  ;;  %v1747_v20 = vld [vmem:[%s4854_s3 + $0x38] sm:$0xff] }
 0x23c   : > { %v3548_v11 = vpop.permute.xlu1 %1564  ;;  %v3550_v17 = vpop.permute.xlu0 %1131 }
 0x23d   : > { %4982 = vst [vmem:[#allocation55_spill] sm:$0xff] %v3548_v11  ;;  %4983 = vst [vmem:[#allocation56_spill] sm:$0xff] %v3550_v17  ;;  %v974_v11 = vlaneseq }
 0x23e   : > { %1388 = vrot.lane.b32.xlu1 %v3412_v24, %s2700_s17  ;;  %1390 = vrot.lane.b32.xlu0 %v3424_v26, %s2700_s17 }
 0x23f   : > { %v3566_v3 = vand.u32 127, %v974_v11 }
 0x240   : > { %v3559_v21 = vpop.permute.xlu1 %1580  ;;  %v3564_v22 = vpop.permute.xlu0 %1147 }
 0x241   : > { %4984 = vst [vmem:[#allocation57_spill] sm:$0xff] %v3559_v21  ;;  %4985 = vst [vmem:[#allocation58_spill] sm:$0xff] %v3564_v22  ;;  %vm1163_vm0 = vcmp.lt.s32.totalorder %v3566_v3, 15  ;;  %vm1584_vm1 = vcmp.lt.s32.totalorder %v3566_v3, 112  ;;  %vm1678_vm2 = vcmp.lt.s32.totalorder %v3566_v3, 111  ;;  %vm976_vm3 = vcmp.lt.s32.totalorder %v3566_v3, 17 }
 0x242   : > { %1780 = vperm.xlu1 %2593, %v1746_v19   ;;  %1785 = vperm.xlu0 %2592, %v1747_v20   ;;  %vm1396_vm4 = vcmp.lt.s32.totalorder %v3566_v3, 127  ;;  %vm1490_vm5 = vcmp.lt.s32.totalorder %v3566_v3, 113  ;;  %v977_v49 = vsel %vm976_vm3, %v3218_v52, %v3228_v55  ;;  %v985_v50 = vsel %vm976_vm3, %v3228_v55, %v3218_v52  ;;  %v5012_v22 = vld [vmem:[#allocation17_spill] sm:$0xff] }
 0x243   : > { %v1412_v52 = vsel %vm1396_vm4, %v3258_v51, %v3242_v61  ;;  %v986_v55 = vsel %vm976_vm3, %v3260_v59, %v3230_v56  ;;  %vm1069_vm6 = vcmp.lt.s32.totalorder %v3566_v3, 16  ;;  %vm1257_vm7 = vcmp.lt.s32.totalorder %v3566_v3, 1 }
 0x244   : > { %v1134_v27 = vpop.permute.xlu1 %1133  ;;  %v1567_v24 = vpop.permute.xlu0 %1566 }
 0x246   : > { %1658 = vrot.lane.b32.xlu1 %v3246_v0, %s2706_s11  ;;  %1660 = vrot.lane.b32.xlu0 %v3256_v63, %s2706_s11 }
 0x248   : > { %v1150_v26 = vpop.permute.xlu1 %1149  ;;  %v1583_v21 = vpop.permute.xlu0 %1582 }
 0x249   : > { %v3576_v19 = vsel %vm1163_vm0, %v1134_v27, %v1150_v26  ;;  %v3580_v20 = vsel %vm1163_vm0, %v1150_v26, %v1134_v27  ;;  %v3584_v0 = vsel %vm1584_vm1, %v1567_v24, %v1583_v21  ;;  %v3588_v63 = vsel %vm1584_vm1, %v1583_v21, %v1567_v24  ;;  %v2235_v26 = vld [vmem:[%s4856_s5 + $0x8] sm:$0xff] }
 0x24a   : > { %4986 = vst [vmem:[#allocation59_spill] sm:$0xff] %v3576_v19  ;;  %4987 = vst [vmem:[#allocation60_spill] sm:$0xff] %v3580_v20  ;;  %1674 = vrot.lane.b32.xlu1 %v3254_v47, %s2706_s11  ;;  %1676 = vrot.lane.b32.xlu0 %v3268_v2, %s2706_s11  ;;  %v996_v21 = vshrl.u32 %v974_v11, 7  ;;  %v2430_v19 = vld [vmem:[%s4852_s1 + $0x4] sm:$0x3] }
 0x24b   : > { %4988 = vst [vmem:[#allocation61_spill] sm:$0xff] %v3584_v0  ;;  %4989 = vst [vmem:[#allocation62_spill] sm:$0xff] %v3588_v63 }
 0x24c   : > { %v1647_v27 = vpop.permute.xlu1 %1646  ;;  %v1136_v0 = vpop.permute.xlu0 %1135  ;;  %v3617_v11 = vsub.s32 0, %v996_v21 }
 0x24e   : > { %2238 = vperm.xlu1 %2593, %v2234_v16   ;;  %2243 = vperm.xlu0 %2592, %v2235_v26   ;;  %v3619_v26 = vsub.s32 1, %v996_v21 }
 0x250   : > { %v1663_v24 = vpop.permute.xlu1 %1662  ;;  %v1152_v63 = vpop.permute.xlu0 %1151 }
 0x251   : > { %v3603_v47 = vsel %vm1678_vm2, %v1647_v27, %v1663_v24  ;;  %v3607_v2 = vsel %vm1678_vm2, %v1663_v24, %v1647_v27  ;;  %v3611_v10 = vsel %vm1163_vm0, %v1136_v0, %v1152_v63  ;;  %v3615_v16 = vsel %vm1163_vm0, %v1152_v63, %v1136_v0  ;;  %v2433_v27 = vld [vmem:[%s4852_s1 + $0xa] sm:$0x3]  ;;  %v2434_v24 = vld [vmem:[%s4852_s1 + $0xc] sm:$0x3]  ;;  %v2432_v0 = vld [vmem:[%s4852_s1 + $0x8] sm:$0x3] }
 0x252   : > { %4990 = vst [vmem:[#allocation63_spill] sm:$0xff] %v3603_v47  ;;  %4991 = vst [vmem:[#allocation64_spill] sm:$0xff] %v3607_v2  ;;  %v993_v47 = vld [vmem:[%s4852_s1] sm:$0x3]  ;;  %v3642_v57 = vrot.slane %v2433_v27, %v3617_v11  ;;  %v3645_v58 = vrot.slane %v2433_v27, %v3619_v26  ;;  %v3649_v60 = vrot.slane %v2434_v24, %v3617_v11  ;;  %v2435_v27 = vld [vmem:[%s4852_s1 + $0xe] sm:$0x3] }
 0x253   : > { %4992 = vst [vmem:[#allocation65_spill] sm:$0xff] %v3611_v10  ;;  %4993 = vst [vmem:[#allocation66_spill] sm:$0xff] %v3615_v16  ;;  %v3635_v63 = vrot.slane %v993_v47, %v3617_v11  ;;  %v3638_v21 = vrot.slane %v993_v47, %v3619_v26  ;;  %v3652_v10 = vrot.slane %v2434_v24, %v3619_v26  ;;  %v2429_v47 = vld [vmem:[%s4852_s1 + $0x2] sm:$0x3] }
 0x254   : > { %v1138_v18 = vpop.permute.xlu1 %1137  ;;  %v1649_v2 = vpop.permute.xlu0 %1648  ;;  %4996 = vst [vmem:[#allocation69_spill] sm:$0xff] %v3642_v57  ;;  %4997 = vst [vmem:[#allocation70_spill] sm:$0xff] %v3645_v58  ;;  %v3658_v16 = vrot.slane %v2432_v0, %v3617_v11  ;;  %v3725_v20 = vrot.slane %v2435_v27, %v3619_v26 }
 0x255   : > { %4994 = vst [vmem:[#allocation67_spill] sm:$0xff] %v3635_v63  ;;  %4995 = vst [vmem:[#allocation68_spill] sm:$0xff] %v3638_v21 }
 0x256   : > { %4998 = vst [vmem:[#allocation71_spill] sm:$0xff] %v3649_v60  ;;  %4999 = vst [vmem:[#allocation72_spill] sm:$0xff] %v3652_v10 }
 0x257   : > { %5000 = vst [vmem:[#allocation73_spill] sm:$0xff] %v3658_v16  ;;  %5007 = vst [vmem:[#allocation80_spill] sm:$0xff] %v3725_v20 }
 0x258   : > { %v1154_v62 = vpop.permute.xlu1 %1153  ;;  %v1665_v53 = vpop.permute.xlu0 %1664 }
 0x259   : > { %v3665_v54 = vsel %vm1163_vm0, %v1138_v18, %v1154_v62  ;;  %v3669_v24 = vsel %vm1163_vm0, %v1154_v62, %v1138_v18  ;;  %v3688_v62 = vsel %vm1678_vm2, %v1665_v53, %v1649_v2  ;;  %v1404_v18 = vsel %vm1396_vm4, %v3242_v61, %v3258_v51 }
 0x25a   : > { %5001 = vst [vmem:[#allocation74_spill] sm:$0xff] %v3665_v54  ;;  %5002 = vst [vmem:[#allocation75_spill] sm:$0xff] %v3669_v24  ;;  %v3684_v54 = vsel %vm1678_vm2, %v1649_v2, %v1665_v53  ;;  %v978_v53 = vsel %vm976_vm3, %v3230_v56, %v3260_v59  ;;  %v3710_v2 = vrot.slane %v2429_v47, %v3617_v11  ;;  %v2436_v59 = vld [vmem:[%s4852_s1 + $0x10] sm:$0x3] }
 0x25b   : > { %5003 = vst [vmem:[#allocation76_spill] sm:$0xff] %v3684_v54  ;;  %5004 = vst [vmem:[#allocation77_spill] sm:$0xff] %v3688_v62  ;;  %v3703_v54 = vrot.slane %v2432_v0, %v3619_v26  ;;  %v3713_v62 = vrot.slane %v2429_v47, %v3619_v26  ;;  %v3716_v51 = vrot.slane %v2435_v27, %v3617_v11 }
 0x25c   : > { %v1651_v61 = vpop.permute.xlu1 %1650  ;;  %v3719_v24 = vmul.f32 %v3635_v63, %v985_v50  ;;  %v3722_v0 = vmul.f32 %v3638_v21, %v977_v49  ;;  %v3728_v56 = vrot.slane %v2430_v19, %v3617_v11  ;;  %v1140_v47 = vpop.permute.xlu0 %1139  ;;  %v3737_v50 = vmul.f32 %v3645_v58, %v1412_v52 }
 0x25d   : > { %5005 = vst [vmem:[#allocation78_spill] sm:$0xff] %v3703_v54  ;;  %5006 = vst [vmem:[#allocation79_spill] sm:$0xff] %v3716_v51  ;;  %v3734_v51 = vmul.f32 %v3642_v57, %v1404_v18  ;;  %v3740_v49 = vmul.f32 %v3635_v63, %v986_v55  ;;  %v3743_v27 = vrot.slane %v2430_v19, %v3619_v26  ;;  %v5013_v55 = vld [vmem:[#allocation19_spill] sm:$0xff]  ;;  %v5016_v57 = vld [vmem:[#allocation18_spill] sm:$0xff] }
 0x25e   : > { %5008 = vst [vmem:[#allocation81_spill] sm:$0xff] %v3728_v56  ;;  %5010 = vst [vmem:[#allocation83_spill] sm:$0xff] %v3737_v50  ;;  %v3746_v20 = vmul.f32 %v3638_v21, %v978_v53  ;;  %v5011_v56 = vld [vmem:[#allocation16_spill] sm:$0xff]  ;;  %v3754_v18 = vmul.f32 %v3703_v54, %v5012_v22  ;;  %v3758_v52 = vmul.f32 %v3658_v16, %v3276_v37 }
 0x25f   : > { %5009 = vst [vmem:[#allocation82_spill] sm:$0xff] %v3734_v51  ;;  %v3750_v17 = vmul.f32 %v3658_v16, %v5011_v56  ;;  %v987_v19 = vsel %vm976_vm3, %v3296_v6, %v3272_v1  ;;  %v3766_v53 = vmul.f32 %v3703_v54, %v5013_v55  ;;  %v3769_v56 = vrot.slane %v2436_v59, %v3617_v11 }
 0x260   : > { %v3772_v58 = vrot.slane %v2436_v59, %v3619_v26  ;;  %v1667_v22 = vpop.permute.xlu1 %1666  ;;  %v979_v37 = vsel %vm976_vm3, %v3272_v1, %v3296_v6  ;;  %v988_v50 = vsel %vm976_vm3, %v3298_v41, %v5016_v57  ;;  %v1156_v59 = vpop.permute.xlu0 %1155  ;;  %v3796_v1 = vmul.f32 %v3658_v16, %v3288_v45 }
 0x261   : > { %5014 = vst [vmem:[#allocation16_spill] sm:$0xff] %v3769_v56  ;;  %v3784_v55 = vsel %vm1678_vm2, %v1651_v61, %v1667_v22  ;;  %v3788_v51 = vsel %vm1678_vm2, %v1667_v22, %v1651_v61  ;;  %v3800_v6 = vsel %vm1163_vm0, %v1140_v47, %v1156_v59  ;;  %v3807_v61 = vmul.f32 %v3635_v63, %v987_v19 }
 0x262   : > { %5015 = vst [vmem:[#allocation17_spill] sm:$0xff] %v3772_v58  ;;  %5017 = vst [vmem:[#allocation19_spill] sm:$0xff] %v3784_v55  ;;  %v980_v58 = vsel %vm976_vm3, %v5016_v57, %v3298_v41  ;;  %v3804_v55 = vsel %vm1163_vm0, %v1156_v59, %v1140_v47  ;;  %v1491_v41 = vsel %vm1490_vm5, %v3284_v4, %v3308_v7  ;;  %v5022_v57 = vld [vmem:[#allocation21_spill] sm:$0xff]  ;;  %v5024_v59 = vld [vmem:[#allocation20_spill] sm:$0xff] }
 0x263   : > { %5018 = vst [vmem:[#allocation18_spill] sm:$0xff] %v3788_v51  ;;  %5019 = vst [vmem:[#allocation84_spill] sm:$0xff] %v3796_v1  ;;  %v1499_v45 = vsel %vm1490_vm5, %v3308_v7, %v3284_v4  ;;  %v3819_v22 = vmul.f32 %v3703_v54, %v5022_v57  ;;  %v3822_v47 = vmul.f32 %v3638_v21, %v979_v37  ;;  %v5025_v37 = vld [vmem:[#allocation22_spill] sm:$0xff] }
 0x264   : > { %5020 = vst [vmem:[#allocation85_spill] sm:$0xff] %v3800_v6  ;;  %5021 = vst [vmem:[#allocation86_spill] sm:$0xff] %v3804_v55  ;;  %v3825_v19 = vmul.f32 %v3635_v63, %v988_v50  ;;  %v1492_v51 = vsel %vm1490_vm5, %v5024_v59, %v3310_v42  ;;  %v1500_v4 = vsel %vm1490_vm5, %v3310_v42, %v5024_v59  ;;  %v1142_v7 = vpop.permute.xlu1 %1141  ;;  %v1653_v42 = vpop.permute.xlu0 %1652 }
 0x265   : > { %5023 = vst [vmem:[#allocation21_spill] sm:$0xff] %v3819_v22  ;;  %v3836_v57 = vmul.f32 %v3638_v21, %v980_v58  ;;  %v1493_v50 = vsel %vm1490_vm5, %v3320_v9, %v3332_v12  ;;  %v3845_v56 = vmul.f32 %v3658_v16, %v5025_v37  ;;  %v5027_v22 = vld [vmem:[#allocation23_spill] sm:$0xff]  ;;  %v3852_v59 = vmul.f32 %v3649_v60, %v1491_v41 }
 0x266   : > { %v3849_v1 = vmul.f32 %v3703_v54, %v5027_v22  ;;  %v3855_v58 = vmul.f32 %v3652_v10, %v1499_v45  ;;  %v1501_v6 = vsel %vm1490_vm5, %v3332_v12, %v3320_v9  ;;  %v989_v37 = vsel %vm976_vm3, %v3334_v8, %v3322_v5  ;;  %v5033_v45 = vld [vmem:[#allocation24_spill] sm:$0xff]  ;;  %v5036_v12 = vld [vmem:[#allocation25_spill] sm:$0xff] }
 0x267   : > { %5026 = vst [vmem:[#allocation20_spill] sm:$0xff] %v3845_v56  ;;  %5029 = vst [vmem:[#allocation23_spill] sm:$0xff] %v3852_v59  ;;  %v3866_v22 = vmul.f32 %v3649_v60, %v1492_v51  ;;  %v3869_v55 = vmul.f32 %v3652_v10, %v1500_v4  ;;  %v981_v41 = vsel %vm976_vm3, %v3322_v5, %v3334_v8  ;;  %v5038_v51 = vld [vmem:[#allocation26_spill] sm:$0xff] }
 0x268   : > { %5028 = vst [vmem:[#allocation22_spill] sm:$0xff] %v3849_v1  ;;  %5030 = vst [vmem:[#allocation87_spill] sm:$0xff] %v3855_v58  ;;  %v3877_v58 = vmul.f32 %v3658_v16, %v5033_v45  ;;  %v3880_v9 = vmul.f32 %v3649_v60, %v1493_v50  ;;  %v3884_v59 = vmul.f32 %v3703_v54, %v5036_v12  ;;  %v1158_v5 = vpop.permute.xlu1 %1157  ;;  %v1669_v50 = vpop.permute.xlu0 %1668  ;;  %v5057_v1 = vld [vmem:[#allocation35_spill] sm:$0xff] }
 0x269   : > { %5031 = vst [vmem:[#allocation88_spill] sm:$0xff] %v3866_v22  ;;  %5032 = vst [vmem:[#allocation89_spill] sm:$0xff] %v3869_v55  ;;  %v3888_v4 = vmul.f32 %v3658_v16, %v5038_v51  ;;  %v5040_v55 = vld [vmem:[#allocation27_spill] sm:$0xff]  ;;  %v3895_v8 = vmul.f32 %v3652_v10, %v1501_v6  ;;  %v3898_v45 = vmul.f32 %v3635_v63, %v989_v37 }
 0x26a   : > { %5034 = vst [vmem:[#allocation24_spill] sm:$0xff] %v3877_v58  ;;  %5035 = vst [vmem:[#allocation90_spill] sm:$0xff] %v3880_v9  ;;  %v3892_v22 = vmul.f32 %v3703_v54, %v5040_v55  ;;  %v3902_v12 = vsel %vm1163_vm0, %v1142_v7, %v1158_v5  ;;  %v3906_v51 = vsel %vm1163_vm0, %v1158_v5, %v1142_v7  ;;  %v5046_v5 = vld [vmem:[#allocation30_spill] sm:$0xff] }
 0x26b   : > { %5037 = vst [vmem:[#allocation25_spill] sm:$0xff] %v3884_v59  ;;  %5039 = vst [vmem:[#allocation26_spill] sm:$0xff] %v3888_v4  ;;  %v3909_v9 = vmul.f32 %v3638_v21, %v981_v41  ;;  %v1494_v55 = vsel %vm1490_vm5, %v3344_v14, %v3356_v15  ;;  %v3917_v6 = vsel %vm1678_vm2, %v1653_v42, %v1669_v50  ;;  %v5045_v41 = vld [vmem:[#allocation33_spill] sm:$0xff]  ;;  %v5053_v4 = vld [vmem:[#allocation31_spill] sm:$0xff] }
 0x26c   : > { %5041 = vst [vmem:[#allocation27_spill] sm:$0xff] %v3892_v22  ;;  %5042 = vst [vmem:[#allocation91_spill] sm:$0xff] %v3895_v8  ;;  %v3921_v37 = vsel %vm1678_vm2, %v1669_v50, %v1653_v42  ;;  %v1502_v7 = vsel %vm1490_vm5, %v3356_v15, %v3344_v14  ;;  %v982_v8 = vsel %vm976_vm3, %v5046_v5, %v5045_v41  ;;  %v5049_v42 = vld [vmem:[#allocation36_spill] sm:$0xff]  ;;  %v5050_v50 = vld [vmem:[#allocation34_spill] sm:$0xff] }
 0x26d   : > { %5043 = vst [vmem:[#allocation92_spill] sm:$0xff] %v3917_v6  ;;  %5044 = vst [vmem:[#allocation93_spill] sm:$0xff] %v3921_v37  ;;  %v990_v59 = vsel %vm976_vm3, %v5045_v41, %v5046_v5  ;;  %v5047_v6 = vld [vmem:[#allocation28_spill] sm:$0xff]  ;;  %v1495_v37 = vsel %vm1490_vm5, %v5050_v50, %v5049_v42  ;;  %v1503_v14 = vsel %vm1490_vm5, %v5049_v42, %v5050_v50  ;;  %v5051_v15 = vld [vmem:[#allocation29_spill] sm:$0xff] }
 0x26e   : > { %v3937_v58 = vmul.f32 %v3658_v16, %v5047_v6  ;;  %v3949_v22 = vmul.f32 %v3703_v54, %v5051_v15  ;;  %v3953_v41 = vmul.f32 %v3658_v16, %v5053_v4  ;;  %v1144_v6 = vpop.permute.xlu1 %1143  ;;  %v3956_v5 = vmul.f32 %v3649_v60, %v1494_v55  ;;  %v5058_v50 = vld [vmem:[#allocation32_spill] sm:$0xff]  ;;  %v1146_v4 = vpop.permute.xlu0 %1145 }
 0x26f   : > { %v3968_v15 = vmul.f32 %v3703_v54, %v5058_v50  ;;  %v3971_v16 = vmul.f32 %v3652_v10, %v1502_v7  ;;  %v3974_v55 = vmul.f32 %v3635_v63, %v990_v59  ;;  %v5063_v7 = vld [vmem:[#allocation39_spill] sm:$0xff]  ;;  %v5064_v50 = vld [vmem:[#allocation40_spill] sm:$0xff] }
 0x270   : > { %5048 = vst [vmem:[#allocation33_spill] sm:$0xff] %v3937_v58  ;;  %5052 = vst [vmem:[#allocation30_spill] sm:$0xff] %v3949_v22  ;;  %v5056_v58 = vld [vmem:[#allocation37_spill] sm:$0xff] }
 0x271   : > { %5054 = vst [vmem:[#allocation28_spill] sm:$0xff] %v3953_v41  ;;  %5055 = vst [vmem:[#allocation36_spill] sm:$0xff] %v3956_v5  ;;  %v983_v56 = vsel %vm976_vm3, %v5057_v1, %v5056_v58  ;;  %v991_v42 = vsel %vm976_vm3, %v5056_v58, %v5057_v1  ;;  %v3977_v5 = vmul.f32 %v3638_v21, %v982_v8  ;;  %v5060_v41 = vld [vmem:[#allocation38_spill] sm:$0xff] }
 0x272   : > { %5059 = vst [vmem:[#allocation34_spill] sm:$0xff] %v3971_v16  ;;  %v1496_v22 = vsel %vm1490_vm5, %v5060_v41, %v3404_v23  ;;  %v3984_v1 = vmul.f32 %v3649_v60, %v1495_v37  ;;  %v3987_v58 = vmul.f32 %v3652_v10, %v1503_v14  ;;  %v1504_v59 = vsel %vm1490_vm5, %v3404_v23, %v5060_v41  ;;  %v4011_v14 = vpop.permute.xlu1 %1654 }
 0x273   : > { %v992_v8 = vsel %vm976_vm3, %v5064_v50, %v5063_v7  ;;  %v3998_v54 = vmul.f32 %v3635_v63, %v991_v42  ;;  %v4001_v16 = vmul.f32 %v3638_v21, %v983_v56  ;;  %v1070_v37 = vsel %vm1069_vm6, %v3418_v13, %v3430_v35 }
 0x274   : > { %5061 = vst [vmem:[#allocation29_spill] sm:$0xff] %v3984_v1  ;;  %5062 = vst [vmem:[#allocation31_spill] sm:$0xff] %v3987_v58  ;;  %v1078_v23 = vsel %vm1069_vm6, %v3430_v35, %v3418_v13  ;;  %v4014_v41 = vmul.f32 %v3649_v60, %v1496_v22  ;;  %v984_v56 = vsel %vm976_vm3, %v5063_v7, %v5064_v50  ;;  %v4028_v13 = vpop.permute.xlu0 %1656 }
 0x275   : > { %v1071_v42 = vsel %vm1069_vm6, %v3438_v25, %v3446_v32  ;;  %v1079_v35 = vsel %vm1069_vm6, %v3446_v32, %v3438_v25  ;;  %5066 = vst [vmem:[#allocation35_spill] sm:$0xff] %v4028_v13  ;;  %v4031_v22 = vmul.f32 %v3652_v10, %v1504_v59  ;;  %v1072_v7 = vsel %vm1069_vm6, %v3452_v29, %v3468_v36 }
 0x276   : > { %5065 = vst [vmem:[#allocation37_spill] sm:$0xff] %v4014_v41  ;;  %v4034_v41 = vmul.f32 %v3635_v63, %v992_v8  ;;  %v1080_v50 = vsel %vm1069_vm6, %v3468_v36, %v3452_v29  ;;  %v1099_v25 = vmul.f32 %v3710_v2, %v1078_v23  ;;  %v1100_v32 = vmul.f32 %v3713_v62, %v1070_v37  ;;  %v1160_v23 = vpop.permute.xlu1 %1159 }
 0x277   : > { %5067 = vst [vmem:[#allocation32_spill] sm:$0xff] %v4031_v22  ;;  %v1073_v59 = vsel %vm1069_vm6, %v3454_v33, %v3470_v39  ;;  %v1081_v8 = vsel %vm1069_vm6, %v3470_v39, %v3454_v33  ;;  %v1498_v63 = vsel %vm1490_vm5, %v3436_v31, %v3444_v28  ;;  %v1506_v29 = vsel %vm1490_vm5, %v3444_v28, %v3436_v31  ;;  %v2431_v22 = vld [vmem:[%s4852_s1 + $0x6] sm:$0x3] }
 0x278   : > { %v1101_v36 = vmul.f32 %v3710_v2, %v1079_v35  ;;  %v1102_v37 = vmul.f32 %v3713_v62, %v1071_v42  ;;  %v1103_v33 = vmul.f32 %v3710_v2, %v1080_v50  ;;  %v1104_v39 = vmul.f32 %v3713_v62, %v1072_v7  ;;  %v1162_v28 = vpop.permute.xlu0 %1161 }
 0x279   : > { %v4071_v58 = vsel %vm1163_vm0, %v1144_v6, %v1160_v23  ;;  %v4075_v31 = vsel %vm1163_vm0, %v1160_v23, %v1144_v6  ;;  %v1105_v42 = vmul.f32 %v3710_v2, %v1081_v8  ;;  %v1106_v35 = vmul.f32 %v3713_v62, %v1073_v59 }
 0x27a   : > { %v4081_v1 = vsel %vm1163_vm0, %v1146_v4, %v1162_v28  ;;  %v4085_v7 = vsel %vm1163_vm0, %v1162_v28, %v1146_v4  ;;  %v4088_v50 = vmul.f32 %v3638_v21, %v984_v56  ;;  %v4092_v6 = vrot.slane %v2431_v22, %v3617_v11  ;;  %v4105_v56 = vpop.permute.xlu1 %1670 }
 0x27b   : > { %v4095_v8 = vrot.slane %v2431_v22, %v3619_v26  ;;  %v1115_v59 = vadd.f32 %v1099_v25, %v3719_v24  ;;  %v1116_v23 = vadd.f32 %v1100_v32, %v3722_v0  ;;  %v4100_v13 = vmul.f32 %v3649_v60, %v1498_v63  ;;  %v5074_v25 = vld [vmem:[#allocation79_spill] sm:$0xff]  ;;  %v5085_v60 = vld [vmem:[#allocation45_spill] sm:$0xff] }
 0x27c   : > { %v4103_v4 = vmul.f32 %v3652_v10, %v1506_v29  ;;  %v1117_v28 = vadd.f32 %v1101_v36, %v3740_v49  ;;  %v1118_v11 = vadd.f32 %v1102_v37, %v3746_v20  ;;  %v4110_v21 = vadd.f32 %v1103_v33, %v3807_v61  ;;  %v4115_v24 = vpop.permute.xlu0 %1672  ;;  %v5076_v29 = vld [vmem:[#allocation80_spill] sm:$0xff]  ;;  %v5079_v33 = vld [vmem:[#allocation81_spill] sm:$0xff] }
 0x27d   : > { %5068 = vst [vmem:[#allocation38_spill] sm:$0xff] %v4095_v8  ;;  %5069 = vst [vmem:[#allocation39_spill] sm:$0xff] %v4100_v13  ;;  %v4113_v26 = vadd.f32 %v1104_v39, %v3822_v47  ;;  %v4118_v63 = vadd.f32 %v1105_v42, %v3825_v19  ;;  %v4121_v0 = vadd.f32 %v1106_v35, %v3836_v57  ;;  %v5073_v57 = vld [vmem:[#allocation56_spill] sm:$0xff]  ;;  %v5089_v13 = vld [vmem:[#allocation75_spill] sm:$0xff] }
 0x27e   : > { %5070 = vst [vmem:[#allocation40_spill] sm:$0xff] %v4103_v4  ;;  %5071 = vst [vmem:[#allocation94_spill] sm:$0xff] %v4115_v24  ;;  %v1585_v49 = vsel %vm1584_vm1, %v3460_v30, %v3476_v38  ;;  %v1593_v20 = vsel %vm1584_vm1, %v3476_v38, %v3460_v30  ;;  %v1586_v61 = vsel %vm1584_vm1, %v3462_v34, %v3478_v40  ;;  %v5078_v37 = vld [vmem:[#allocation60_spill] sm:$0xff] }
 0x27f   : > { %v1594_v47 = vsel %vm1584_vm1, %v3478_v40, %v3462_v34  ;;  %v1587_v19 = vsel %vm1584_vm1, %v3484_v43, %v3492_v44  ;;  %v1595_v30 = vsel %vm1584_vm1, %v3492_v44, %v3484_v43  ;;  %v1074_v38 = vsel %vm1069_vm6, %v3486_v46, %v3494_v48  ;;  %v5072_v40 = vld [vmem:[#allocation58_spill] sm:$0xff]  ;;  %v1228_v44 = vpop.permute.xlu1 %1227 }
 0x280   : > { %v1082_v34 = vsel %vm1069_vm6, %v3494_v48, %v3486_v46  ;;  %v1164_v22 = vsel %vm1163_vm0, %v5073_v57, %v5072_v40  ;;  %v1172_v43 = vsel %vm1163_vm0, %v5072_v40, %v5073_v57  ;;  %v4164_v32 = vmul.f32 %v5074_v25, %v1585_v49  ;;  %v5080_v48 = vld [vmem:[#allocation59_spill] sm:$0xff]  ;;  %v1226_v42 = vpop.permute.xlu0 %1225 }
 0x281   : > { %v4167_v36 = vmul.f32 %v5076_v29, %v1593_v20  ;;  %v1195_v46 = vmul.f32 %v5079_v33, %v5078_v37  ;;  %v1196_v39 = vmul.f32 %v3743_v27, %v5080_v48  ;;  %v4174_v35 = vmul.f32 %v5074_v25, %v1586_v61  ;;  %v5086_v61 = vld [vmem:[#allocation43_spill] sm:$0xff] }
 0x282   : > { %5075 = vst [vmem:[#allocation58_spill] sm:$0xff] %v4164_v32  ;;  %v4177_v10 = vmul.f32 %v5076_v29, %v1594_v47  ;;  %v4180_v40 = vmul.f32 %v5074_v25, %v1587_v19  ;;  %v4183_v49 = vmul.f32 %v5076_v29, %v1595_v30  ;;  %v1107_v20 = vmul.f32 %v3710_v2, %v1082_v34  ;;  %v5087_v30 = vld [vmem:[#allocation46_spill] sm:$0xff] }
 0x283   : > { %5077 = vst [vmem:[#allocation56_spill] sm:$0xff] %v4167_v36  ;;  %5081 = vst [vmem:[#allocation79_spill] sm:$0xff] %v4174_v35  ;;  %v1108_v57 = vmul.f32 %v3713_v62, %v1074_v38  ;;  %v1193_v37 = vmul.f32 %v5079_v33, %v1172_v43  ;;  %v1194_v48 = vmul.f32 %v3743_v27, %v1164_v22  ;;  %v1244_v22 = vpop.permute.xlu1 %1243 }
 0x284   : > { %5082 = vst [vmem:[#allocation80_spill] sm:$0xff] %v4177_v10  ;;  %5083 = vst [vmem:[#allocation60_spill] sm:$0xff] %v4180_v40  ;;  %v1588_v47 = vsel %vm1584_vm1, %v5086_v61, %v5085_v60  ;;  %v1596_v19 = vsel %vm1584_vm1, %v5085_v60, %v5086_v61  ;;  %v1211_v43 = vadd.f32 %v1195_v46, %v1117_v28  ;;  %v1242_v36 = vpop.permute.xlu0 %1241 }
 0x285   : > { %5084 = vst [vmem:[#allocation81_spill] sm:$0xff] %v4183_v49  ;;  %v5088_v49 = vld [vmem:[#allocation44_spill] sm:$0xff]  ;;  %v1212_v40 = vadd.f32 %v1196_v39, %v1118_v11  ;;  %v1259_v32 = vsel %vm1257_vm7, %v1228_v44, %v1244_v22  ;;  %v1267_v60 = vsel %vm1257_vm7, %v1244_v22, %v1228_v44  ;;  %v1258_v61 = vsel %vm1257_vm7, %v1226_v42, %v1242_v36 }
 0x286   : > { %v1075_v34 = vsel %vm1069_vm6, %v5088_v49, %v5087_v30  ;;  %v1083_v38 = vsel %vm1069_vm6, %v5087_v30, %v5088_v49  ;;  %v1266_v10 = vsel %vm1257_vm7, %v1242_v36, %v1226_v42  ;;  %v1289_v35 = vmul.f32 %v4092_v6, %v1267_v60  ;;  %v5090_v42 = vld [vmem:[#allocation74_spill] sm:$0xff] }
 0x287   : > { %v1290_v49 = vmul.f32 %v4095_v8, %v1259_v32  ;;  %v1209_v30 = vadd.f32 %v1193_v37, %v1115_v59  ;;  %v1210_v28 = vadd.f32 %v1194_v48, %v1116_v23  ;;  %v1287_v11 = vmul.f32 %v4092_v6, %v1266_v10  ;;  %v1232_v4 = vpop.permute.xlu1 %1231 }
 0x288   : > { %v1288_v46 = vmul.f32 %v4095_v8, %v1258_v61  ;;  %v1109_v39 = vmul.f32 %v3710_v2, %v1083_v38  ;;  %v1110_v44 = vmul.f32 %v3713_v62, %v1075_v34  ;;  %v1305_v22 = vadd.f32 %v1289_v35, %v1211_v43  ;;  %v1230_v23 = vpop.permute.xlu0 %1229 }
 0x289   : > { %v1306_v24 = vadd.f32 %v1290_v49, %v1212_v40  ;;  %v1199_v36 = vmul.f32 %v5079_v33, %v5089_v13  ;;  %v1200_v60 = vmul.f32 %v3743_v27, %v5090_v42  ;;  %v1303_v32 = vadd.f32 %v1287_v11, %v1209_v30  ;;  %v5091_v40 = vld [vmem:[#allocation66_spill] sm:$0xff]  ;;  %v5092_v13 = vld [vmem:[#allocation65_spill] sm:$0xff] }
 0x28a   : > { %v1304_v59 = vadd.f32 %v1288_v46, %v1210_v28  ;;  %v1123_v10 = vadd.f32 %v1107_v20, %v3898_v45  ;;  %v1124_v37 = vadd.f32 %v1108_v57, %v3909_v9  ;;  %v4226_v48 = vadd.f32 %v3758_v52, %v1305_v22  ;;  %v5093_v11 = vld [vmem:[#allocation50_spill] sm:$0xff] }
 0x28b   : > { %v4229_v35 = vadd.f32 %v3766_v53, %v1306_v24  ;;  %v1197_v34 = vmul.f32 %v5079_v33, %v5091_v40  ;;  %v1198_v38 = vmul.f32 %v3743_v27, %v5092_v13  ;;  %v4236_v43 = vadd.f32 %v3750_v17, %v1303_v32  ;;  %v1248_v24 = vpop.permute.xlu1 %1247  ;;  %v5097_v13 = vld [vmem:[#allocation20_spill] sm:$0xff] }
 0x28c   : > { %v4239_v61 = vadd.f32 %v3754_v18, %v1304_v59  ;;  %v4242_v9 = vmul.f32 %v5074_v25, %v1588_v47  ;;  %v4245_v52 = vmul.f32 %v5076_v29, %v1596_v19  ;;  %v1125_v53 = vadd.f32 %v1109_v39, %v3974_v55  ;;  %v1246_v17 = vpop.permute.xlu0 %1245  ;;  %v5095_v59 = vld [vmem:[#allocation49_spill] sm:$0xff] }
 0x28d   : > { %v1126_v45 = vadd.f32 %v1110_v44, %v3977_v5  ;;  %v1215_v20 = vadd.f32 %v1199_v36, %v4118_v63  ;;  %v1216_v57 = vadd.f32 %v1200_v60, %v4121_v0  ;;  %v1261_v18 = vsel %vm1257_vm7, %v1232_v4, %v1248_v24 }
 0x28e   : > { %v1269_v47 = vsel %vm1257_vm7, %v1248_v24, %v1232_v4  ;;  %v1260_v19 = vsel %vm1257_vm7, %v1230_v23, %v1246_v17  ;;  %v1268_v55 = vsel %vm1257_vm7, %v1246_v17, %v1230_v23  ;;  %v1294_v49 = vmul.f32 %v4095_v8, %v1261_v18  ;;  %v5094_v4 = vld [vmem:[#allocation48_spill] sm:$0xff]  ;;  %v5096_v23 = vld [vmem:[#allocation47_spill] sm:$0xff] }
 0x28f   : > { %v1293_v5 = vmul.f32 %v4092_v6, %v1269_v47  ;;  %v1213_v63 = vadd.f32 %v1197_v34, %v4110_v21  ;;  %v1214_v0 = vadd.f32 %v1198_v38, %v4113_v26  ;;  %v1291_v30 = vmul.f32 %v4092_v6, %v1268_v55  ;;  %v1236_v36 = vpop.permute.xlu1 %1235  ;;  %v5101_v18 = vld [vmem:[#allocation84_spill] sm:$0xff] }
 0x290   : > { %v1292_v28 = vmul.f32 %v4095_v8, %v1260_v19  ;;  %v1076_v46 = vsel %vm1069_vm6, %v5094_v4, %v5093_v11  ;;  %v1084_v39 = vsel %vm1069_vm6, %v5093_v11, %v5094_v4  ;;  %v1310_v22 = vadd.f32 %v1294_v49, %v1216_v57  ;;  %v1234_v32 = vpop.permute.xlu0 %1233  ;;  %v5100_v57 = vld [vmem:[#allocation85_spill] sm:$0xff] }
 0x291   : > { %v1309_v44 = vadd.f32 %v1293_v5, %v1215_v20  ;;  %v1203_v21 = vmul.f32 %v5079_v33, %v3906_v51  ;;  %v1204_v26 = vmul.f32 %v3743_v27, %v3902_v12  ;;  %v1307_v42 = vadd.f32 %v1291_v30, %v1213_v63  ;;  %v5098_v51 = vld [vmem:[#allocation22_spill] sm:$0xff]  ;;  %v5102_v19 = vld [vmem:[#allocation21_spill] sm:$0xff] }
 0x292   : > { %v1308_v60 = vadd.f32 %v1292_v28, %v1214_v0  ;;  %v1589_v40 = vsel %vm1584_vm1, %v5096_v23, %v5095_v59  ;;  %v1597_v34 = vsel %vm1584_vm1, %v5095_v59, %v5096_v23  ;;  %v4289_v24 = vadd.f32 %v5098_v51, %v1310_v22  ;;  %v5099_v12 = vld [vmem:[#allocation86_spill] sm:$0xff]  ;;  %v5104_v0 = vld [vmem:[#allocation52_spill] sm:$0xff] }
 0x293   : > { %v4286_v38 = vadd.f32 %v5097_v13, %v1309_v44  ;;  %v1201_v20 = vmul.f32 %v5079_v33, %v5099_v12  ;;  %v1202_v17 = vmul.f32 %v3743_v27, %v5100_v57  ;;  %v4296_v47 = vadd.f32 %v5101_v18, %v1307_v42  ;;  %v5103_v63 = vld [vmem:[#allocation54_spill] sm:$0xff]  ;;  %v1252_v11 = vpop.permute.xlu1 %1251 }
 0x294   : > { %v4299_v55 = vadd.f32 %v5102_v19, %v1308_v60  ;;  %v1111_v5 = vmul.f32 %v3710_v2, %v1084_v39  ;;  %v1112_v49 = vmul.f32 %v3713_v62, %v1076_v46  ;;  %v1077_v30 = vsel %vm1069_vm6, %v5104_v0, %v5103_v63  ;;  %v1250_v22 = vpop.permute.xlu0 %1249 }
 0x295   : > { %v1085_v28 = vsel %vm1069_vm6, %v5103_v63, %v5104_v0  ;;  %v1219_v4 = vadd.f32 %v1203_v21, %v1125_v53  ;;  %v1220_v44 = vadd.f32 %v1204_v26, %v1126_v45  ;;  %v1263_v42 = vsel %vm1257_vm7, %v1236_v36, %v1252_v11  ;;  %v5105_v63 = vld [vmem:[#allocation26_spill] sm:$0xff] }
 0x296   : > { %v1271_v46 = vsel %vm1257_vm7, %v1252_v11, %v1236_v36  ;;  %v1262_v39 = vsel %vm1257_vm7, %v1234_v32, %v1250_v22  ;;  %v1270_v60 = vsel %vm1257_vm7, %v1250_v22, %v1234_v32  ;;  %v1298_v23 = vmul.f32 %v4095_v8, %v1263_v42 }
 0x297   : > { %v1297_v59 = vmul.f32 %v4092_v6, %v1271_v46  ;;  %v1217_v13 = vadd.f32 %v1201_v20, %v1123_v10  ;;  %v1218_v53 = vadd.f32 %v1202_v17, %v1124_v37  ;;  %v1295_v45 = vmul.f32 %v4092_v6, %v1270_v60  ;;  %v1238_v57 = vpop.permute.xlu1 %1237 }
 0x298   : > { %v1296_v21 = vmul.f32 %v4095_v8, %v1262_v39  ;;  %v1113_v26 = vmul.f32 %v3710_v2, %v1085_v28  ;;  %v1114_v36 = vmul.f32 %v3713_v62, %v1077_v30  ;;  %v1314_v12 = vadd.f32 %v1298_v23, %v1220_v44  ;;  %v1240_v37 = vpop.permute.xlu0 %1239  ;;  %v5106_v30 = vld [vmem:[#allocation27_spill] sm:$0xff]  ;;  %v5108_v44 = vld [vmem:[#allocation25_spill] sm:$0xff] }
 0x299   : > { %v1313_v51 = vadd.f32 %v1297_v59, %v1219_v4  ;;  %v1205_v32 = vmul.f32 %v5079_v33, %v4075_v31  ;;  %v1206_v18 = vmul.f32 %v3743_v27, %v4071_v58  ;;  %v1311_v19 = vadd.f32 %v1295_v45, %v1217_v13  ;;  %v5107_v58 = vld [vmem:[#allocation24_spill] sm:$0xff] }
 0x29a   : > { %v1312_v10 = vadd.f32 %v1296_v21, %v1218_v53  ;;  %v1127_v20 = vadd.f32 %v1111_v5, %v3998_v54  ;;  %v1128_v17 = vadd.f32 %v1112_v49, %v4001_v16  ;;  %v4335_v28 = vadd.f32 %v5106_v30, %v1314_v12  ;;  %v5109_v54 = vld [vmem:[#allocation53_spill] sm:$0xff]  ;;  %v5110_v16 = vld [vmem:[#allocation51_spill] sm:$0xff] }
 0x29b   : > { %v4332_v0 = vadd.f32 %v5105_v63, %v1313_v51  ;;  %v1207_v11 = vmul.f32 %v5079_v33, %v4085_v7  ;;  %v1208_v31 = vmul.f32 %v3743_v27, %v4081_v1  ;;  %v4342_v4 = vadd.f32 %v5107_v58, %v1311_v19  ;;  %v1254_v42 = vpop.permute.xlu1 %1253  ;;  %v5111_v63 = vld [vmem:[#allocation61_spill] sm:$0xff]  ;;  %v5114_v58 = vld [vmem:[#allocation30_spill] sm:$0xff] }
 0x29c   : > { %v4345_v22 = vadd.f32 %v5108_v44, %v1312_v10  ;;  %v1590_v5 = vsel %vm1584_vm1, %v5110_v16, %v5109_v54  ;;  %v1598_v49 = vsel %vm1584_vm1, %v5109_v54, %v5110_v16  ;;  %v1129_v7 = vadd.f32 %v1113_v26, %v4034_v41  ;;  %v1256_v23 = vpop.permute.xlu0 %1255  ;;  %v5115_v54 = vld [vmem:[#allocation63_spill] sm:$0xff]  ;;  %v5116_v16 = vld [vmem:[#allocation16_spill] sm:$0xff] }
 0x29d   : > { %v1130_v1 = vadd.f32 %v1114_v36, %v4088_v50  ;;  %v1221_v46 = vadd.f32 %v1205_v32, %v1127_v20  ;;  %v1222_v39 = vadd.f32 %v1206_v18, %v1128_v17  ;;  %v1264_v60 = vsel %vm1257_vm7, %v1238_v57, %v1254_v42 }
 0x29e   : > { %v1272_v59 = vsel %vm1257_vm7, %v1254_v42, %v1238_v57  ;;  %v1300_v53 = vmul.f32 %v4095_v8, %v1264_v60  ;;  %v1265_v45 = vsel %vm1257_vm7, %v1240_v37, %v1256_v23  ;;  %v1273_v41 = vsel %vm1257_vm7, %v1256_v23, %v1240_v37  ;;  %v5119_v42 = vld [vmem:[#allocation28_spill] sm:$0xff]  ;;  %v5121_v23 = vld [vmem:[#allocation77_spill] sm:$0xff] }
 0x29f   : > { %v1299_v13 = vmul.f32 %v4092_v6, %v1272_v59  ;;  %v1223_v50 = vadd.f32 %v1207_v11, %v1129_v7  ;;  %v1224_v21 = vadd.f32 %v1208_v31, %v1130_v1  ;;  %v1301_v26 = vmul.f32 %v4092_v6, %v1273_v41  ;;  %v1367_v18 = vpop.permute.xlu1 %1366  ;;  %v5118_v7 = vld [vmem:[#allocation17_spill] sm:$0xff]  ;;  %v5120_v60 = vld [vmem:[#allocation76_spill] sm:$0xff]  ;;  %v5123_v41 = vld [vmem:[#allocation18_spill] sm:$0xff] }
 0x2a0   : > { %v1302_v36 = vmul.f32 %v4095_v8, %v1265_v45  ;;  %v4370_v51 = vmul.f32 %v5074_v25, %v1589_v40  ;;  %v4373_v12 = vmul.f32 %v5076_v29, %v1597_v34  ;;  %v1316_v32 = vadd.f32 %v1300_v53, %v1222_v39  ;;  %v1365_v17 = vpop.permute.xlu0 %1364  ;;  %v5112_v40 = vld [vmem:[#allocation62_spill] sm:$0xff]  ;;  %v5113_v34 = vld [vmem:[#allocation33_spill] sm:$0xff]  ;;  %v5122_v53 = vld [vmem:[#allocation19_spill] sm:$0xff] }
 0x2a1   : > { %v1315_v57 = vadd.f32 %v1299_v13, %v1221_v46  ;;  %v4376_v19 = vmul.f32 %v5074_v25, %v1590_v5  ;;  %v4379_v10 = vmul.f32 %v5076_v29, %v1598_v49  ;;  %v1317_v37 = vadd.f32 %v1301_v26, %v1223_v50  ;;  %v5117_v49 = vld [vmem:[#allocation64_spill] sm:$0xff]  ;;  %v5124_v26 = vld [vmem:[#allocation82_spill] sm:$0xff] }
 0x2a2   : > { %v1318_v20 = vadd.f32 %v1302_v36, %v1224_v21  ;;  %v1628_v30 = vmul.f32 %v5074_v25, %v5111_v63  ;;  %v1629_v11 = vmul.f32 %v5076_v29, %v5112_v40  ;;  %v4389_v44 = vadd.f32 %v5114_v58, %v1316_v32 }
 0x2a3   : > { %v4386_v31 = vadd.f32 %v5113_v34, %v1315_v57  ;;  %v1708_v5 = vmul.f32 %v5116_v16, %v5115_v54  ;;  %v1709_v1 = vmul.f32 %v5118_v7, %v5117_v49  ;;  %v1362_v46 = vadd.f32 %v5119_v42, %v1317_v37  ;;  %v1383_v21 = vpop.permute.xlu1 %1382  ;;  %v5125_v57 = vld [vmem:[#allocation83_spill] sm:$0xff]  ;;  %v5126_v34 = vld [vmem:[#allocation69_spill] sm:$0xff]  ;;  %v5127_v54 = vld [vmem:[#allocation70_spill] sm:$0xff] }
 0x2a4   : > { %v1363_v39 = vadd.f32 %v3968_v15, %v1318_v20  ;;  %v1710_v59 = vmul.f32 %v5116_v16, %v5120_v60  ;;  %v1711_v13 = vmul.f32 %v5118_v7, %v5121_v23  ;;  %v4403_v45 = vmul.f32 %v5116_v16, %v5122_v53  ;;  %v1381_v15 = vpop.permute.xlu0 %1380  ;;  %v5128_v53 = vld [vmem:[#allocation39_spill] sm:$0xff] }
 0x2a5   : > { %v4407_v50 = vmul.f32 %v5118_v7, %v5123_v41  ;;  %v1456_v36 = vadd.f32 %v5124_v26, %v1362_v46  ;;  %v1398_v37 = vsel %vm1396_vm4, %v1367_v18, %v1383_v21  ;;  %v1406_v20 = vsel %vm1396_vm4, %v1383_v21, %v1367_v18  ;;  %v5129_v21 = vld [vmem:[#allocation40_spill] sm:$0xff] }
 0x2a6   : > { %v1457_v32 = vadd.f32 %v5125_v57, %v1363_v39  ;;  %v1397_v63 = vsel %vm1396_vm4, %v1365_v17, %v1381_v15  ;;  %v1405_v40 = vsel %vm1396_vm4, %v1381_v15, %v1365_v17  ;;  %v1428_v58 = vmul.f32 %v5126_v34, %v1398_v37  ;;  %v5130_v57 = vld [vmem:[#allocation92_spill] sm:$0xff]  ;;  %v5131_v37 = vld [vmem:[#allocation93_spill] sm:$0xff] }
 0x2a7   : > { %v1429_v49 = vmul.f32 %v5127_v54, %v1406_v20  ;;  %v1683_v42 = vsel %vm1678_vm2, %v4011_v14, %v4105_v56  ;;  %v1691_v18 = vsel %vm1678_vm2, %v4105_v56, %v4011_v14  ;;  %v1426_v46 = vmul.f32 %v5126_v34, %v1397_v63  ;;  %v1371_v23 = vpop.permute.xlu1 %1370 }
 0x2a8   : > { %v1427_v39 = vmul.f32 %v5127_v54, %v1405_v40  ;;  %v1444_v17 = vadd.f32 %v1428_v58, %v4226_v48  ;;  %v1550_v41 = vadd.f32 %v5128_v53, %v1456_v36  ;;  %v1551_v26 = vadd.f32 %v5129_v21, %v1457_v32  ;;  %v1369_v63 = vpop.permute.xlu0 %1368  ;;  %v5132_v48 = vld [vmem:[#allocation88_spill] sm:$0xff]  ;;  %v5134_v21 = vld [vmem:[#allocation23_spill] sm:$0xff] }
 0x2a9   : > { %v1445_v60 = vadd.f32 %v1429_v49, %v4229_v35  ;;  %v1714_v15 = vmul.f32 %v5116_v16, %v5130_v57  ;;  %v4439_v20 = vmul.f32 %v5118_v7, %v5131_v37  ;;  %v1442_v14 = vadd.f32 %v1426_v46, %v4236_v43  ;;  %v5133_v35 = vld [vmem:[#allocation89_spill] sm:$0xff]  ;;  %v5135_v43 = vld [vmem:[#allocation87_spill] sm:$0xff] }
 0x2aa   : > { %v1443_v56 = vadd.f32 %v1427_v39, %v4239_v61  ;;  %v1538_v40 = vadd.f32 %v5132_v48, %v1444_v17  ;;  %v4445_v49 = vadd.f32 %v1628_v30, %v1550_v41  ;;  %v4447_v36 = vadd.f32 %v1629_v11, %v1551_v26  ;;  %v5136_v61 = vld [vmem:[#allocation94_spill] sm:$0xff]  ;;  %v5137_v39 = vld [vmem:[#allocation35_spill] sm:$0xff] }
 0x2ab   : > { %v1539_v58 = vadd.f32 %v5133_v35, %v1445_v60  ;;  %v4450_v32 = vmul.f32 %v5116_v16, %v1683_v42  ;;  %v4453_v53 = vmul.f32 %v5118_v7, %v1691_v18  ;;  %v1536_v57 = vadd.f32 %v5134_v21, %v1442_v14  ;;  %v5138_v11 = vld [vmem:[#allocation79_spill] sm:$0xff]  ;;  %v5139_v60 = vld [vmem:[#allocation80_spill] sm:$0xff]  ;;  %v1387_v41 = vpop.permute.xlu1 %1386  ;;  %v5140_v26 = vld [vmem:[#allocation58_spill] sm:$0xff] }
 0x2ac   : > { %v1537_v46 = vadd.f32 %v5135_v43, %v1443_v56  ;;  %v1684_v17 = vsel %vm1678_vm2, %v5137_v39, %v5136_v61  ;;  %v4465_v30 = vsel %vm1678_vm2, %v5136_v61, %v5137_v39  ;;  %v1632_v42 = vadd.f32 %v5138_v11, %v1538_v40  ;;  %v5141_v14 = vld [vmem:[#allocation56_spill] sm:$0xff]  ;;  %v1385_v48 = vpop.permute.xlu0 %1384 }
 0x2ad   : > { %v1633_v18 = vadd.f32 %v5139_v60, %v1539_v58  ;;  %v1630_v37 = vadd.f32 %v5140_v26, %v1536_v57  ;;  %v1400_v35 = vsel %vm1396_vm4, %v1371_v23, %v1387_v41  ;;  %v1408_v21 = vsel %vm1396_vm4, %v1387_v41, %v1371_v23 }
 0x2ae   : > { %v1631_v56 = vadd.f32 %v5141_v14, %v1537_v46  ;;  %v1726_v43 = vadd.f32 %v1710_v59, %v1632_v42  ;;  %v1399_v61 = vsel %vm1396_vm4, %v1369_v63, %v1385_v48  ;;  %v1407_v40 = vsel %vm1396_vm4, %v1385_v48, %v1369_v63  ;;  %v5142_v42 = vld [vmem:[#allocation8_spill] sm:$0xff] }
 0x2af   : > { %v1432_v58 = vmul.f32 %v5126_v34, %v1400_v35  ;;  %v1724_v39 = vadd.f32 %v1708_v5, %v1630_v37  ;;  %v1430_v57 = vmul.f32 %v5126_v34, %v1399_v61  ;;  %v1431_v46 = vmul.f32 %v5127_v54, %v1407_v40  ;;  %v1373_v26 = vpop.permute.xlu1 %1372  ;;  %v5143_v37 = vld [vmem:[#allocation9_spill] sm:$0xff]  ;;  %v5144_v40 = vld [vmem:[#allocation36_spill] sm:$0xff] }
 0x2b0   : > { %v1433_v11 = vmul.f32 %v5127_v54, %v1408_v21  ;;  %v1725_v23 = vadd.f32 %v1709_v1, %v1631_v56  ;;  %v1727_v59 = vadd.f32 %v1711_v13, %v1633_v18  ;;  %v1790_v41 = vadd.f32 %v5142_v42, %v1726_v43  ;;  %v1375_v5 = vpop.permute.xlu0 %1374  ;;  %v5145_v13 = vld [vmem:[#allocation90_spill] sm:$0xff]  ;;  %v5146_v56 = vld [vmem:[#allocation91_spill] sm:$0xff] }
 0x2b1   : > { %v1448_v60 = vadd.f32 %v1432_v58, %v4286_v38  ;;  %v1446_v14 = vadd.f32 %v1430_v57, %v4296_v47  ;;  %v1447_v63 = vadd.f32 %v1431_v46, %v4299_v55  ;;  %v1788_v35 = vadd.f32 %v5143_v37, %v1724_v39  ;;  %v5147_v47 = vld [vmem:[#allocation34_spill] sm:$0xff] }
 0x2b2   : > { %v1449_v48 = vadd.f32 %v1433_v11, %v4289_v24  ;;  %v1718_v61 = vmul.f32 %v5116_v16, %v1684_v17  ;;  %v1789_v38 = vadd.f32 %v5143_v37, %v1725_v23  ;;  %v1791_v1 = vadd.f32 %v5142_v42, %v1727_v59  ;;  %v5148_v17 = vld [vmem:[#allocation60_spill] sm:$0xff] }
 0x2b3   : > { %v1542_v21 = vadd.f32 %v5144_v40, %v1448_v60  ;;  %v1540_v18 = vadd.f32 %v5145_v13, %v1446_v14  ;;  %v1541_v43 = vadd.f32 %v5146_v56, %v1447_v63  ;;  %v1806_v55 = vmax.f32 %v1790_v41, 0.0  ;;  %v1389_v57 = vpop.permute.xlu1 %1388  ;;  %v5149_v60 = vld [vmem:[#allocation81_spill] sm:$0xff] }
 0x2b4   : > { %v1543_v58 = vadd.f32 %v5147_v47, %v1449_v48  ;;  %v1805_v46 = vmax.f32 %v1789_v38, 0.0  ;;  %v1807_v39 = vmax.f32 %v1791_v1, 0.0  ;;  %v1804_v11 = vmax.f32 %v1788_v35, 0.0  ;;  %v1391_v42 = vpop.permute.xlu0 %1390 }
 0x2b5   : > { %v1636_v24 = vadd.f32 %v4242_v9, %v1542_v21  ;;  %v1634_v8 = vadd.f32 %v5148_v17, %v1540_v18  ;;  %v1635_v40 = vadd.f32 %v5149_v60, %v1541_v43  ;;  %v1401_v59 = vsel %vm1396_vm4, %v1373_v26, %v1389_v57  ;;  %v5151_v43 = vld [vmem:[#allocation10_spill] sm:$0xff] }
 0x2b6   : > { %v1637_v23 = vadd.f32 %v4245_v52, %v1543_v58  ;;  %v1409_v41 = vsel %vm1396_vm4, %v1389_v57, %v1373_v26  ;;  %v1434_v9 = vmul.f32 %v5126_v34, %v1401_v59  ;;  %v1402_v63 = vsel %vm1396_vm4, %v1375_v5, %v1391_v42 }
 0x2b7   : > { %v1730_v14 = vadd.f32 %v1714_v15, %v1636_v24  ;;  %v1728_v48 = vadd.f32 %v4403_v45, %v1634_v8  ;;  %v1435_v37 = vmul.f32 %v5127_v54, %v1409_v41  ;;  %v1410_v52 = vsel %vm1396_vm4, %v1391_v42, %v1375_v5  ;;  %v5150_v45 = vld [vmem:[#allocation29_spill] sm:$0xff]  ;;  %v5153_v24 = vld [vmem:[#allocation31_spill] sm:$0xff] }
 0x2b8   : > { %v1436_v35 = vmul.f32 %v5126_v34, %v1402_v63  ;;  %v1450_v21 = vadd.f32 %v1434_v9, %v4342_v4  ;;  %v1437_v15 = vmul.f32 %v5127_v54, %v1410_v52  ;;  %v2492_v38 = vpack.c.bf16 %v1807_v39, %v1805_v46  ;;  %v5152_v4 = vld [vmem:[#allocation11_spill] sm:$0xff] }
 0x2b9   : > { %v2494_v26 = vpack.c.bf16 %v1806_v55, %v1804_v11  ;;  %v1451_v1 = vadd.f32 %v1435_v37, %v4345_v22  ;;  %v1729_v18 = vadd.f32 %v4407_v50, %v1635_v40  ;;  %v1731_v8 = vadd.f32 %v4439_v20, %v1637_v23  ;;  %v5154_v55 = vld [vmem:[#allocation37_spill] sm:$0xff]  ;;  %v5155_v20 = vld [vmem:[#allocation32_spill] sm:$0xff] }
 0x2ba   : > { %v1452_v13 = vadd.f32 %v1436_v35, %v4332_v0  ;;  %v1544_v56 = vadd.f32 %v5150_v45, %v1450_v21  ;;  %v1453_v5 = vadd.f32 %v1437_v15, %v4335_v28  ;;  %2493 = vmatprep.subr.bf16.mxu1 %v2492_v38  ;;  %v1792_v47 = vadd.f32 %v5151_v43, %v1728_v48  ;;  %v5156_v37 = vld [vmem:[#allocation12_spill] sm:$0xff]  ;;  %v5158_v35 = vld [vmem:[#allocation14_spill] sm:$0xff] }
 0x2bb   : > { %v1794_v58 = vadd.f32 %v5152_v4, %v1730_v14  ;;  %v1545_v57 = vadd.f32 %v5153_v24, %v1451_v1  ;;  %2495 = vmatpush1.bf16.msra.mxu1 %v2494_v26  ;;  %v1793_v0 = vadd.f32 %v5151_v43, %v1729_v18  ;;  %v1795_v22 = vadd.f32 %v5152_v4, %v1731_v8  ;;  %v5160_v18 = vld [vmem:[#allocation42_spill] sm:$0xff]  ;;  %v5161_v8 = vld [vmem:[#allocation41_spill] sm:$0xff] }
 0x2bc   : > { %v1546_v46 = vadd.f32 %v5154_v55, %v1452_v13  ;;  %v1638_v50 = vadd.f32 %v4370_v51, %v1544_v56  ;;  %v1547_v39 = vadd.f32 %v5155_v20, %v1453_v5  ;;  %v1808_v11 = vmax.f32 %v1792_v47, 0.0 }
 0x2bd   : > { %v1810_v28 = vmax.f32 %v1794_v58, 0.0  ;;  %v1639_v17 = vadd.f32 %v4373_v12, %v1545_v57  ;;  %v1809_v40 = vmax.f32 %v1793_v0, 0.0  ;;  %v1811_v23 = vmax.f32 %v1795_v22, 0.0  ;;  %v5157_v12 = vld [vmem:[#allocation15_spill] sm:$0xff]  ;;  %v5164_v22 = vld [vmem:[#allocation57_spill] sm:$0xff] }
 0x2be   : > { %v1640_v60 = vadd.f32 %v4376_v19, %v1546_v46  ;;  %v1719_v59 = vmul.f32 %v5118_v7, %v4465_v30  ;;  %v1732_v42 = vadd.f32 %v4450_v32, %v1638_v50  ;;  %v1641_v14 = vadd.f32 %v4379_v10, %v1547_v39  ;;  %v5159_v30 = vld [vmem:[#allocation13_spill] sm:$0xff]  ;;  %v5162_v57 = vld [vmem:[#allocation71_spill] sm:$0xff]  ;;  %v5163_v46 = vld [vmem:[#allocation72_spill] sm:$0xff] }
 0x2bf   : > { %v2498_v41 = vpack.c.bf16 %v1810_v28, %v1808_v11  ;;  %v2496_v51 = vpack.c.bf16 %v1811_v23, %v1809_v40  ;;  %v1733_v63 = vadd.f32 %v4453_v53, %v1639_v17  ;;  %v1403_v19 = vsel %vm1396_vm4, %v5158_v35, %v5157_v12  ;;  %v5165_v50 = vld [vmem:[#allocation55_spill] sm:$0xff] }
 0x2c0   : > { %v1734_v9 = vadd.f32 %v1718_v61, %v1640_v60  ;;  %v1735_v48 = vadd.f32 %v1719_v59, %v1641_v14  ;;  %v1796_v52 = vadd.f32 %v5156_v37, %v1732_v42  ;;  %v1411_v32 = vsel %vm1396_vm4, %v5157_v12, %v5158_v35 }
 0x2c1   : > { %2497 = vmatprep.subr.bf16.mxu1 %v2496_v51  ;;  %v1797_v10 = vadd.f32 %v5156_v37, %v1733_v63  ;;  %v1438_v26 = vmul.f32 %v5126_v34, %v1403_v19  ;;  %v1439_v1 = vmul.f32 %v5127_v54, %v1411_v32  ;;  %v1497_v45 = vsel %vm1490_vm5, %v5161_v8, %v5160_v18  ;;  %v1781_v5 = vpop.permute.xlu1 %1780  ;;  %v1786_v58 = vpop.permute.xlu0 %1785 }
 0x2c2   : > { %v1798_v61 = vadd.f32 %v5159_v30, %v1734_v9  ;;  %2499 = vmatpush1.bf16.msra.mxu1 %v2498_v41  ;;  %v1799_v53 = vadd.f32 %v5159_v30, %v1735_v48  ;;  %v1812_v21 = vmax.f32 %v1796_v52, 0.0  ;;  %v1505_v56 = vsel %vm1490_vm5, %v5160_v18, %v5161_v8  ;;  %v1820_v18 = vld [vmem:[%s4855_s4] sm:$0xff]  ;;  %v1822_v8 = vld [vmem:[%s4855_s4 + $0x10] sm:$0xff] }
 0x2c3   : > { %v1813_v15 = vmax.f32 %v1797_v10, 0.0  ;;  %v1454_v47 = vadd.f32 %v1438_v26, %v4386_v31  ;;  %v1455_v4 = vadd.f32 %v1439_v1, %v4389_v44  ;;  %v1532_v55 = vmul.f32 %v5162_v57, %v1497_v45  ;;  %v1823_v45 = vld [vmem:[%s4855_s4 + $0x18] sm:$0xff] }
 0x2c4   : > { %v1814_v38 = vmax.f32 %v1798_v61, 0.0  ;;  %v1815_v13 = vmax.f32 %v1799_v53, 0.0  ;;  %v1533_v0 = vmul.f32 %v5163_v46, %v1505_v56  ;;  %v1591_v20 = vsel %vm1584_vm1, %v5165_v50, %v5164_v22  ;;  %v1824_v56 = vld [vmem:[%s4855_s4 + $0x20] sm:$0xff] }
 0x2c5   : > { %v1599_v39 = vsel %vm1584_vm1, %v5164_v22, %v5165_v50  ;;  %v1659_v31 = vpop.permute.xlu1 %1658  ;;  %v1661_v44 = vpop.permute.xlu0 %1660  ;;  %v1548_v11 = vadd.f32 %v1532_v55, %v1454_v47  ;;  %v1626_v17 = vmul.f32 %v5074_v25, %v1591_v20  ;;  %v1827_v47 = vld [vmem:[%s4855_s4 + $0x38] sm:$0xff]  ;;  %v1833_v22 = vld [vmem:[%s4855_s4 + $0x68] sm:$0xff]  ;;  %v1834_v50 = vld [vmem:[%s4855_s4 + $0x70] sm:$0xff] }
 0x2c6   : > { %v2502_v43 = vpack.c.bf16 %v1814_v38, %v1812_v21  ;;  %v2500_v24 = vpack.c.bf16 %v1815_v13, %v1813_v15  ;;  %v1549_v28 = vadd.f32 %v1533_v0, %v1455_v4  ;;  %v1627_v60 = vmul.f32 %v5076_v29, %v1599_v39  ;;  %v1828_v4 = vld [vmem:[%s4855_s4 + $0x40] sm:$0xff]  ;;  %v1831_v55 = vld [vmem:[%s4855_s4 + $0x58] sm:$0xff] }
 0x2c7   : > { %v1642_v23 = vadd.f32 %v1626_v17, %v1548_v11  ;;  %v1832_v0 = vld [vmem:[%s4855_s4 + $0x60] sm:$0xff]  ;;  %v1835_v20 = vld [vmem:[%s4855_s4 + $0x78] sm:$0xff] }
 0x2c8   : > { %2501 = vmatprep.subr.bf16.mxu1 %v2500_v24  ;;  %v1643_v59 = vadd.f32 %v1627_v60, %v1549_v28  ;;  %v1830_v24 = vld [vmem:[%s4855_s4 + $0x50] sm:$0xff]  ;;  %v1836_v39 = vld [vmem:[%s4855_s4 + $0x80] sm:$0xff] }
 0x2c9   : > { %2503 = vmatpush1.bf16.msra.mxu1 %v2502_v43  ;;  %v1675_v40 = vpop.permute.xlu1 %1674  ;;  %v1677_v41 = vpop.permute.xlu0 %1676  ;;  %v1826_v43 = vld [vmem:[%s4855_s4 + $0x30] sm:$0xff] }
 0x2ca   : > { %v1685_v42 = vsel %vm1678_vm2, %v1659_v31, %v1675_v40  ;;  %v1693_v14 = vsel %vm1678_vm2, %v1675_v40, %v1659_v31  ;;  %v1686_v63 = vsel %vm1678_vm2, %v1661_v44, %v1677_v41  ;;  %v1694_v48 = vsel %vm1678_vm2, %v1677_v41, %v1661_v44  ;;  %v1837_v31 = vld [vmem:[%s4855_s4 + $0x88] sm:$0xff] }
 0x2cb   : > { %v1720_v9 = vmul.f32 %v5116_v16, %v1685_v42  ;;  %v1721_v51 = vmul.f32 %v5118_v7, %v1693_v14  ;;  %v1722_v37 = vmul.f32 %v5116_v16, %v1686_v63  ;;  %v1723_v52 = vmul.f32 %v5118_v7, %v1694_v48 }
 0x2cd   : > { %v1736_v12 = vadd.f32 %v1720_v9, %v1642_v23  ;;  %v1737_v35 = vadd.f32 %v1721_v51, %v1643_v59  ;;  %v1738_v19 = vadd.f32 %v1722_v37, %v4445_v49  ;;  %v1739_v32 = vadd.f32 %v1723_v52, %v4447_v36  ;;  %v1821_v36 = vld [vmem:[%s4855_s4 + $0x8] sm:$0xff] }
 0x2ce   : > { %v5166_v49 = vmov 0.0  }
 0x2cf   : > { %v1800_v10 = vadd.f32 %v1781_v5, %v1736_v12  ;;  %v1801_v30 = vadd.f32 %v1781_v5, %v1737_v35  ;;  %v1802_v61 = vadd.f32 %v1786_v58, %v1738_v19  ;;  %v1803_v53 = vadd.f32 %v1786_v58, %v1739_v32  ;;  %v1825_v5 = vld [vmem:[%s4855_s4 + $0x28] sm:$0xff] }
 0x2d0   : > { %v1829_v58 = vld [vmem:[%s4855_s4 + $0x48] sm:$0xff] }
 0x2d1   : > { %v1816_v21 = vmax.f32 %v1800_v10, 0.0  ;;  %v1817_v15 = vmax.f32 %v1801_v30, 0.0  ;;  %v1818_v38 = vmax.f32 %v1802_v61, 0.0  ;;  %v1819_v26 = vmax.f32 %v1803_v53, 0.0 }
 0x2d3   : > { %v2504_v1 = vpack.c.bf16 %v1819_v26, %v1817_v15  ;;  %v2506_v13 = vpack.c.bf16 %v1818_v38, %v1816_v21 }
 0x2d5   : > { %2505 = vmatprep.subr.bf16.mxu1 %v2504_v1 }
 0x2d6   : > { %2507 = vmatpush1.bf16.msra.mxu1 %v2506_v13 }
 0x2d9   : > { %2437 = vmatmul.mubr.msk.f32.vlgmr.msra.gmra.mrb[52].mxu1 %vm1838_vm8, %v1820_v18 }
 0x2da   : > { %1963 = vmatprep.mubr.f32.mxu1 %v5166_v49 }
 0x2dd   : > { %2438 = vmatmul.mubr.msk.f32.gmra.mrb[54].mxu1 %vm1838_vm8, %v1821_v36 }
 0x2de   : > { %1969 = vmatprep.mubr.f32.mxu1 %v5166_v49 }
 0x2e1   : > { %2439 = vmatmul.mubr.msk.f32.gmra.mrb[56].mxu1 %vm1838_vm8, %v1822_v8 }
 0x2e2   : > { %1975 = vmatprep.mubr.f32.mxu1 %v5166_v49 }
 0x2e5   : > { %2440 = vmatmul.mubr.msk.f32.gmra.mrb[58].mxu1 %vm1838_vm8, %v1823_v45 }
 0x2e6   : > { %1981 = vmatprep.mubr.f32.mxu1 %v5166_v49 }
 0x2e9   : > { %2441 = vmatmul.mubr.msk.f32.gmra.mrb[60].mxu1 %vm1838_vm8, %v1824_v56  ;;  %v2255_v56 = vld [vmem:[%s4858_s7] sm:$0x1f] }
 0x2ea   : > { %1987 = vmatprep.mubr.f32.mxu1 %v5166_v49 }
 0x2ed   : > { %2442 = vmatmul.mubr.msk.f32.gmra.mrb[62].mxu1 %vm1838_vm8, %v1825_v5  ;;  %v4718_v5 = vpop.permute.xlu1 %2238 }
 0x2ee   : > { %1993 = vmatprep.mubr.f32.mxu1 %v5166_v49 }
 0x2f1   : > { %2443 = vmatmul.mubr.msk.f32.gmra.mrb[64].mxu1 %vm1838_vm8, %v1826_v43  ;;  %v4720_v43 = vpop.permute.xlu0 %2243 }
 0x2f2   : > { %1999 = vmatprep.mubr.f32.mxu1 %v5166_v49 }
 0x2f5   : > { %2444 = vmatmul.mubr.msk.f32.gmra.mrb[66].mxu1 %vm1838_vm8, %v1827_v47 }
 0x2f6   : > { %2005 = vmatprep.mubr.f32.mxu1 %v5166_v49 }
 0x2f9   : > { %2445 = vmatmul.mubr.msk.f32.gmra.mrb[68].mxu1 %vm1838_vm8, %v1828_v4 }
 0x2fa   : > { %2011 = vmatprep.mubr.f32.mxu1 %v5166_v49 }
 0x2fd   : > { %2446 = vmatmul.mubr.msk.f32.gmra.mrb[70].mxu1 %vm1838_vm8, %v1829_v58 }
 0x2fe   : > { %2017 = vmatprep.mubr.f32.mxu1 %v5166_v49 }
 0x301   : > { %2447 = vmatmul.mubr.msk.f32.gmra.mrb[72].mxu1 %vm1838_vm8, %v1830_v24 }
 0x302   : > { %2023 = vmatprep.mubr.f32.mxu1 %v5166_v49 }
 0x305   : > { %2448 = vmatmul.mubr.msk.f32.gmra.mrb[74].mxu1 %vm1838_vm8, %v1831_v55 }
 0x306   : > { %2029 = vmatprep.mubr.f32.mxu1 %v5166_v49 }
 0x309   : > { %2449 = vmatmul.mubr.msk.f32.gmra.mrb[76].mxu1 %vm1838_vm8, %v1832_v0 }
 0x30a   : > { %2035 = vmatprep.mubr.f32.mxu1 %v5166_v49 }
 0x30d   : > { %2450 = vmatmul.mubr.msk.f32.gmra.mrb[78].mxu1 %vm1838_vm8, %v1833_v22 }
 0x30e   : > { %2041 = vmatprep.mubr.f32.mxu1 %v5166_v49 }
 0x311   : > { %2451 = vmatmul.mubr.msk.f32.gmra.mrb[80].mxu1 %vm1838_vm8, %v1834_v50 }
 0x312   : > { %2047 = vmatprep.mubr.f32.mxu1 %v5166_v49 }
 0x315   : > { %2452 = vmatmul.mubr.msk.f32.gmra.mrb[82].mxu1 %vm1838_vm8, %v1835_v20 }
 0x316   : > { %2053 = vmatprep.mubr.f32.mxu1 %v5166_v49 }
 0x319   : > { %2453 = vmatmul.mubr.msk.f32.gmra.mrb[84].mxu1 %vm1838_vm8, %v1836_v39 }
 0x31a   : > { %2059 = vmatprep.mubr.f32.mxu1 %v5166_v49 }
 0x31d   : > { %2454 = vmatmul.mubr.msk.f32.gmra.mrb[86].mxu1 %vm1838_vm8, %v1837_v31 }
 0x31e   : > { %2329 = vmatprep.mubr.f32.mxu1 %v5166_v49 }
 0x3ac   : > { %v1959_v44 = vpop.f32.mrb[52].mxu1 }
 0x3ad   : > { %2066 = vrot.lane.b32.xlu1 %v1959_v44, %s2701_s26  ;;  %v1961_v11 = vpop.f32.mrb[53].mxu1 }
 0x3b0   : > { %v1965_v28 = vpop.f32.mrb[54].mxu1 }
 0x3b1   : > { %2070 = vrot.lane.b32.xlu1 %v1961_v11, %s2701_s26  ;;  %2068 = vrot.lane.b32.xlu0 %v1965_v28, %s2701_s26  ;;  %v1967_v17 = vpop.f32.mrb[55].mxu1 }
 0x3b4   : > { %v1971_v60 = vpop.f32.mrb[56].mxu1 }
 0x3b5   : > { %2072 = vrot.lane.b32.xlu0 %v1967_v17, %s2701_s26  ;;  %2086 = vrot.lane.b32.xlu1 %v1971_v60, %s2703_s12  ;;  %v1973_v40 = vpop.f32.mrb[57].mxu1 }
 0x3b8   : > { %v1977_v23 = vpop.f32.mrb[58].mxu1 }
 0x3b9   : > { %2090 = vrot.lane.b32.xlu1 %v1973_v40, %s2703_s12  ;;  %2088 = vrot.lane.b32.xlu0 %v1977_v23, %s2703_s12  ;;  %v1979_v59 = vpop.f32.mrb[59].mxu1 }
 0x3bc   : > { %v1983_v42 = vpop.f32.mrb[60].mxu1 }
 0x3bd   : > { %2092 = vrot.lane.b32.xlu0 %v1979_v59, %s2703_s12  ;;  %2106 = vrot.lane.b32.xlu1 %v1983_v42, %s2705_s10  ;;  %v1985_v14 = vpop.f32.mrb[61].mxu1 }
 0x3c0   : > { %v1989_v41 = vpop.f32.mrb[62].mxu1 }
 0x3c1   : > { %2110 = vrot.lane.b32.xlu1 %v1985_v14, %s2705_s10  ;;  %2108 = vrot.lane.b32.xlu0 %v1989_v41, %s2705_s10  ;;  %v1991_v9 = vpop.f32.mrb[63].mxu1 }
 0x3c4   : > { %v1995_v51 = vpop.f32.mrb[64].mxu1 }
 0x3c5   : > { %2112 = vrot.lane.b32.xlu0 %v1991_v9, %s2705_s10  ;;  %2126 = vrot.lane.b32.xlu1 %v1995_v51, %s2707_s25  ;;  %v1997_v63 = vpop.f32.mrb[65].mxu1 }
 0x3c8   : > { %v2001_v48 = vpop.f32.mrb[66].mxu1 }
 0x3c9   : > { %2130 = vrot.lane.b32.xlu1 %v1997_v63, %s2707_s25  ;;  %2128 = vrot.lane.b32.xlu0 %v2001_v48, %s2707_s25  ;;  %v2003_v37 = vpop.f32.mrb[67].mxu1 }
 0x3cc   : > { %v4690_v52 = vpop.f32.mrb[68].mxu1 }
 0x3cd   : > { %2132 = vrot.lane.b32.xlu0 %v2003_v37, %s2707_s25  ;;  %v4693_v12 = vpop.f32.mrb[69].mxu1 }
 0x3d0   : > { %v4695_v35 = vpop.f32.mrb[70].mxu1 }
 0x3d1   : > { %v4697_v19 = vpop.f32.mrb[71].mxu1 }
 0x3d4   : > { %v2019_v32 = vpop.f32.mrb[72].mxu1 }
 0x3d5   : > { %2154 = vrot.lane.b32.xlu1 %v2019_v32, %s2700_s17  ;;  %v2021_v10 = vpop.f32.mrb[73].mxu1 }
 0x3d8   : > { %v2025_v30 = vpop.f32.mrb[74].mxu1 }
 0x3d9   : > { %2158 = vrot.lane.b32.xlu1 %v2021_v10, %s2700_s17  ;;  %2156 = vrot.lane.b32.xlu0 %v2025_v30, %s2700_s17  ;;  %v2027_v61 = vpop.f32.mrb[75].mxu1  ;;  %v5167_v30 = vld [vmem:[#allocation67_spill] sm:$0xff] }
 0x3dc   : > { %v2031_v53 = vpop.f32.mrb[76].mxu1 }
 0x3dd   : > { %2160 = vrot.lane.b32.xlu0 %v2027_v61, %s2700_s17  ;;  %2174 = vrot.lane.b32.xlu1 %v2031_v53, %s2702_s27  ;;  %v2033_v21 = vpop.f32.mrb[77].mxu1  ;;  %v5168_v53 = vld [vmem:[#allocation68_spill] sm:$0xff] }
 0x3e0   : > { %v2037_v15 = vpop.f32.mrb[78].mxu1 }
 0x3e1   : > { %2178 = vrot.lane.b32.xlu1 %v2033_v21, %s2702_s27  ;;  %2176 = vrot.lane.b32.xlu0 %v2037_v15, %s2702_s27  ;;  %v2039_v38 = vpop.f32.mrb[79].mxu1 }
 0x3e4   : > { %v2043_v26 = vpop.f32.mrb[80].mxu1 }
 0x3e5   : > { %2180 = vrot.lane.b32.xlu0 %v2039_v38, %s2702_s27  ;;  %2194 = vrot.lane.b32.xlu1 %v2043_v26, %s2704_s18  ;;  %v2045_v1 = vpop.f32.mrb[81].mxu1 }
 0x3e8   : > { %v2049_v13 = vpop.f32.mrb[82].mxu1 }
 0x3e9   : > { %2198 = vrot.lane.b32.xlu1 %v2045_v1, %s2704_s18  ;;  %2196 = vrot.lane.b32.xlu0 %v2049_v13, %s2704_s18  ;;  %v2051_v18 = vpop.f32.mrb[83].mxu1 }
 0x3ec   : > { %v2055_v49 = vpop.f32.mrb[84].mxu1 }
 0x3ed   : > { %2200 = vrot.lane.b32.xlu0 %v2051_v18, %s2704_s18  ;;  %2214 = vrot.lane.b32.xlu1 %v2055_v49, %s2706_s11  ;;  %v2057_v36 = vpop.f32.mrb[85].mxu1  ;;  %s2459_s18 = sshll.u32 %s5177_s9, 4 }
 0x3ee   : > { %s340_s25 = scalar_lea.vmem %s4859_s8, %s2459_s18 }
 0x3f0   : > { %v2061_v8 = vpop.f32.mrb[86].mxu1 }
 0x3f1   : > { %2218 = vrot.lane.b32.xlu1 %v2057_v36, %s2706_s11  ;;  %2216 = vrot.lane.b32.xlu0 %v2061_v8, %s2706_s11  ;;  %v2063_v45 = vpop.f32.mrb[87].mxu1 }
 0x3f5   : > { %2258 = vperm.xlu1 %2593, %v2255_v56   ;;  %2220 = vrot.lane.b32.xlu0 %v2063_v45, %s2706_s11 }
 0x41f   : > { %v2067_v47 = vpop.permute.xlu1 %2066 }
 0x423   : > { %v2071_v4 = vpop.permute.xlu1 %2070  ;;  %v2069_v58 = vpop.permute.xlu0 %2068 }
 0x424   : > { %v2074_v41 = vsel %vm976_vm3, %v2067_v47, %v2071_v4  ;;  %v2076_v9 = vsel %vm976_vm3, %v2071_v4, %v2067_v47 }
 0x425   : > { %v2078_v61 = vmul.f32 %v2076_v9, %v5167_v30  ;;  %v2079_v21 = vmul.f32 %v2074_v41, %v5168_v53 }
 0x427   : > { %v2087_v24 = vpop.permute.xlu1 %2086  ;;  %v2073_v55 = vpop.permute.xlu0 %2072 }
 0x428   : > { %v2075_v49 = vsel %vm976_vm3, %v2069_v58, %v2073_v55  ;;  %v2077_v36 = vsel %vm976_vm3, %v2073_v55, %v2069_v58 }
 0x429   : > { %v2080_v58 = vmul.f32 %v2077_v36, %v5167_v30  ;;  %v2081_v55 = vmul.f32 %v2075_v49, %v5168_v53  ;;  %v5170_v30 = vld [vmem:[#allocation73_spill] sm:$0xff] }
 0x42b   : > { %v2091_v0 = vpop.permute.xlu1 %2090  ;;  %v2089_v22 = vpop.permute.xlu0 %2088 }
 0x42c   : > { %v2094_v23 = vsel %vm1069_vm6, %v2087_v24, %v2091_v0  ;;  %v2096_v59 = vsel %vm1069_vm6, %v2091_v0, %v2087_v24 }
 0x42d   : > { %v2098_v51 = vmul.f32 %v2096_v59, %v3710_v2  ;;  %v2099_v63 = vmul.f32 %v2094_v23, %v3713_v62 }
 0x42f   : > { %v2093_v50 = vpop.permute.xlu0 %2092  ;;  %v2107_v20 = vpop.permute.xlu1 %2106  ;;  %v2102_v8 = vadd.f32 %v2098_v51, %v2078_v61  ;;  %v2103_v45 = vadd.f32 %v2099_v63, %v2079_v21  ;;  %v2146_v61 = vmul.f32 %v4690_v52, %v5170_v30 }
 0x430   : > { %v2095_v15 = vsel %vm1069_vm6, %v2089_v22, %v2093_v50  ;;  %v2097_v38 = vsel %vm1069_vm6, %v2093_v50, %v2089_v22 }
 0x431   : > { %v2100_v56 = vmul.f32 %v2097_v38, %v3710_v2  ;;  %v2101_v47 = vmul.f32 %v2095_v15, %v3713_v62 }
 0x433   : > { %v2109_v39 = vpop.permute.xlu0 %2108  ;;  %v2111_v31 = vpop.permute.xlu1 %2110  ;;  %v2105_v59 = vadd.f32 %v2101_v47, %v2081_v55 }
 0x434   : > { %v2114_v48 = vsel %vm1163_vm0, %v2107_v20, %v2111_v31  ;;  %v2116_v37 = vsel %vm1163_vm0, %v2111_v31, %v2107_v20  ;;  %v5169_v20 = vld [vmem:[#allocation38_spill] sm:$0xff] }
 0x435   : > { %v2118_v26 = vmul.f32 %v2116_v37, %v5079_v33  ;;  %v2119_v1 = vmul.f32 %v2114_v48, %v3743_v27 }
 0x437   : > { %v2113_v44 = vpop.permute.xlu0 %2112  ;;  %v2127_v11 = vpop.permute.xlu1 %2126  ;;  %v2123_v2 = vadd.f32 %v2119_v1, %v2103_v45 }
 0x438   : > { %v2115_v4 = vsel %vm1163_vm0, %v2109_v39, %v2113_v44  ;;  %v2117_v24 = vsel %vm1163_vm0, %v2113_v44, %v2109_v39  ;;  %v2104_v44 = vadd.f32 %v2100_v56, %v2080_v58 }
 0x439   : > { %v2120_v62 = vmul.f32 %v2117_v24, %v5079_v33 }
 0x43b   : > { %v2129_v28 = vpop.permute.xlu0 %2128  ;;  %v2131_v17 = vpop.permute.xlu1 %2130  ;;  %v2124_v53 = vadd.f32 %v2120_v62, %v2104_v44 }
 0x43c   : > { %v2134_v13 = vsel %vm1257_vm7, %v2127_v11, %v2131_v17  ;;  %v2136_v18 = vsel %vm1257_vm7, %v2131_v17, %v2127_v11  ;;  %v2122_v11 = vadd.f32 %v2118_v26, %v2102_v8  ;;  %v2121_v17 = vmul.f32 %v2115_v4, %v3743_v27 }
 0x43d   : > { %v2138_v50 = vmul.f32 %v2136_v18, %v4092_v6  ;;  %v2139_v31 = vmul.f32 %v2134_v13, %v5169_v20 }
 0x43e   : > { %v2125_v21 = vadd.f32 %v2121_v17, %v2105_v59 }
 0x43f   : > { %v2133_v60 = vpop.permute.xlu0 %2132  ;;  %v2142_v51 = vadd.f32 %v2138_v50, %v2122_v11  ;;  %v2143_v63 = vadd.f32 %v2139_v31, %v2123_v2 }
 0x440   : > { %v2135_v23 = vsel %vm1257_vm7, %v2129_v28, %v2133_v60  ;;  %v2137_v39 = vsel %vm1257_vm7, %v2133_v60, %v2129_v28  ;;  %v5171_v28 = vld [vmem:[#allocation78_spill] sm:$0xff] }
 0x441   : > { %v2140_v27 = vmul.f32 %v2137_v39, %v4092_v6  ;;  %v2141_v37 = vmul.f32 %v2135_v23, %v5169_v20  ;;  %v2147_v60 = vmul.f32 %v4693_v12, %v5171_v28  ;;  %v2150_v1 = vadd.f32 %v2146_v61, %v2142_v51 }
 0x442   : > { %v2149_v45 = vmul.f32 %v4697_v19, %v5171_v28 }
 0x443   : > { %v2151_v13 = vadd.f32 %v2147_v60, %v2143_v63  ;;  %v2144_v18 = vadd.f32 %v2140_v27, %v2124_v53  ;;  %v2145_v49 = vadd.f32 %v2141_v37, %v2125_v21 }
 0x445   : > { %v2153_v55 = vadd.f32 %v2149_v45, %v2145_v49 }
 0x447   : > { %v2155_v40 = vpop.permute.xlu1 %2154 }
 0x44b   : > { %v2159_v42 = vpop.permute.xlu1 %2158  ;;  %v2157_v14 = vpop.permute.xlu0 %2156 }
 0x44c   : > { %v2162_v48 = vsel %vm1396_vm4, %v2155_v40, %v2159_v42  ;;  %v2164_v33 = vsel %vm1396_vm4, %v2159_v42, %v2155_v40 }
 0x44d   : > { %v2166_v15 = vmul.f32 %v2162_v48, %v5126_v34  ;;  %v2167_v38 = vmul.f32 %v2164_v33, %v5127_v54 }
 0x44f   : > { %v2175_v32 = vpop.permute.xlu1 %2174  ;;  %v2161_v10 = vpop.permute.xlu0 %2160  ;;  %v2170_v4 = vadd.f32 %v2166_v15, %v2150_v1 }
 0x450   : > { %v2163_v52 = vsel %vm1396_vm4, %v2157_v14, %v2161_v10  ;;  %v2165_v12 = vsel %vm1396_vm4, %v2161_v10, %v2157_v14  ;;  %v2171_v14 = vadd.f32 %v2167_v38, %v2151_v13 }
 0x451   : > { %v2168_v10 = vmul.f32 %v2163_v52, %v5126_v34  ;;  %v2169_v24 = vmul.f32 %v2165_v12, %v5127_v54 }
 0x453   : > { %v2179_v0 = vpop.permute.xlu1 %2178  ;;  %v2177_v22 = vpop.permute.xlu0 %2176  ;;  %v2173_v17 = vadd.f32 %v2169_v24, %v2153_v55 }
 0x454   : > { %v2182_v26 = vsel %vm1490_vm5, %v2175_v32, %v2179_v0  ;;  %v2184_v6 = vsel %vm1490_vm5, %v2179_v0, %v2175_v32  ;;  %v2148_v32 = vmul.f32 %v4695_v35, %v5170_v30 }
 0x455   : > { %v2186_v56 = vmul.f32 %v2182_v26, %v5162_v57  ;;  %v2187_v47 = vmul.f32 %v2184_v6, %v5163_v46 }
 0x456   : > { %v2152_v58 = vadd.f32 %v2148_v32, %v2144_v18 }
 0x457   : > { %v2195_v41 = vpop.permute.xlu1 %2194  ;;  %v2181_v9 = vpop.permute.xlu0 %2180  ;;  %v2190_v11 = vadd.f32 %v2186_v56, %v2170_v4  ;;  %v2191_v2 = vadd.f32 %v2187_v47, %v2171_v14 }
 0x458   : > { %v2183_v20 = vsel %vm1490_vm5, %v2177_v22, %v2181_v9  ;;  %v2185_v35 = vsel %vm1490_vm5, %v2181_v9, %v2177_v22  ;;  %v2172_v62 = vadd.f32 %v2168_v10, %v2152_v58 }
 0x459   : > { %v2188_v23 = vmul.f32 %v2183_v20, %v5162_v57  ;;  %v2189_v22 = vmul.f32 %v2185_v35, %v5163_v46 }
 0x45b   : > { %v2199_v40 = vpop.permute.xlu1 %2198  ;;  %v2197_v42 = vpop.permute.xlu0 %2196  ;;  %v2192_v27 = vadd.f32 %v2188_v23, %v2172_v62  ;;  %v2193_v46 = vadd.f32 %v2189_v22, %v2173_v17 }
 0x45c   : > { %v2202_v36 = vsel %vm1584_vm1, %v2195_v41, %v2199_v40  ;;  %v2204_v8 = vsel %vm1584_vm1, %v2199_v40, %v2195_v41 }
 0x45d   : > { %v2206_v19 = vmul.f32 %v2202_v36, %v5074_v25  ;;  %v2207_v31 = vmul.f32 %v2204_v8, %v5076_v29 }
 0x45f   : > { %v2215_v0 = vpop.permute.xlu1 %2214  ;;  %v2201_v50 = vpop.permute.xlu0 %2200  ;;  %v2210_v59 = vadd.f32 %v2206_v19, %v2190_v11  ;;  %v2211_v41 = vadd.f32 %v2207_v31, %v2191_v2 }
 0x460   : > { %v2203_v34 = vsel %vm1584_vm1, %v2197_v42, %v2201_v50  ;;  %v2205_v54 = vsel %vm1584_vm1, %v2201_v50, %v2197_v42 }
 0x461   : > { %v2208_v63 = vmul.f32 %v2203_v34, %v5074_v25  ;;  %v2209_v48 = vmul.f32 %v2205_v54, %v5076_v29 }
 0x463   : > { %v2219_v39 = vpop.permute.xlu1 %2218  ;;  %v2217_v44 = vpop.permute.xlu0 %2216  ;;  %v2212_v53 = vadd.f32 %v2208_v63, %v2192_v27  ;;  %v2213_v21 = vadd.f32 %v2209_v48, %v2193_v46 }
 0x464   : > { %v2222_v9 = vsel %vm1678_vm2, %v2215_v0, %v2219_v39  ;;  %v2224_v51 = vsel %vm1678_vm2, %v2219_v39, %v2215_v0 }
 0x465   : > { %v2226_v33 = vmul.f32 %v2222_v9, %v5116_v16  ;;  %v2227_v57 = vmul.f32 %v2224_v51, %v5118_v7 }
 0x467   : > { %v2230_v37 = vadd.f32 %v2226_v33, %v2210_v59  ;;  %v2231_v30 = vadd.f32 %v2227_v57, %v2211_v41  ;;  %v2221_v61 = vpop.permute.xlu0 %2220 }
 0x468   : > { %v2223_v28 = vsel %vm1678_vm2, %v2217_v44, %v2221_v61  ;;  %v2225_v60 = vsel %vm1678_vm2, %v2221_v61, %v2217_v44 }
 0x469   : > { %v2228_v25 = vmul.f32 %v2223_v28, %v5116_v16  ;;  %v2229_v29 = vmul.f32 %v2225_v60, %v5118_v7  ;;  %v2246_v15 = vadd.f32 %v4718_v5, %v2230_v37  ;;  %v2247_v6 = vadd.f32 %v4718_v5, %v2231_v30  ;;  %v2254_v7 = vld [vmem:[%s4857_s6] sm:$0x1f] }
 0x46b   : > { %v2232_v38 = vadd.f32 %v2228_v25, %v2212_v53  ;;  %v2233_v26 = vadd.f32 %v2229_v29, %v2213_v21  ;;  %v2250_v3 = vmax.f32 %v2246_v15, 0.0  ;;  %v2251_v13 = vmax.f32 %v2247_v6, 0.0 }
 0x46d   : > { %v2248_v40 = vadd.f32 %v4720_v43, %v2232_v38  ;;  %v2249_v42 = vadd.f32 %v4720_v43, %v2233_v26 }
 0x46f   : > { %v2252_v1 = vmax.f32 %v2248_v40, 0.0  ;;  %v2253_v52 = vmax.f32 %v2249_v42, 0.0 }
 0x471   : > { %v2508_v12 = vpack.c.bf16 %v2253_v52, %v2251_v13  ;;  %v2510_v16 = vpack.c.bf16 %v2252_v1, %v2250_v3 }
 0x473   : > { %2509 = vmatprep.subr.bf16.mxu1 %v2508_v12 }
 0x474   : > { %2511 = vmatpush1.bf16.msra.mxu1 %v2510_v16  ;;  %v2259_v5 = vpop.permute.xlu1 %2258 }
 0x477   : > { %2455 = vmatmul.mubr.msk.f32.vlgmr.msra.gmra.mrb[88].mxu1 %vm2261_vm9, %v2254_v7 }
 0x54a   : > { %v2331_v18 = vpop.f32.mrb[88].mxu1 }
 0x54b   : > { %v2332_v43 = vadd.f32 %v2331_v18, %v2259_v5  ;;  %v2333_v49 = vpop.f32.mrb[89].mxu1 }
 0x54c   : > { %v2334_v36 = vadd.f32 %v2333_v49, %v2259_v5 }
 0x54d   : > { %v2336_v8 = vmax.f32 %v2332_v43, 0.0 }
 0x54e   : > { %v2337_v32 = vmax.f32 %v2334_v36, 0.0 }
 0x54f   : > { %2338 = vst [vmem:[%s340_s25] sm:$0x1f] %v2336_v8 }
 0x550   : > { %2339 = vst [vmem:[%s340_s25 + $0x8] sm:$0x1f] %v2337_v32 }
 0x551 PF: > { %p19_p8 = scmp.ge.s32.totalorder %s2797_s15, 4   ;;  %s5172_s27 = smov %s2682_s28 }
 0x552   : > { %s5173_s28 = smov %s2686_s29  ;;  %s5174_s29 = smov %s2823_s19 }
 0x553   : > { %s5175_s30 = smov %s2797_s15  ;;  %21 = sbr.rel (!%p19_p8) target bundleno = 4 (0x4), region = 104 }
 0x55a   :  { %2361 = vsyncpa [#allocation3], 1 }
 0x55b   :  { %2363 = vsyncpa [#allocation3 + $0x1], 1 }
 0x55c   :  { %2364 = vsyncpa [#allocation5], 1 }

</bundles_post_ra>
